<compile_context>
chip_gen: v7x
topology: tpu7x:2x2x1
jax: 0.10.0
libtpu: 0.0.40
codegen_flags: <defaults>
</compile_context>

<pallas_src>
import functools

import jax
import jax.numpy as jnp
from jax import lax
from jax.experimental import pallas as pl
from jax.experimental.pallas import tpu as pltpu


TM_MAX = 512                      # M-tile (rows); multiple of 8, v5e/v6e/v7x safe
_VMEM_LIMIT = 32 * 1024 * 1024    # raise scoped VMEM above v5e's 16 MiB default


def _choose_tm(m):
    # Full-extent block when small (always legal), otherwise an 8-aligned tile.
    return m if m <= TM_MAX else TM_MAX


# ----------------------------------------------------------------------------
# Pallas kernels
# ----------------------------------------------------------------------------
def _linear_kernel(x_ref, w_ref, b_ref, o_ref, *, apply_relu):
    # bf16 x bf16 -> f32 accumulation on the MXU
    acc = jnp.dot(x_ref[...], w_ref[...], preferred_element_type=jnp.float32)
    acc = acc + b_ref[...]                      # (1, N) broadcast over rows
    if apply_relu:
        acc = jnp.maximum(acc, 0.0)
    o_ref[...] = acc.astype(o_ref.dtype)


def _mlp_head_kernel(x_ref, w1_ref, b1_ref, w2_ref, b2_ref, o_ref):
    # value = relu(x @ W1 + b1) @ W2 + b2, fully fused; hidden stays in VMEM.
    h = jnp.dot(x_ref[...], w1_ref[...], preferred_element_type=jnp.float32)
    h = jnp.maximum(h + b1_ref[...], 0.0)
    v = jnp.dot(h.astype(w2_ref.dtype), w2_ref[...],
                preferred_element_type=jnp.float32)
    o_ref[...] = (v + b2_ref[...]).astype(o_ref.dtype)


def pallas_linear(x, w_mat, b, *, apply_relu, out_dtype=jnp.bfloat16):
    """relu?(x @ w_mat + b), M-tiled grid, weights/bias resident per tile."""
    M, K = x.shape
    K2, N = w_mat.shape
    assert K == K2
    tm = _choose_tm(M)
    grid_m = pl.cdiv(M, tm)
    b2 = b.reshape(1, N).astype(jnp.float32)
    kernel = functools.partial(_linear_kernel, apply_relu=apply_relu)
    return pl.pallas_call(
        kernel,
        out_shape=jax.ShapeDtypeStruct((M, N), out_dtype),
        grid=(grid_m,),
        in_specs=[
            pl.BlockSpec((tm, K), lambda i: (i, 0)),
            pl.BlockSpec((K, N), lambda i: (0, 0)),
            pl.BlockSpec((1, N), lambda i: (0, 0)),
        ],
        out_specs=pl.BlockSpec((tm, N), lambda i: (i, 0)),
        compiler_params=pltpu.CompilerParams(
            dimension_semantics=("parallel",),
            vmem_limit_bytes=_VMEM_LIMIT),
    )(x.astype(jnp.bfloat16), w_mat.astype(jnp.bfloat16), b2)


def pallas_mlp_head(x, w1, b1, w2, b2):
    """Fused fc1(ReLU)+fc2 head: one kernel, one (M, 1) output."""
    M, K1 = x.shape
    K1b, H = w1.shape
    Hb, NO = w2.shape
    assert K1 == K1b and H == Hb
    tm = _choose_tm(M)
    grid_m = pl.cdiv(M, tm)
    b1r = b1.reshape(1, H).astype(jnp.float32)
    b2r = b2.reshape(1, NO).astype(jnp.float32)
    return pl.pallas_call(
        _mlp_head_kernel,
        out_shape=jax.ShapeDtypeStruct((M, NO), jnp.float32),
        grid=(grid_m,),
        in_specs=[
            pl.BlockSpec((tm, K1), lambda i: (i, 0)),
            pl.BlockSpec((K1, H), lambda i: (0, 0)),
            pl.BlockSpec((1, H), lambda i: (0, 0)),
            pl.BlockSpec((H, NO), lambda i: (0, 0)),
            pl.BlockSpec((1, NO), lambda i: (0, 0)),
        ],
        out_specs=pl.BlockSpec((tm, NO), lambda i: (i, 0)),
        compiler_params=pltpu.CompilerParams(
            dimension_semantics=("parallel",),
            vmem_limit_bytes=_VMEM_LIMIT),
    )(x.astype(jnp.bfloat16), w1.astype(jnp.bfloat16), b1r,
      w2.astype(jnp.bfloat16), b2r)


# ----------------------------------------------------------------------------
# Conv layer = fused patch extraction (one XLA op) + Pallas GEMM, NHWC in/out
# ----------------------------------------------------------------------------
def conv2d_relu_nhwc(x_nhwc, w_mat, b, *, k, s):
    """x: (N,H,W,C) -> (N,OH,OW,O). w_mat: (C*k*k, O) with rows ordered (c,kh,kw)."""
    n, h, w, c = x_nhwc.shape
    oh = (h - k) // s + 1
    ow = (w - k) // s + 1
    # Feature dim of patches is ordered (c, kh, kw) -- matches w_mat row order.
    patches = lax.conv_general_dilated_patches(
        x_nhwc, filter_shape=(k, k), window_strides=(s, s), padding="VALID",
        dimension_numbers=("NHWC", "HWIO", "NHWC"))
    o = w_mat.shape[1]
    y = pallas_linear(patches.reshape(n * oh * ow, c * k * k), w_mat, b,
                      apply_relu=True)              # (N*OH*OW, O) bf16
    return y.reshape(n, oh, ow, o)                  # stay NHWC


# ----------------------------------------------------------------------------
# Parameter construction / one-time layout preparation
# ----------------------------------------------------------------------------
def conv_out(h, k, s):
    return (h - k) // s + 1


def conv_spatial(state_dim):
    _, h, w = state_dim
    h1, w1 = conv_out(h, 8, 4), conv_out(w, 8, 4)
    h2, w2 = conv_out(h1, 4, 2), conv_out(w1, 4, 2)
    h3, w3 = conv_out(h2, 3, 1), conv_out(w2, 3, 1)
    return h3, w3


def feature_size(state_dim):
    h3, w3 = conv_spatial(state_dim)
    return 64 * h3 * w3


def init_critic_params(key, state_dim):
    """Deterministic synthetic init in PyTorch layouts (shapes match the module)."""
    c_in = state_dim[0]
    feat = feature_size(state_dim)
    keys = jax.random.split(key, 5)

    def w_init(k, shape, scale):
        return scale * jax.random.normal(k, shape, jnp.float32)

    return {
        "conv1_w": w_init(keys[0], (32, c_in, 8, 8), 0.05),
        "conv1_b": jnp.zeros((32,), jnp.float32),
        "conv2_w": w_init(keys[1], (64, 32, 4, 4), 0.05),
        "conv2_b": jnp.zeros((64,), jnp.float32),
        "conv3_w": w_init(keys[2], (64, 64, 3, 3), 0.05),
        "conv3_b": jnp.zeros((64,), jnp.float32),
        # PyTorch nn.Linear weight layout: (out_features, in_features)
        "fc1_w": w_init(keys[3], (512, feat), 0.05),
        "fc1_b": jnp.zeros((512,), jnp.float32),
        "fc2_w": w_init(keys[4], (1, 512), 0.01),
        "fc2_b": jnp.zeros((1,), jnp.float32),
    }


def prepare_params(raw, state_dim):
    """One-time conversion to GEMM-ready bf16 layouts (no per-forward reshapes)."""
    h3, w3 = conv_spatial(state_dim)
    feat = 64 * h3 * w3

    def conv_w(w):
        # (O, C, kh, kw) -> (C*kh*kw, O), rows ordered (c, kh, kw) to match patches
        o, c, kh, kw = w.shape
        return (jnp.transpose(w, (1, 2, 3, 0))
                .reshape(c * kh * kw, o).astype(jnp.bfloat16))

    # fc1 columns are in PyTorch NCHW-flatten order (c, h, w); permute once to
    # NHWC-flatten order (h, w, c) so the activation never needs a transpose.
    fc1 = raw["fc1_w"].reshape(512, 64, h3, w3)
    fc1 = jnp.transpose(fc1, (0, 2, 3, 1)).reshape(512, feat)

    return {
        "conv1_w": conv_w(raw["conv1_w"]), "conv1_b": raw["conv1_b"],
        "conv2_w": conv_w(raw["conv2_w"]), "conv2_b": raw["conv2_b"],
        "conv3_w": conv_w(raw["conv3_w"]), "conv3_b": raw["conv3_b"],
        "fc1_w": fc1.T.astype(jnp.bfloat16),              # (feat, 512)
        "fc1_b": raw["fc1_b"],
        "fc2_w": raw["fc2_w"].T.astype(jnp.bfloat16),     # (512, 1)
        "fc2_b": raw["fc2_b"],
    }


# ----------------------------------------------------------------------------
# Critic forward pass
# ----------------------------------------------------------------------------
def critic_forward(params, x):
    # x: (N, C, H, W) float32 -- NCHW interface, same as the PyTorch module.
    # Single transpose to NHWC; everything downstream stays NHWC.
    x = jnp.transpose(x, (0, 2, 3, 1)).astype(jnp.bfloat16)
    x = conv2d_relu_nhwc(x, params["conv1_w"], params["conv1_b"], k=8, s=4)
    x = conv2d_relu_nhwc(x, params["conv2_w"], params["conv2_b"], k=4, s=2)
    x = conv2d_relu_nhwc(x, params["conv3_w"], params["conv3_b"], k=3, s=1)
    n = x.shape[0]
    x = x.reshape(n, -1)   # NHWC flatten; fc1_w columns pre-permuted to match
    value = pallas_mlp_head(x, params["fc1_w"], params["fc1_b"],
                            params["fc2_w"], params["fc2_b"])
    return value           # (N, 1) float32


if __name__ == "__main__":
    # Atari-style input: state_dim = (4, 84, 84), batch = 2
    state_dim = (4, 84, 84)
    batch = 2

    key = jax.random.PRNGKey(0)
    k_params, k_x = jax.random.split(key)
    raw_params = init_critic_params(k_params, state_dim)
    params = prepare_params(raw_params, state_dim)        # one-time layout prep
    x = jax.random.normal(k_x, (batch,) + state_dim, jnp.float32)

    fwd = jax.jit(critic_forward)
    value = fwd(params, x)
    jax.block_until_ready(value)

    assert value.shape == (batch, 1)
    assert value.dtype == jnp.float32
    assert bool(jnp.all(jnp.isfinite(value)))
    print("KERNEL_OK")
</pallas_src>

<mosaic_0001>
module attributes {stable_mosaic.version = 11 : i64} {
  func.func @_linear_kernel(%arg0: i32, %arg1: memref<512x256xbf16, #tpu.memory_space<vmem>>, %arg2: memref<256x32xbf16, #tpu.memory_space<vmem>>, %arg3: memref<1x32xf32, #tpu.memory_space<vmem>>, %arg4: memref<512x32xbf16, #tpu.memory_space<vmem>>) attributes {dimension_semantics = [#tpu.dimension_semantics<parallel>], iteration_bounds = array<i64: 2>, scalar_prefetch = 0 : i64, scratch_operands = 0 : i64, tpu.core_type = #tpu.core_type<tc>, window_params = [{transform_indices = @transform_0, window_bounds = array<i64: 512, 256>}, {pipeline_mode = #tpu.pipeline_mode<synchronous>, transform_indices = @transform_1, window_bounds = array<i64: 256, 32>}, {pipeline_mode = #tpu.pipeline_mode<synchronous>, transform_indices = @transform_2, window_bounds = array<i64: 1, 32>}, {transform_indices = @transform_3, window_bounds = array<i64: 512, 32>}]} {
    %c0 = arith.constant 0 : index
    %c0_0 = arith.constant 0 : index
    %0 = vector.load %arg1[%c0, %c0_0] : memref<512x256xbf16, #tpu.memory_space<vmem>>, vector<512x256xbf16>
    %c0_1 = arith.constant 0 : index
    %c0_2 = arith.constant 0 : index
    %1 = vector.load %arg2[%c0_1, %c0_2] : memref<256x32xbf16, #tpu.memory_space<vmem>>, vector<256x32xbf16>
    %cst = arith.constant dense<0.000000e+00> : vector<512x32xf32>
    %2 = tpu.matmul %0, %1, %cst {dimension_numbers = #tpu.dot_dimension_numbers<[1], [0], [0], [1], [0, 0, 1, 1], [], []>} : vector<512x256xbf16>, vector<256x32xbf16>, vector<512x32xf32> -> vector<512x32xf32>
    %c0_3 = arith.constant 0 : index
    %c0_4 = arith.constant 0 : index
    %3 = vector.load %arg3[%c0_3, %c0_4] : memref<1x32xf32, #tpu.memory_space<vmem>>, vector<1x32xf32>
    %4 = vector.broadcast %3 : vector<1x32xf32> to vector<512x32xf32>
    %5 = arith.addf %2, %4 : vector<512x32xf32>
    %cst_5 = arith.constant 0.000000e+00 : f32
    %6 = vector.broadcast %cst_5 : f32 to vector<512x32xf32>
    %7 = arith.maximumf %5, %6 : vector<512x32xf32>
    %8 = arith.truncf %7 : vector<512x32xf32> to vector<512x32xbf16>
    %c0_6 = arith.constant 0 : index
    %c0_7 = arith.constant 0 : index
    %9 = vector.load %arg4[%c0_6, %c0_7] : memref<512x32xbf16, #tpu.memory_space<vmem>>, vector<512x32xbf16>
    tpu.vector_store %arg4[%c0_6, %c0_7], %8 {strides = array<i32>} : memref<512x32xbf16, #tpu.memory_space<vmem>>, vector<512x32xbf16>,
    return
  }
  func.func @transform_0(%arg0: i32) -> (i32, i32) {
    %c0_i32 = arith.constant 0 : i32
    %c0_i32_0 = arith.constant 0 : i32
    return %arg0, %c0_i32 : i32, i32
  }
  func.func @transform_1(%arg0: i32) -> (i32, i32) {
    %c0_i32 = arith.constant 0 : i32
    %c0_i32_0 = arith.constant 0 : i32
    %c0_i32_1 = arith.constant 0 : i32
    return %c0_i32, %c0_i32_0 : i32, i32
  }
  func.func @transform_2(%arg0: i32) -> (i32, i32) {
    %c0_i32 = arith.constant 0 : i32
    %c0_i32_0 = arith.constant 0 : i32
    %c0_i32_1 = arith.constant 0 : i32
    return %c0_i32, %c0_i32_0 : i32, i32
  }
  func.func @transform_3(%arg0: i32) -> (i32, i32) {
    %c0_i32 = arith.constant 0 : i32
    %c0_i32_0 = arith.constant 0 : i32
    return %arg0, %c0_i32 : i32, i32
  }
}

module attributes {stable_mosaic.version = 11 : i64} {
  func.func @_linear_kernel(%arg0: i32, %arg1: memref<162x512xbf16, #tpu.memory_space<vmem>>, %arg2: memref<512x64xbf16, #tpu.memory_space<vmem>>, %arg3: memref<1x64xf32, #tpu.memory_space<vmem>>, %arg4: memref<162x64xbf16, #tpu.memory_space<vmem>>) attributes {dimension_semantics = [#tpu.dimension_semantics<parallel>], iteration_bounds = array<i64: 1>, scalar_prefetch = 0 : i64, scratch_operands = 0 : i64, tpu.core_type = #tpu.core_type<tc>, window_params = [{transform_indices = @transform_0, window_bounds = array<i64: 162, 512>}, {pipeline_mode = #tpu.pipeline_mode<synchronous>, transform_indices = @transform_1, window_bounds = array<i64: 512, 64>}, {pipeline_mode = #tpu.pipeline_mode<synchronous>, transform_indices = @transform_2, window_bounds = array<i64: 1, 64>}, {transform_indices = @transform_3, window_bounds = array<i64: 162, 64>}]} {
    %c0 = arith.constant 0 : index
    %c0_0 = arith.constant 0 : index
    %0 = vector.load %arg1[%c0, %c0_0] : memref<162x512xbf16, #tpu.memory_space<vmem>>, vector<162x512xbf16>
    %c0_1 = arith.constant 0 : index
    %c0_2 = arith.constant 0 : index
    %1 = vector.load %arg2[%c0_1, %c0_2] : memref<512x64xbf16, #tpu.memory_space<vmem>>, vector<512x64xbf16>
    %cst = arith.constant dense<0.000000e+00> : vector<162x64xf32>
    %2 = tpu.matmul %0, %1, %cst {dimension_numbers = #tpu.dot_dimension_numbers<[1], [0], [0], [1], [0, 0, 1, 1], [], []>} : vector<162x512xbf16>, vector<512x64xbf16>, vector<162x64xf32> -> vector<162x64xf32>
    %c0_3 = arith.constant 0 : index
    %c0_4 = arith.constant 0 : index
    %3 = vector.load %arg3[%c0_3, %c0_4] : memref<1x64xf32, #tpu.memory_space<vmem>>, vector<1x64xf32>
    %4 = vector.broadcast %3 : vector<1x64xf32> to vector<162x64xf32>
    %5 = arith.addf %2, %4 : vector<162x64xf32>
    %cst_5 = arith.constant 0.000000e+00 : f32
    %6 = vector.broadcast %cst_5 : f32 to vector<162x64xf32>
    %7 = arith.maximumf %5, %6 : vector<162x64xf32>
    %8 = arith.truncf %7 : vector<162x64xf32> to vector<162x64xbf16>
    %c0_6 = arith.constant 0 : index
    %c0_7 = arith.constant 0 : index
    %9 = vector.load %arg4[%c0_6, %c0_7] : memref<162x64xbf16, #tpu.memory_space<vmem>>, vector<162x64xbf16>
    tpu.vector_store %arg4[%c0_6, %c0_7], %8 {strides = array<i32>} : memref<162x64xbf16, #tpu.memory_space<vmem>>, vector<162x64xbf16>,
    return
  }
  func.func @transform_0(%arg0: i32) -> (i32, i32) {
    %c0_i32 = arith.constant 0 : i32
    %c0_i32_0 = arith.constant 0 : i32
    return %arg0, %c0_i32 : i32, i32
  }
  func.func @transform_1(%arg0: i32) -> (i32, i32) {
    %c0_i32 = arith.constant 0 : i32
    %c0_i32_0 = arith.constant 0 : i32
    %c0_i32_1 = arith.constant 0 : i32
    return %c0_i32, %c0_i32_0 : i32, i32
  }
  func.func @transform_2(%arg0: i32) -> (i32, i32) {
    %c0_i32 = arith.constant 0 : i32
    %c0_i32_0 = arith.constant 0 : i32
    %c0_i32_1 = arith.constant 0 : i32
    return %c0_i32, %c0_i32_0 : i32, i32
  }
  func.func @transform_3(%arg0: i32) -> (i32, i32) {
    %c0_i32 = arith.constant 0 : i32
    %c0_i32_0 = arith.constant 0 : i32
    return %arg0, %c0_i32 : i32, i32
  }
}

module attributes {stable_mosaic.version = 11 : i64} {
  func.func @_linear_kernel(%arg0: i32, %arg1: memref<98x576xbf16, #tpu.memory_space<vmem>>, %arg2: memref<576x64xbf16, #tpu.memory_space<vmem>>, %arg3: memref<1x64xf32, #tpu.memory_space<vmem>>, %arg4: memref<98x64xbf16, #tpu.memory_space<vmem>>) attributes {dimension_semantics = [#tpu.dimension_semantics<parallel>], iteration_bounds = array<i64: 1>, scalar_prefetch = 0 : i64, scratch_operands = 0 : i64, tpu.core_type = #tpu.core_type<tc>, window_params = [{transform_indices = @transform_0, window_bounds = array<i64: 98, 576>}, {pipeline_mode = #tpu.pipeline_mode<synchronous>, transform_indices = @transform_1, window_bounds = array<i64: 576, 64>}, {pipeline_mode = #tpu.pipeline_mode<synchronous>, transform_indices = @transform_2, window_bounds = array<i64: 1, 64>}, {transform_indices = @transform_3, window_bounds = array<i64: 98, 64>}]} {
    %c0 = arith.constant 0 : index
    %c0_0 = arith.constant 0 : index
    %0 = vector.load %arg1[%c0, %c0_0] : memref<98x576xbf16, #tpu.memory_space<vmem>>, vector<98x576xbf16>
    %c0_1 = arith.constant 0 : index
    %c0_2 = arith.constant 0 : index
    %1 = vector.load %arg2[%c0_1, %c0_2] : memref<576x64xbf16, #tpu.memory_space<vmem>>, vector<576x64xbf16>
    %cst = arith.constant dense<0.000000e+00> : vector<98x64xf32>
    %2 = tpu.matmul %0, %1, %cst {dimension_numbers = #tpu.dot_dimension_numbers<[1], [0], [0], [1], [0, 0, 1, 1], [], []>} : vector<98x576xbf16>, vector<576x64xbf16>, vector<98x64xf32> -> vector<98x64xf32>
    %c0_3 = arith.constant 0 : index
    %c0_4 = arith.constant 0 : index
    %3 = vector.load %arg3[%c0_3, %c0_4] : memref<1x64xf32, #tpu.memory_space<vmem>>, vector<1x64xf32>
    %4 = vector.broadcast %3 : vector<1x64xf32> to vector<98x64xf32>
    %5 = arith.addf %2, %4 : vector<98x64xf32>
    %cst_5 = arith.constant 0.000000e+00 : f32
    %6 = vector.broadcast %cst_5 : f32 to vector<98x64xf32>
    %7 = arith.maximumf %5, %6 : vector<98x64xf32>
    %8 = arith.truncf %7 : vector<98x64xf32> to vector<98x64xbf16>
    %c0_6 = arith.constant 0 : index
    %c0_7 = arith.constant 0 : index
    %9 = vector.load %arg4[%c0_6, %c0_7] : memref<98x64xbf16, #tpu.memory_space<vmem>>, vector<98x64xbf16>
    tpu.vector_store %arg4[%c0_6, %c0_7], %8 {strides = array<i32>} : memref<98x64xbf16, #tpu.memory_space<vmem>>, vector<98x64xbf16>,
    return
  }
  func.func @transform_0(%arg0: i32) -> (i32, i32) {
    %c0_i32 = arith.constant 0 : i32
    %c0_i32_0 = arith.constant 0 : i32
    return %arg0, %c0_i32 : i32, i32
  }
  func.func @transform_1(%arg0: i32) -> (i32, i32) {
    %c0_i32 = arith.constant 0 : i32
    %c0_i32_0 = arith.constant 0 : i32
    %c0_i32_1 = arith.constant 0 : i32
    return %c0_i32, %c0_i32_0 : i32, i32
  }
  func.func @transform_2(%arg0: i32) -> (i32, i32) {
    %c0_i32 = arith.constant 0 : i32
    %c0_i32_0 = arith.constant 0 : i32
    %c0_i32_1 = arith.constant 0 : i32
    return %c0_i32, %c0_i32_0 : i32, i32
  }
  func.func @transform_3(%arg0: i32) -> (i32, i32) {
    %c0_i32 = arith.constant 0 : i32
    %c0_i32_0 = arith.constant 0 : i32
    return %arg0, %c0_i32 : i32, i32
  }
}

module attributes {stable_mosaic.version = 11 : i64} {
  func.func @_mlp_head_kernel(%arg0: i32, %arg1: memref<2x3136xbf16, #tpu.memory_space<vmem>>, %arg2: memref<3136x512xbf16, #tpu.memory_space<vmem>>, %arg3: memref<1x512xf32, #tpu.memory_space<vmem>>, %arg4: memref<512x1xbf16, #tpu.memory_space<vmem>>, %arg5: memref<1x1xf32, #tpu.memory_space<vmem>>, %arg6: memref<2x1xf32, #tpu.memory_space<vmem>>) attributes {dimension_semantics = [#tpu.dimension_semantics<parallel>], iteration_bounds = array<i64: 1>, scalar_prefetch = 0 : i64, scratch_operands = 0 : i64, tpu.core_type = #tpu.core_type<tc>, window_params = [{transform_indices = @transform_0, window_bounds = array<i64: 2, 3136>}, {pipeline_mode = #tpu.pipeline_mode<synchronous>, transform_indices = @transform_1, window_bounds = array<i64: 3136, 512>}, {pipeline_mode = #tpu.pipeline_mode<synchronous>, transform_indices = @transform_2, window_bounds = array<i64: 1, 512>}, {pipeline_mode = #tpu.pipeline_mode<synchronous>, transform_indices = @transform_3, window_bounds = array<i64: 512, 1>}, {pipeline_mode = #tpu.pipeline_mode<synchronous>, transform_indices = @transform_4, window_bounds = array<i64: 1, 1>}, {transform_indices = @transform_5, window_bounds = array<i64: 2, 1>}]} {
    %c0 = arith.constant 0 : index
    %c0_0 = arith.constant 0 : index
    %0 = vector.load %arg1[%c0, %c0_0] : memref<2x3136xbf16, #tpu.memory_space<vmem>>, vector<2x3136xbf16>
    %c0_1 = arith.constant 0 : index
    %c0_2 = arith.constant 0 : index
    %1 = vector.load %arg2[%c0_1, %c0_2] : memref<3136x512xbf16, #tpu.memory_space<vmem>>, vector<3136x512xbf16>
    %cst = arith.constant dense<0.000000e+00> : vector<2x512xf32>
    %2 = tpu.matmul %0, %1, %cst {dimension_numbers = #tpu.dot_dimension_numbers<[1], [0], [0], [1], [0, 0, 1, 1], [], []>} : vector<2x3136xbf16>, vector<3136x512xbf16>, vector<2x512xf32> -> vector<2x512xf32>
    %c0_3 = arith.constant 0 : index
    %c0_4 = arith.constant 0 : index
    %3 = vector.load %arg3[%c0_3, %c0_4] : memref<1x512xf32, #tpu.memory_space<vmem>>, vector<1x512xf32>
    %4 = vector.broadcast %3 : vector<1x512xf32> to vector<2x512xf32>
    %5 = arith.addf %2, %4 : vector<2x512xf32>
    %cst_5 = arith.constant 0.000000e+00 : f32
    %6 = vector.broadcast %cst_5 : f32 to vector<2x512xf32>
    %7 = arith.maximumf %5, %6 : vector<2x512xf32>
    %8 = arith.truncf %7 : vector<2x512xf32> to vector<2x512xbf16>
    %c0_6 = arith.constant 0 : index
    %c0_7 = arith.constant 0 : index
    %9 = vector.load %arg4[%c0_6, %c0_7] : memref<512x1xbf16, #tpu.memory_space<vmem>>, vector<512x1xbf16>
    %cst_8 = arith.constant dense<0.000000e+00> : vector<2x1xf32>
    %10 = tpu.matmul %8, %9, %cst_8 {dimension_numbers = #tpu.dot_dimension_numbers<[1], [0], [0], [1], [0, 0, 1, 1], [], []>} : vector<2x512xbf16>, vector<512x1xbf16>, vector<2x1xf32> -> vector<2x1xf32>
    %c0_9 = arith.constant 0 : index
    %c0_10 = arith.constant 0 : index
    %11 = vector.load %arg5[%c0_9, %c0_10] : memref<1x1xf32, #tpu.memory_space<vmem>>, vector<1x1xf32>
    %12 = vector.broadcast %11 : vector<1x1xf32> to vector<2x1xf32>
    %13 = arith.addf %10, %12 : vector<2x1xf32>
    %c0_11 = arith.constant 0 : index
    %c0_12 = arith.constant 0 : index
    %14 = vector.load %arg6[%c0_11, %c0_12] : memref<2x1xf32, #tpu.memory_space<vmem>>, vector<2x1xf32>
    tpu.vector_store %arg6[%c0_11, %c0_12], %13 {strides = array<i32>} : memref<2x1xf32, #tpu.memory_space<vmem>>, vector<2x1xf32>,
    return
  }
  func.func @transform_0(%arg0: i32) -> (i32, i32) {
    %c0_i32 = arith.constant 0 : i32
    %c0_i32_0 = arith.constant 0 : i32
    return %arg0, %c0_i32 : i32, i32
  }
  func.func @transform_1(%arg0: i32) -> (i32, i32) {
    %c0_i32 = arith.constant 0 : i32
    %c0_i32_0 = arith.constant 0 : i32
    %c0_i32_1 = arith.constant 0 : i32
    return %c0_i32, %c0_i32_0 : i32, i32
  }
  func.func @transform_2(%arg0: i32) -> (i32, i32) {
    %c0_i32 = arith.constant 0 : i32
    %c0_i32_0 = arith.constant 0 : i32
    %c0_i32_1 = arith.constant 0 : i32
    return %c0_i32, %c0_i32_0 : i32, i32
  }
  func.func @transform_3(%arg0: i32) -> (i32, i32) {
    %c0_i32 = arith.constant 0 : i32
    %c0_i32_0 = arith.constant 0 : i32
    %c0_i32_1 = arith.constant 0 : i32
    return %c0_i32, %c0_i32_0 : i32, i32
  }
  func.func @transform_4(%arg0: i32) -> (i32, i32) {
    %c0_i32 = arith.constant 0 : i32
    %c0_i32_0 = arith.constant 0 : i32
    %c0_i32_1 = arith.constant 0 : i32
    return %c0_i32, %c0_i32_0 : i32, i32
  }
  func.func @transform_5(%arg0: i32) -> (i32, i32) {
    %c0_i32 = arith.constant 0 : i32
    %c0_i32_0 = arith.constant 0 : i32
    return %arg0, %c0_i32 : i32, i32
  }
}

</mosaic_0001>

<bundles_post_ra>
// kernel: critic_forward.4
= control target key start
LH: loop header
LB: loop body
LE: loop exit
PB: predicated region body
PF: predicated region fallthrough
CT: control target
= control target key end

     0   :  { %s2440_s12 = smov 0   ;;  %s2442_s13 = smov 0   ;;  %s3022_s0 = inlined_call_operand.vmem [shape: bf16[800,256], index: 0, kind: input, shape index: {}]   ;;  %s3023_s1 = inlined_call_operand.vmem [shape: bf16[256,32], index: 1, kind: input, shape index: {}]   ;;  %s3024_s2 = inlined_call_operand.vmem [shape: f32[1,32], index: 2, kind: input, shape index: {}]   ;;  %s3025_s3 = inlined_call_operand.vmem [shape: bf16[800,32], index: 3, kind: output, shape index: {}]  }
   0x1   :  { %s2444_s14 = smov 0  }
   0x2 LB: > { %s2453_s15 = sadd.s32 4294967295, %s2385_s14   ;;  %s2455_s16 = sadd.s32 1, %s2385_s14   ;;  %s2385_s14 = sphi %s2444_s14, %s3032_s14   ;;  %s2381_s13 = sphi %s2442_s13, %s3031_s13   ;;  %s2377_s12 = sphi %s2440_s12, %s3030_s12  }
   0x3   : > { %s85_s17 = ssub.s32 %s2385_s14, %s2455_s16  ;;  %s88_s18 = sadd.s32 1, %s2381_s13 }
   0x4   : > { %p86_p0 = scmp.eq.s32.totalorder %s85_s17, 0  ;;  %p98_p1 = scmp.ne.s32.totalorder %s2381_s13, %s2377_s12 }
   0x5   : > { %p99_p2 = scmp.eq.s32.totalorder %s2453_s15, 1  ;;  %p1863_p3 = scmp.ge.s32.totalorder %s2385_s14, 1 }
   0x6   : > { %s2463_s19 = scalar_select %p86_p0, %s2381_s13, %s88_s18  }
   0x7   : > { %p2465_p4 = por %p99_p2, %p98_p1  ;;  %p149_p5 = scmp.lt.s32.totalorder %s2385_s14, 3 }
   0x9   : > { %p150_p6 = pnand %p1863_p3, %p149_p5 }
   0xa   : > { %v2219_v0 = vld [vmem:[%s3023_s1] sm:$0xff] (!%p150_p6)   ;;  %v2419_v1 = vmov (!%p150_p6), 0   ;;  %s2475_s23 = sshll.u32 (!%p150_p6), %s2453_s15, 6  ;;  %v2220_v2 = vld [vmem:[%s3023_s1 + $0x8] sm:$0xff] (!%p150_p6)   ;;  %v2221_v3 = vld [vmem:[%s3023_s1 + $0x10] sm:$0xff] (!%p150_p6)   ;;  %s175_s17 = sand.u32 (!%p150_p6), 1, %s2377_s12  }
   0xb   : > { %153 = sbr.rel (%p150_p6) target bundleno = 507 (0x1fb), region = 32  ;;  %720 = vmatprep.subr.bf16.mxu0 (!%p150_p6), %v2419_v1  ;;  %2098 = vmatprep.subr.bf16.mxu1 (!%p150_p6), %v2419_v1  ;;  %p184_p7 = scmp.lt.s32.totalorder (!%p150_p6), %s2475_s23, 99  ;;  %v2222_v4 = vld [vmem:[%s3023_s1 + $0x18] sm:$0xff] (!%p150_p6)   ;;  %v2223_v5 = vld [vmem:[%s3023_s1 + $0x20] sm:$0xff] (!%p150_p6)   ;;  %v2224_v7 = vld [vmem:[%s3023_s1 + $0x28] sm:$0xff] (!%p150_p6)   ;;  %vm1329_vm0 = vcmask (!%p150_p6), 257024  }
   0xc   : > { %721 = vmatpush1.bf16.msra.mxu0 (!%p150_p6), %v2219_v0  ;;  %2114 = vmatpush1.bf16.msra.mxu1 (!%p150_p6), %v2219_v0  ;;  %v2225_v9 = vld [vmem:[%s3023_s1 + $0x30] sm:$0xff] (!%p150_p6)   ;;  %v2226_v10 = vld [vmem:[%s3023_s1 + $0x38] sm:$0xff] (!%p150_p6)   ;;  %v2227_v11 = vld [vmem:[%s3023_s1 + $0x40] sm:$0xff] (!%p150_p6)   ;;  %s1864_s22 = sshll.u32 (!%p150_p6), %s175_s17, 8 }
   0xd   : > { %722 = vmatprep.subr.bf16.mxu0 (!%p150_p6), %v2419_v1  ;;  %2099 = vmatprep.subr.bf16.mxu1 (!%p150_p6), %v2419_v1  ;;  %v2228_v12 = vld [vmem:[%s3023_s1 + $0x48] sm:$0xff] (!%p150_p6)   ;;  %v2229_v13 = vld [vmem:[%s3023_s1 + $0x50] sm:$0xff] (!%p150_p6)   ;;  %v2230_v14 = vld [vmem:[%s3023_s1 + $0x58] sm:$0xff] (!%p150_p6)   ;;  %s2633_s12 = scalar_lea.vmem (!%p150_p6), [#allocation2], %s1864_s22  }
   0xe   : > { %v2231_v15 = vld [vmem:[%s3023_s1 + $0x60] sm:$0xff] (!%p150_p6)   ;;  %v2232_v16 = vld [vmem:[%s3023_s1 + $0x68] sm:$0xff] (!%p150_p6)   ;;  %v2233_v17 = vld [vmem:[%s3023_s1 + $0x70] sm:$0xff] (!%p150_p6)  }
   0xf   : > { %v2234_v18 = vld [vmem:[%s3023_s1 + $0x78] sm:$0xff] (!%p150_p6)  }
  0x10   : > { %723 = vmatpush1.bf16.msra.mxu0 (!%p150_p6), %v2220_v2  ;;  %2115 = vmatpush1.bf16.msra.mxu1 (!%p150_p6), %v2220_v2 }
  0x11   : > { %724 = vmatprep.subr.bf16.mxu0 (!%p150_p6), %v2419_v1  ;;  %2100 = vmatprep.subr.bf16.mxu1 (!%p150_p6), %v2419_v1 }
  0x12   : > { %s185_s28 = scalar_select %p184_p7, %s2475_s23, 99 }
  0x13   : > { %s2095_s24 = sshll.u32 (%p2465_p4), %s2453_s15, 8 }
  0x14   : > { %725 = vmatpush1.bf16.msra.mxu0 %v2221_v3  ;;  %2116 = vmatpush1.bf16.msra.mxu1 %v2221_v3  ;;  %s2030_s4 = sshll.u32 %s185_s28, 3  ;;  %s2830_s27 = scalar_lea.vmem (%p2465_p4), %s3025_s3, %s2095_s24  }
  0x15   : > { %726 = vmatprep.subr.bf16.mxu0 %v2419_v1  ;;  %2101 = vmatprep.subr.bf16.mxu1 %v2419_v1  ;;  %s2500_s9 = scalar_lea.vmem %s3022_s0, %s2030_s4 }
  0x16   : > { %v2237_v6 = vld [vmem:[%s2500_s9 + $0x4] ss:$8 sps:$4 sm:$0xff]   ;;  %v2235_v19 = vld [vmem:[%s2500_s9] ss:$8 sps:$4 sm:$0xff]   ;;  %v2241_v21 = vld [vmem:[%s2500_s9 + $0x14] ss:$8 sps:$4 sm:$0xff]  }
  0x17   : > { %v2240_v8 = vld [vmem:[%s2500_s9 + $0x104] ss:$8 sps:$4 sm:$0xff]   ;;  %752 = vmatprep.mubr.bf16.mxu0 %v2237_v6  ;;  %v2238_v20 = vld [vmem:[%s2500_s9 + $0x100] ss:$8 sps:$4 sm:$0xff]   ;;  %v2243_v22 = vld [vmem:[%s2500_s9 + $0x114] ss:$8 sps:$4 sm:$0xff]  }
  0x18   : > { %727 = vmatpush1.bf16.msra.mxu0 %v2222_v4  ;;  %2117 = vmatpush1.bf16.msra.mxu1 %v2222_v4  ;;  %v2245_v23 = vld [vmem:[%s2500_s9 + $0x10] ss:$8 sps:$4 sm:$0xff]   ;;  %v2247_v25 = vld [vmem:[%s2500_s9 + $0x24] ss:$8 sps:$4 sm:$0xff]   ;;  %v2251_v27 = vld [vmem:[%s2500_s9 + $0x20] ss:$8 sps:$4 sm:$0xff]  }
  0x19   : > { %728 = vmatprep.subr.bf16.mxu0 %v2419_v1  ;;  %2102 = vmatprep.subr.bf16.mxu1 %v2419_v1  ;;  %v2246_v24 = vld [vmem:[%s2500_s9 + $0x110] ss:$8 sps:$4 sm:$0xff]   ;;  %v2249_v26 = vld [vmem:[%s2500_s9 + $0x124] ss:$8 sps:$4 sm:$0xff]   ;;  %v2252_v28 = vld [vmem:[%s2500_s9 + $0x120] ss:$8 sps:$4 sm:$0xff]  }
  0x1a   : > { %880 = vmatprep.mubr.bf16.mxu1 %v2240_v8  ;;  %v2253_v29 = vld [vmem:[%s2500_s9 + $0x34] ss:$8 sps:$4 sm:$0xff]   ;;  %v2257_v31 = vld [vmem:[%s2500_s9 + $0x30] ss:$8 sps:$4 sm:$0xff]   ;;  %v2259_v33 = vld [vmem:[%s2500_s9 + $0x44] ss:$8 sps:$4 sm:$0xff]  }
  0x1b   : > { %v2255_v30 = vld [vmem:[%s2500_s9 + $0x134] ss:$8 sps:$4 sm:$0xff]   ;;  %v2258_v32 = vld [vmem:[%s2500_s9 + $0x130] ss:$8 sps:$4 sm:$0xff]   ;;  %v2261_v34 = vld [vmem:[%s2500_s9 + $0x144] ss:$8 sps:$4 sm:$0xff]  }
  0x1c   : > { %729 = vmatpush1.bf16.msra.mxu0 %v2223_v5  ;;  %2118 = vmatpush1.bf16.msra.mxu1 %v2223_v5  ;;  %v2263_v35 = vld [vmem:[%s2500_s9 + $0x40] ss:$8 sps:$4 sm:$0xff]   ;;  %v2265_v37 = vld [vmem:[%s2500_s9 + $0x54] ss:$8 sps:$4 sm:$0xff]   ;;  %v2269_v39 = vld [vmem:[%s2500_s9 + $0x50] ss:$8 sps:$4 sm:$0xff]  }
  0x1d   : > { %730 = vmatprep.subr.bf16.mxu0 %v2419_v1  ;;  %2103 = vmatprep.subr.bf16.mxu1 %v2419_v1  ;;  %v2264_v36 = vld [vmem:[%s2500_s9 + $0x140] ss:$8 sps:$4 sm:$0xff]   ;;  %v2267_v38 = vld [vmem:[%s2500_s9 + $0x154] ss:$8 sps:$4 sm:$0xff]   ;;  %v2270_v40 = vld [vmem:[%s2500_s9 + $0x150] ss:$8 sps:$4 sm:$0xff]  }
  0x1e   : > { %v2271_v41 = vld [vmem:[%s2500_s9 + $0x64] ss:$8 sps:$4 sm:$0xff]   ;;  %v2275_v43 = vld [vmem:[%s2500_s9 + $0x60] ss:$8 sps:$4 sm:$0xff]   ;;  %v2277_v45 = vld [vmem:[%s2500_s9 + $0x74] ss:$8 sps:$4 sm:$0xff]  }
  0x1f   : > { %v2273_v42 = vld [vmem:[%s2500_s9 + $0x164] ss:$8 sps:$4 sm:$0xff]   ;;  %v2276_v44 = vld [vmem:[%s2500_s9 + $0x160] ss:$8 sps:$4 sm:$0xff]   ;;  %v2279_v46 = vld [vmem:[%s2500_s9 + $0x174] ss:$8 sps:$4 sm:$0xff]  }
  0x20   : > { %731 = vmatpush1.bf16.msra.mxu0 %v2224_v7  ;;  %2119 = vmatpush1.bf16.msra.mxu1 %v2224_v7  ;;  %v2281_v47 = vld [vmem:[%s2500_s9 + $0x70] ss:$8 sps:$4 sm:$0xff]   ;;  %v2283_v49 = vld [vmem:[%s2500_s9 + $0x84] ss:$8 sps:$4 sm:$0xff]   ;;  %v2287_v51 = vld [vmem:[%s2500_s9 + $0x80] ss:$8 sps:$4 sm:$0xff]  }
  0x21   : > { %732 = vmatprep.subr.bf16.mxu0 %v2419_v1  ;;  %2104 = vmatprep.subr.bf16.mxu1 %v2419_v1  ;;  %v2282_v48 = vld [vmem:[%s2500_s9 + $0x170] ss:$8 sps:$4 sm:$0xff]   ;;  %v2285_v50 = vld [vmem:[%s2500_s9 + $0x184] ss:$8 sps:$4 sm:$0xff]   ;;  %v2288_v52 = vld [vmem:[%s2500_s9 + $0x180] ss:$8 sps:$4 sm:$0xff]  }
  0x22   : > { %v2289_v53 = vld [vmem:[%s2500_s9 + $0x94] ss:$8 sps:$4 sm:$0xff]   ;;  %v2293_v55 = vld [vmem:[%s2500_s9 + $0x90] ss:$8 sps:$4 sm:$0xff]   ;;  %v2295_v57 = vld [vmem:[%s2500_s9 + $0xa4] ss:$8 sps:$4 sm:$0xff]  }
  0x23   : > { %v2291_v54 = vld [vmem:[%s2500_s9 + $0x194] ss:$8 sps:$4 sm:$0xff]   ;;  %v2294_v56 = vld [vmem:[%s2500_s9 + $0x190] ss:$8 sps:$4 sm:$0xff]   ;;  %v2297_v58 = vld [vmem:[%s2500_s9 + $0x1a4] ss:$8 sps:$4 sm:$0xff]  }
  0x24   : > { %733 = vmatpush1.bf16.msra.mxu0 %v2225_v9  ;;  %2120 = vmatpush1.bf16.msra.mxu1 %v2225_v9  ;;  %v2299_v59 = vld [vmem:[%s2500_s9 + $0xa0] ss:$8 sps:$4 sm:$0xff]   ;;  %v2301_v61 = vld [vmem:[%s2500_s9 + $0xb4] ss:$8 sps:$4 sm:$0xff]   ;;  %v2305_v63 = vld [vmem:[%s2500_s9 + $0xb0] ss:$8 sps:$4 sm:$0xff]  }
  0x25   : > { %734 = vmatprep.subr.bf16.mxu0 %v2419_v1  ;;  %2105 = vmatprep.subr.bf16.mxu1 %v2419_v1  ;;  %v2300_v60 = vld [vmem:[%s2500_s9 + $0x1a0] ss:$8 sps:$4 sm:$0xff]   ;;  %v2303_v62 = vld [vmem:[%s2500_s9 + $0x1b4] ss:$8 sps:$4 sm:$0xff]   ;;  %v2306_v0 = vld [vmem:[%s2500_s9 + $0x1b0] ss:$8 sps:$4 sm:$0xff]  }
  0x26   : > { %v2309_v2 = vld [vmem:[%s2500_s9 + $0x1c4] ss:$8 sps:$4 sm:$0xff]   ;;  %v2311_v3 = vld [vmem:[%s2500_s9 + $0xc0] ss:$8 sps:$4 sm:$0xff]   ;;  %v2313_v5 = vld [vmem:[%s2500_s9 + $0xd4] ss:$8 sps:$4 sm:$0xff]  }
  0x27   : > { %v2312_v4 = vld [vmem:[%s2500_s9 + $0x1c0] ss:$8 sps:$4 sm:$0xff]   ;;  %v2315_v6 = vld [vmem:[%s2500_s9 + $0x1d4] ss:$8 sps:$4 sm:$0xff]   ;;  %v2317_v7 = vld [vmem:[%s2500_s9 + $0xd0] ss:$8 sps:$4 sm:$0xff]  }
  0x28   : > { %735 = vmatpush1.bf16.msra.mxu0 %v2226_v10  ;;  %2121 = vmatpush1.bf16.msra.mxu1 %v2226_v10  ;;  %v2318_v8 = vld [vmem:[%s2500_s9 + $0x1d0] ss:$8 sps:$4 sm:$0xff]   ;;  %v2319_v9 = vld [vmem:[%s2500_s9 + $0xe4] ss:$8 sps:$4 sm:$0xff]  }
  0x29   : > { %736 = vmatprep.subr.bf16.mxu0 %v2419_v1  ;;  %2106 = vmatprep.subr.bf16.mxu1 %v2419_v1  ;;  %v2321_v10 = vld [vmem:[%s2500_s9 + $0x1e4] ss:$8 sps:$4 sm:$0xff]  }
  0x2c   : > { %737 = vmatpush1.bf16.msra.mxu0 %v2227_v11  ;;  %2122 = vmatpush1.bf16.msra.mxu1 %v2227_v11  ;;  %v2323_v11 = vld [vmem:[%s2500_s9 + $0xe0] ss:$8 sps:$4 sm:$0xff]  }
  0x2d   : > { %738 = vmatprep.subr.bf16.mxu0 %v2419_v1  ;;  %2107 = vmatprep.subr.bf16.mxu1 %v2419_v1 }
  0x30   : > { %739 = vmatpush1.bf16.msra.mxu0 %v2228_v12  ;;  %2123 = vmatpush1.bf16.msra.mxu1 %v2228_v12  ;;  %v2324_v12 = vld [vmem:[%s2500_s9 + $0x1e0] ss:$8 sps:$4 sm:$0xff]  }
  0x31   : > { %740 = vmatprep.subr.bf16.mxu0 %v2419_v1  ;;  %2108 = vmatprep.subr.bf16.mxu1 %v2419_v1 }
  0x34   : > { %741 = vmatpush1.bf16.msra.mxu0 %v2229_v13  ;;  %2124 = vmatpush1.bf16.msra.mxu1 %v2229_v13  ;;  %v2325_v13 = vld [vmem:[%s2500_s9 + $0xf4] ss:$8 sps:$4 sm:$0xff]  }
  0x35   : > { %742 = vmatprep.subr.bf16.mxu0 %v2419_v1  ;;  %2109 = vmatprep.subr.bf16.mxu1 %v2419_v1 }
  0x38   : > { %743 = vmatpush1.bf16.msra.mxu0 %v2230_v14  ;;  %2125 = vmatpush1.bf16.msra.mxu1 %v2230_v14  ;;  %v2327_v14 = vld [vmem:[%s2500_s9 + $0x1f4] ss:$8 sps:$4 sm:$0xff]  }
  0x39   : > { %744 = vmatprep.subr.bf16.mxu0 %v2419_v1  ;;  %2110 = vmatprep.subr.bf16.mxu1 %v2419_v1 }
  0x3c   : > { %745 = vmatpush1.bf16.msra.mxu0 %v2231_v15  ;;  %2126 = vmatpush1.bf16.msra.mxu1 %v2231_v15  ;;  %v2329_v15 = vld [vmem:[%s2500_s9 + $0xf0] ss:$8 sps:$4 sm:$0xff]  }
  0x3d   : > { %746 = vmatprep.subr.bf16.mxu0 %v2419_v1  ;;  %2111 = vmatprep.subr.bf16.mxu1 %v2419_v1 }
  0x40   : > { %747 = vmatpush1.bf16.msra.mxu0 %v2232_v16  ;;  %2127 = vmatpush1.bf16.msra.mxu1 %v2232_v16  ;;  %v2330_v16 = vld [vmem:[%s2500_s9 + $0x1f0] ss:$8 sps:$4 sm:$0xff]  }
  0x41   : > { %748 = vmatprep.subr.bf16.mxu0 %v2419_v1  ;;  %2112 = vmatprep.subr.bf16.mxu1 %v2419_v1 }
  0x44   : > { %749 = vmatpush1.bf16.msra.mxu0 %v2233_v17  ;;  %2128 = vmatpush1.bf16.msra.mxu1 %v2233_v17  ;;  %v2627_v17 = vld [vmem:[%s3024_s2] ss:$0 sm:$0xff] }
  0x45   : > { %750 = vmatprep.subr.bf16.mxu0 %v2419_v1  ;;  %2113 = vmatprep.subr.bf16.mxu1 %v2419_v1  ;;  %v2307_v1 = vld [vmem:[%s2500_s9 + $0xc4] ss:$8 sps:$4 sm:$0xff]   ;;  %s1402_s9 = ssub.s32 (%p2465_p4), 100, %s2475_s23 }
  0x46   : > { %p1403_p8 = scmp.lt.s32.totalorder (%p2465_p4), %s1402_s9, 64 }
  0x48   : > { %751 = vmatpush1.bf16.msra.mxu0 %v2234_v18  ;;  %2129 = vmatpush1.bf16.msra.mxu1 %v2234_v18 }
  0x4b   : > { %753 = vmatmul.mubr.bf16.vlgmr.msra.gmra.mrb[0].mxu0 %v2235_v19  ;;  %881 = vmatmul.mubr.bf16.vlgmr.msra.gmra.mrb[0].mxu1 %v2238_v20 }
  0x4c   : > { %760 = vmatprep.mubr.bf16.mxu0 %v2241_v21  ;;  %888 = vmatprep.mubr.bf16.mxu1 %v2243_v22 }
  0x53   : > { %761 = vmatmul.mubr.bf16.gmra.mrb[4].mxu0 %v2245_v23  ;;  %889 = vmatmul.mubr.bf16.gmra.mrb[4].mxu1 %v2246_v24 }
  0x54   : > { %768 = vmatprep.mubr.bf16.mxu0 %v2247_v25  ;;  %896 = vmatprep.mubr.bf16.mxu1 %v2249_v26 }
  0x5b   : > { %769 = vmatmul.mubr.bf16.gmra.mrb[8].mxu0 %v2251_v27  ;;  %897 = vmatmul.mubr.bf16.gmra.mrb[8].mxu1 %v2252_v28 }
  0x5c   : > { %776 = vmatprep.mubr.bf16.mxu0 %v2253_v29  ;;  %904 = vmatprep.mubr.bf16.mxu1 %v2255_v30 }
  0x63   : > { %777 = vmatmul.mubr.bf16.gmra.mrb[12].mxu0 %v2257_v31  ;;  %905 = vmatmul.mubr.bf16.gmra.mrb[12].mxu1 %v2258_v32 }
  0x64   : > { %784 = vmatprep.mubr.bf16.mxu0 %v2259_v33  ;;  %912 = vmatprep.mubr.bf16.mxu1 %v2261_v34 }
  0x6b   : > { %785 = vmatmul.mubr.bf16.gmra.mrb[16].mxu0 %v2263_v35  ;;  %913 = vmatmul.mubr.bf16.gmra.mrb[16].mxu1 %v2264_v36 }
  0x6c   : > { %792 = vmatprep.mubr.bf16.mxu0 %v2265_v37  ;;  %920 = vmatprep.mubr.bf16.mxu1 %v2267_v38 }
  0x73   : > { %793 = vmatmul.mubr.bf16.gmra.mrb[20].mxu0 %v2269_v39  ;;  %921 = vmatmul.mubr.bf16.gmra.mrb[20].mxu1 %v2270_v40 }
  0x74   : > { %800 = vmatprep.mubr.bf16.mxu0 %v2271_v41  ;;  %928 = vmatprep.mubr.bf16.mxu1 %v2273_v42 }
  0x7b   : > { %801 = vmatmul.mubr.bf16.gmra.mrb[24].mxu0 %v2275_v43  ;;  %929 = vmatmul.mubr.bf16.gmra.mrb[24].mxu1 %v2276_v44 }
  0x7c   : > { %808 = vmatprep.mubr.bf16.mxu0 %v2277_v45  ;;  %936 = vmatprep.mubr.bf16.mxu1 %v2279_v46 }
  0x83   : > { %809 = vmatmul.mubr.bf16.gmra.mrb[28].mxu0 %v2281_v47  ;;  %937 = vmatmul.mubr.bf16.gmra.mrb[28].mxu1 %v2282_v48 }
  0x84   : > { %816 = vmatprep.mubr.bf16.mxu0 %v2283_v49  ;;  %944 = vmatprep.mubr.bf16.mxu1 %v2285_v50 }
  0x8b   : > { %817 = vmatmul.mubr.bf16.gmra.mrb[32].mxu0 %v2287_v51  ;;  %945 = vmatmul.mubr.bf16.gmra.mrb[32].mxu1 %v2288_v52 }
  0x8c   : > { %824 = vmatprep.mubr.bf16.mxu0 %v2289_v53  ;;  %952 = vmatprep.mubr.bf16.mxu1 %v2291_v54 }
  0x93   : > { %825 = vmatmul.mubr.bf16.gmra.mrb[36].mxu0 %v2293_v55  ;;  %953 = vmatmul.mubr.bf16.gmra.mrb[36].mxu1 %v2294_v56 }
  0x94   : > { %832 = vmatprep.mubr.bf16.mxu0 %v2295_v57  ;;  %960 = vmatprep.mubr.bf16.mxu1 %v2297_v58 }
  0x9b   : > { %833 = vmatmul.mubr.bf16.gmra.mrb[40].mxu0 %v2299_v59  ;;  %961 = vmatmul.mubr.bf16.gmra.mrb[40].mxu1 %v2300_v60 }
  0x9c   : > { %840 = vmatprep.mubr.bf16.mxu0 %v2301_v61  ;;  %968 = vmatprep.mubr.bf16.mxu1 %v2303_v62 }
  0xa3   : > { %841 = vmatmul.mubr.bf16.gmra.mrb[44].mxu0 %v2305_v63  ;;  %969 = vmatmul.mubr.bf16.gmra.mrb[44].mxu1 %v2306_v0 }
  0xa4   : > { %848 = vmatprep.mubr.bf16.mxu0 %v2307_v1  ;;  %976 = vmatprep.mubr.bf16.mxu1 %v2309_v2 }
  0xab   : > { %849 = vmatmul.mubr.bf16.gmra.mrb[48].mxu0 %v2311_v3  ;;  %977 = vmatmul.mubr.bf16.gmra.mrb[48].mxu1 %v2312_v4 }
  0xac   : > { %856 = vmatprep.mubr.bf16.mxu0 %v2313_v5  ;;  %984 = vmatprep.mubr.bf16.mxu1 %v2315_v6 }
  0xb3   : > { %857 = vmatmul.mubr.bf16.gmra.mrb[52].mxu0 %v2317_v7  ;;  %985 = vmatmul.mubr.bf16.gmra.mrb[52].mxu1 %v2318_v8 }
  0xb4   : > { %864 = vmatprep.mubr.bf16.mxu0 %v2319_v9  ;;  %992 = vmatprep.mubr.bf16.mxu1 %v2321_v10 }
  0xbb   : > { %865 = vmatmul.mubr.bf16.gmra.mrb[56].mxu0 %v2323_v11  ;;  %993 = vmatmul.mubr.bf16.gmra.mrb[56].mxu1 %v2324_v12 }
  0xbc   : > { %872 = vmatprep.mubr.bf16.mxu0 %v2325_v13  ;;  %1000 = vmatprep.mubr.bf16.mxu1 %v2327_v14 }
  0xc3   : > { %873 = vmatmul.mubr.bf16.gmra.mrb[60].mxu0 %v2329_v15  ;;  %1001 = vmatmul.mubr.bf16.gmra.mrb[60].mxu1 %v2330_v16 }
 0x11e   : > { %v754_v18 = vpop.f32.mrb[0].mxu0  ;;  %v882_v19 = vpop.f32.mrb[0].mxu1 }
 0x11f   : > { %v755_v20 = vadd.f32 %v2627_v17, %v754_v18  ;;  %v883_v21 = vadd.f32 %v2627_v17, %v882_v19  ;;  %v756_v22 = vpop.f32.mrb[1].mxu0  ;;  %v884_v23 = vpop.f32.mrb[1].mxu1 }
 0x120   : > { %v757_v24 = vpop.f32.mrb[2].mxu0  ;;  %v885_v25 = vpop.f32.mrb[2].mxu1 }
 0x121   : > { %v1009_v26 = vmax.f32 %v755_v20, 0.0  ;;  %v1041_v27 = vmax.f32 %v883_v21, 0.0  ;;  %v758_v28 = vadd.f32 %v2627_v17, %v757_v24  ;;  %v886_v29 = vadd.f32 %v2627_v17, %v885_v25  ;;  %v759_v30 = vpop.f32.mrb[3].mxu0  ;;  %v887_v31 = vpop.f32.mrb[3].mxu1 }
 0x123   : > { %v2031_v32 = vpack.c.bf16 %v1009_v26, %v1009_v26  ;;  %v2063_v33 = vpack.c.bf16 %v1041_v27, %v1041_v27  ;;  %v1010_v34 = vmax.f32 %v758_v28, 0.0  ;;  %v1042_v35 = vmax.f32 %v886_v29, 0.0 }
 0x125   : > { %1330 = vst.msk [vmem:[%s2633_s12] sm:$0xf] %vm1329_vm0, %v2031_v32  ;;  %1362 = vst.msk [vmem:[%s2633_s12 + $0x80] sm:$0xf] %vm1329_vm0, %v2063_v33  ;;  %v2032_v36 = vpack.c.bf16 %v1010_v34, %v1010_v34  ;;  %v2064_v37 = vpack.c.bf16 %v1042_v35, %v1042_v35 }
 0x126   : > { %v762_v38 = vpop.f32.mrb[4].mxu0  ;;  %v890_v39 = vpop.f32.mrb[4].mxu1 }
 0x127   : > { %1331 = vst.msk [vmem:[%s2633_s12 + $0x4] sm:$0xf] %vm1329_vm0, %v2032_v36  ;;  %1363 = vst.msk [vmem:[%s2633_s12 + $0x84] sm:$0xf] %vm1329_vm0, %v2064_v37  ;;  %v763_v40 = vadd.f32 %v2627_v17, %v762_v38  ;;  %v891_v41 = vadd.f32 %v2627_v17, %v890_v39  ;;  %v764_v42 = vpop.f32.mrb[5].mxu0  ;;  %v892_v43 = vpop.f32.mrb[5].mxu1 }
 0x128   : > { %v765_v44 = vpop.f32.mrb[6].mxu0  ;;  %v893_v45 = vpop.f32.mrb[6].mxu1 }
 0x129   : > { %v1011_v46 = vmax.f32 %v763_v40, 0.0  ;;  %v1043_v47 = vmax.f32 %v891_v41, 0.0  ;;  %v766_v48 = vadd.f32 %v2627_v17, %v765_v44  ;;  %v894_v49 = vadd.f32 %v2627_v17, %v893_v45  ;;  %v767_v50 = vpop.f32.mrb[7].mxu0  ;;  %v895_v51 = vpop.f32.mrb[7].mxu1 }
 0x12b   : > { %v2033_v52 = vpack.c.bf16 %v1011_v46, %v1011_v46  ;;  %v2065_v53 = vpack.c.bf16 %v1043_v47, %v1043_v47  ;;  %v1012_v54 = vmax.f32 %v766_v48, 0.0  ;;  %v1044_v55 = vmax.f32 %v894_v49, 0.0 }
 0x12d   : > { %1332 = vst.msk [vmem:[%s2633_s12 + $0x8] sm:$0xf] %vm1329_vm0, %v2033_v52  ;;  %1364 = vst.msk [vmem:[%s2633_s12 + $0x88] sm:$0xf] %vm1329_vm0, %v2065_v53  ;;  %v2034_v56 = vpack.c.bf16 %v1012_v54, %v1012_v54  ;;  %v2066_v57 = vpack.c.bf16 %v1044_v55, %v1044_v55 }
 0x12e   : > { %v770_v58 = vpop.f32.mrb[8].mxu0  ;;  %v898_v59 = vpop.f32.mrb[8].mxu1 }
 0x12f   : > { %1333 = vst.msk [vmem:[%s2633_s12 + $0xc] sm:$0xf] %vm1329_vm0, %v2034_v56  ;;  %1365 = vst.msk [vmem:[%s2633_s12 + $0x8c] sm:$0xf] %vm1329_vm0, %v2066_v57  ;;  %v771_v60 = vadd.f32 %v2627_v17, %v770_v58  ;;  %v899_v61 = vadd.f32 %v2627_v17, %v898_v59  ;;  %v772_v62 = vpop.f32.mrb[9].mxu0  ;;  %v900_v63 = vpop.f32.mrb[9].mxu1 }
 0x130   : > { %v773_v0 = vpop.f32.mrb[10].mxu0  ;;  %v901_v1 = vpop.f32.mrb[10].mxu1 }
 0x131   : > { %v1013_v2 = vmax.f32 %v771_v60, 0.0  ;;  %v1045_v3 = vmax.f32 %v899_v61, 0.0  ;;  %v774_v4 = vadd.f32 %v2627_v17, %v773_v0  ;;  %v902_v5 = vadd.f32 %v2627_v17, %v901_v1  ;;  %v775_v6 = vpop.f32.mrb[11].mxu0  ;;  %v903_v7 = vpop.f32.mrb[11].mxu1 }
 0x133   : > { %v2035_v8 = vpack.c.bf16 %v1013_v2, %v1013_v2  ;;  %v2067_v9 = vpack.c.bf16 %v1045_v3, %v1045_v3  ;;  %v1014_v10 = vmax.f32 %v774_v4, 0.0  ;;  %v1046_v11 = vmax.f32 %v902_v5, 0.0 }
 0x135   : > { %1334 = vst.msk [vmem:[%s2633_s12 + $0x10] sm:$0xf] %vm1329_vm0, %v2035_v8  ;;  %1366 = vst.msk [vmem:[%s2633_s12 + $0x90] sm:$0xf] %vm1329_vm0, %v2067_v9  ;;  %v2036_v12 = vpack.c.bf16 %v1014_v10, %v1014_v10  ;;  %v2068_v13 = vpack.c.bf16 %v1046_v11, %v1046_v11 }
 0x136   : > { %v778_v14 = vpop.f32.mrb[12].mxu0  ;;  %v906_v15 = vpop.f32.mrb[12].mxu1 }
 0x137   : > { %1335 = vst.msk [vmem:[%s2633_s12 + $0x14] sm:$0xf] %vm1329_vm0, %v2036_v12  ;;  %1367 = vst.msk [vmem:[%s2633_s12 + $0x94] sm:$0xf] %vm1329_vm0, %v2068_v13  ;;  %v779_v16 = vadd.f32 %v2627_v17, %v778_v14  ;;  %v907_v18 = vadd.f32 %v2627_v17, %v906_v15  ;;  %v780_v19 = vpop.f32.mrb[13].mxu0  ;;  %v908_v20 = vpop.f32.mrb[13].mxu1 }
 0x138   : > { %v781_v21 = vpop.f32.mrb[14].mxu0  ;;  %v909_v22 = vpop.f32.mrb[14].mxu1 }
 0x139   : > { %v1015_v23 = vmax.f32 %v779_v16, 0.0  ;;  %v1047_v24 = vmax.f32 %v907_v18, 0.0  ;;  %v782_v25 = vadd.f32 %v2627_v17, %v781_v21  ;;  %v910_v26 = vadd.f32 %v2627_v17, %v909_v22  ;;  %v783_v27 = vpop.f32.mrb[15].mxu0  ;;  %v911_v28 = vpop.f32.mrb[15].mxu1 }
 0x13b   : > { %v2037_v29 = vpack.c.bf16 %v1015_v23, %v1015_v23  ;;  %v2069_v30 = vpack.c.bf16 %v1047_v24, %v1047_v24  ;;  %v1016_v31 = vmax.f32 %v782_v25, 0.0  ;;  %v1048_v32 = vmax.f32 %v910_v26, 0.0 }
 0x13d   : > { %1336 = vst.msk [vmem:[%s2633_s12 + $0x18] sm:$0xf] %vm1329_vm0, %v2037_v29  ;;  %1368 = vst.msk [vmem:[%s2633_s12 + $0x98] sm:$0xf] %vm1329_vm0, %v2069_v30  ;;  %v2038_v33 = vpack.c.bf16 %v1016_v31, %v1016_v31  ;;  %v2070_v34 = vpack.c.bf16 %v1048_v32, %v1048_v32 }
 0x13e   : > { %v786_v35 = vpop.f32.mrb[16].mxu0  ;;  %v914_v36 = vpop.f32.mrb[16].mxu1 }
 0x13f   : > { %1337 = vst.msk [vmem:[%s2633_s12 + $0x1c] sm:$0xf] %vm1329_vm0, %v2038_v33  ;;  %1369 = vst.msk [vmem:[%s2633_s12 + $0x9c] sm:$0xf] %vm1329_vm0, %v2070_v34  ;;  %v787_v37 = vadd.f32 %v2627_v17, %v786_v35  ;;  %v915_v38 = vadd.f32 %v2627_v17, %v914_v36  ;;  %v788_v39 = vpop.f32.mrb[17].mxu0  ;;  %v916_v40 = vpop.f32.mrb[17].mxu1 }
 0x140   : > { %v789_v41 = vpop.f32.mrb[18].mxu0  ;;  %v917_v42 = vpop.f32.mrb[18].mxu1 }
 0x141   : > { %v1017_v43 = vmax.f32 %v787_v37, 0.0  ;;  %v1049_v44 = vmax.f32 %v915_v38, 0.0  ;;  %v790_v45 = vadd.f32 %v2627_v17, %v789_v41  ;;  %v918_v46 = vadd.f32 %v2627_v17, %v917_v42  ;;  %v791_v47 = vpop.f32.mrb[19].mxu0  ;;  %v919_v48 = vpop.f32.mrb[19].mxu1 }
 0x143   : > { %v2039_v49 = vpack.c.bf16 %v1017_v43, %v1017_v43  ;;  %v2071_v50 = vpack.c.bf16 %v1049_v44, %v1049_v44  ;;  %v1018_v51 = vmax.f32 %v790_v45, 0.0  ;;  %v1050_v52 = vmax.f32 %v918_v46, 0.0 }
 0x145   : > { %1338 = vst.msk [vmem:[%s2633_s12 + $0x20] sm:$0xf] %vm1329_vm0, %v2039_v49  ;;  %1370 = vst.msk [vmem:[%s2633_s12 + $0xa0] sm:$0xf] %vm1329_vm0, %v2071_v50  ;;  %v2040_v53 = vpack.c.bf16 %v1018_v51, %v1018_v51  ;;  %v2072_v54 = vpack.c.bf16 %v1050_v52, %v1050_v52 }
 0x146   : > { %v794_v55 = vpop.f32.mrb[20].mxu0  ;;  %v922_v56 = vpop.f32.mrb[20].mxu1 }
 0x147   : > { %1339 = vst.msk [vmem:[%s2633_s12 + $0x24] sm:$0xf] %vm1329_vm0, %v2040_v53  ;;  %1371 = vst.msk [vmem:[%s2633_s12 + $0xa4] sm:$0xf] %vm1329_vm0, %v2072_v54  ;;  %v795_v57 = vadd.f32 %v2627_v17, %v794_v55  ;;  %v923_v58 = vadd.f32 %v2627_v17, %v922_v56  ;;  %v796_v59 = vpop.f32.mrb[21].mxu0  ;;  %v924_v60 = vpop.f32.mrb[21].mxu1 }
 0x148   : > { %v797_v61 = vpop.f32.mrb[22].mxu0  ;;  %v925_v62 = vpop.f32.mrb[22].mxu1 }
 0x149   : > { %v1019_v63 = vmax.f32 %v795_v57, 0.0  ;;  %v1051_v0 = vmax.f32 %v923_v58, 0.0  ;;  %v798_v1 = vadd.f32 %v2627_v17, %v797_v61  ;;  %v926_v2 = vadd.f32 %v2627_v17, %v925_v62  ;;  %v799_v3 = vpop.f32.mrb[23].mxu0  ;;  %v927_v4 = vpop.f32.mrb[23].mxu1 }
 0x14b   : > { %v2041_v5 = vpack.c.bf16 %v1019_v63, %v1019_v63  ;;  %v2073_v6 = vpack.c.bf16 %v1051_v0, %v1051_v0  ;;  %v1020_v7 = vmax.f32 %v798_v1, 0.0  ;;  %v1052_v8 = vmax.f32 %v926_v2, 0.0 }
 0x14d   : > { %1340 = vst.msk [vmem:[%s2633_s12 + $0x28] sm:$0xf] %vm1329_vm0, %v2041_v5  ;;  %1372 = vst.msk [vmem:[%s2633_s12 + $0xa8] sm:$0xf] %vm1329_vm0, %v2073_v6  ;;  %v2042_v9 = vpack.c.bf16 %v1020_v7, %v1020_v7  ;;  %v2074_v10 = vpack.c.bf16 %v1052_v8, %v1052_v8 }
 0x14e   : > { %v802_v11 = vpop.f32.mrb[24].mxu0  ;;  %v930_v12 = vpop.f32.mrb[24].mxu1 }
 0x14f   : > { %1341 = vst.msk [vmem:[%s2633_s12 + $0x2c] sm:$0xf] %vm1329_vm0, %v2042_v9  ;;  %1373 = vst.msk [vmem:[%s2633_s12 + $0xac] sm:$0xf] %vm1329_vm0, %v2074_v10  ;;  %v803_v13 = vadd.f32 %v2627_v17, %v802_v11  ;;  %v931_v14 = vadd.f32 %v2627_v17, %v930_v12  ;;  %v804_v15 = vpop.f32.mrb[25].mxu0  ;;  %v932_v16 = vpop.f32.mrb[25].mxu1 }
 0x150   : > { %v805_v18 = vpop.f32.mrb[26].mxu0  ;;  %v933_v19 = vpop.f32.mrb[26].mxu1 }
 0x151   : > { %v1021_v20 = vmax.f32 %v803_v13, 0.0  ;;  %v1053_v21 = vmax.f32 %v931_v14, 0.0  ;;  %v806_v22 = vadd.f32 %v2627_v17, %v805_v18  ;;  %v934_v23 = vadd.f32 %v2627_v17, %v933_v19  ;;  %v807_v24 = vpop.f32.mrb[27].mxu0  ;;  %v935_v25 = vpop.f32.mrb[27].mxu1 }
 0x153   : > { %v2043_v26 = vpack.c.bf16 %v1021_v20, %v1021_v20  ;;  %v2075_v27 = vpack.c.bf16 %v1053_v21, %v1053_v21  ;;  %v1022_v28 = vmax.f32 %v806_v22, 0.0  ;;  %v1054_v29 = vmax.f32 %v934_v23, 0.0 }
 0x155   : > { %1342 = vst.msk [vmem:[%s2633_s12 + $0x30] sm:$0xf] %vm1329_vm0, %v2043_v26  ;;  %1374 = vst.msk [vmem:[%s2633_s12 + $0xb0] sm:$0xf] %vm1329_vm0, %v2075_v27  ;;  %v2044_v30 = vpack.c.bf16 %v1022_v28, %v1022_v28  ;;  %v2076_v31 = vpack.c.bf16 %v1054_v29, %v1054_v29 }
 0x156   : > { %v810_v32 = vpop.f32.mrb[28].mxu0  ;;  %v938_v33 = vpop.f32.mrb[28].mxu1 }
 0x157   : > { %1343 = vst.msk [vmem:[%s2633_s12 + $0x34] sm:$0xf] %vm1329_vm0, %v2044_v30  ;;  %1375 = vst.msk [vmem:[%s2633_s12 + $0xb4] sm:$0xf] %vm1329_vm0, %v2076_v31  ;;  %v811_v34 = vadd.f32 %v2627_v17, %v810_v32  ;;  %v939_v35 = vadd.f32 %v2627_v17, %v938_v33  ;;  %v812_v36 = vpop.f32.mrb[29].mxu0  ;;  %v940_v37 = vpop.f32.mrb[29].mxu1 }
 0x158   : > { %v813_v38 = vpop.f32.mrb[30].mxu0  ;;  %v941_v39 = vpop.f32.mrb[30].mxu1 }
 0x159   : > { %v1023_v40 = vmax.f32 %v811_v34, 0.0  ;;  %v1055_v41 = vmax.f32 %v939_v35, 0.0  ;;  %v814_v42 = vadd.f32 %v2627_v17, %v813_v38  ;;  %v942_v43 = vadd.f32 %v2627_v17, %v941_v39  ;;  %v815_v44 = vpop.f32.mrb[31].mxu0  ;;  %v943_v45 = vpop.f32.mrb[31].mxu1 }
 0x15b   : > { %v2045_v46 = vpack.c.bf16 %v1023_v40, %v1023_v40  ;;  %v2077_v47 = vpack.c.bf16 %v1055_v41, %v1055_v41  ;;  %v1024_v48 = vmax.f32 %v814_v42, 0.0  ;;  %v1056_v49 = vmax.f32 %v942_v43, 0.0 }
 0x15d   : > { %1344 = vst.msk [vmem:[%s2633_s12 + $0x38] sm:$0xf] %vm1329_vm0, %v2045_v46  ;;  %1376 = vst.msk [vmem:[%s2633_s12 + $0xb8] sm:$0xf] %vm1329_vm0, %v2077_v47  ;;  %v2046_v50 = vpack.c.bf16 %v1024_v48, %v1024_v48  ;;  %v2078_v51 = vpack.c.bf16 %v1056_v49, %v1056_v49 }
 0x15e   : > { %v818_v52 = vpop.f32.mrb[32].mxu0  ;;  %v946_v53 = vpop.f32.mrb[32].mxu1 }
 0x15f   : > { %1345 = vst.msk [vmem:[%s2633_s12 + $0x3c] sm:$0xf] %vm1329_vm0, %v2046_v50  ;;  %1377 = vst.msk [vmem:[%s2633_s12 + $0xbc] sm:$0xf] %vm1329_vm0, %v2078_v51  ;;  %v819_v54 = vadd.f32 %v2627_v17, %v818_v52  ;;  %v947_v55 = vadd.f32 %v2627_v17, %v946_v53  ;;  %v820_v56 = vpop.f32.mrb[33].mxu0  ;;  %v948_v57 = vpop.f32.mrb[33].mxu1 }
 0x160   : > { %v821_v58 = vpop.f32.mrb[34].mxu0  ;;  %v949_v59 = vpop.f32.mrb[34].mxu1 }
 0x161   : > { %v1025_v60 = vmax.f32 %v819_v54, 0.0  ;;  %v1057_v61 = vmax.f32 %v947_v55, 0.0  ;;  %v822_v62 = vadd.f32 %v2627_v17, %v821_v58  ;;  %v950_v63 = vadd.f32 %v2627_v17, %v949_v59  ;;  %v823_v0 = vpop.f32.mrb[35].mxu0  ;;  %v951_v1 = vpop.f32.mrb[35].mxu1 }
 0x163   : > { %v2047_v2 = vpack.c.bf16 %v1025_v60, %v1025_v60  ;;  %v2079_v3 = vpack.c.bf16 %v1057_v61, %v1057_v61  ;;  %v1026_v4 = vmax.f32 %v822_v62, 0.0  ;;  %v1058_v5 = vmax.f32 %v950_v63, 0.0 }
 0x165   : > { %1346 = vst.msk [vmem:[%s2633_s12 + $0x40] sm:$0xf] %vm1329_vm0, %v2047_v2  ;;  %1378 = vst.msk [vmem:[%s2633_s12 + $0xc0] sm:$0xf] %vm1329_vm0, %v2079_v3  ;;  %v2048_v6 = vpack.c.bf16 %v1026_v4, %v1026_v4  ;;  %v2080_v7 = vpack.c.bf16 %v1058_v5, %v1058_v5 }
 0x166   : > { %v826_v8 = vpop.f32.mrb[36].mxu0  ;;  %v954_v9 = vpop.f32.mrb[36].mxu1 }
 0x167   : > { %1347 = vst.msk [vmem:[%s2633_s12 + $0x44] sm:$0xf] %vm1329_vm0, %v2048_v6  ;;  %1379 = vst.msk [vmem:[%s2633_s12 + $0xc4] sm:$0xf] %vm1329_vm0, %v2080_v7  ;;  %v827_v10 = vadd.f32 %v2627_v17, %v826_v8  ;;  %v955_v11 = vadd.f32 %v2627_v17, %v954_v9  ;;  %v828_v12 = vpop.f32.mrb[37].mxu0  ;;  %v956_v13 = vpop.f32.mrb[37].mxu1 }
 0x168   : > { %v829_v14 = vpop.f32.mrb[38].mxu0  ;;  %v957_v15 = vpop.f32.mrb[38].mxu1 }
 0x169   : > { %v1027_v16 = vmax.f32 %v827_v10, 0.0  ;;  %v1059_v18 = vmax.f32 %v955_v11, 0.0  ;;  %v830_v19 = vadd.f32 %v2627_v17, %v829_v14  ;;  %v958_v20 = vadd.f32 %v2627_v17, %v957_v15  ;;  %v831_v21 = vpop.f32.mrb[39].mxu0  ;;  %v959_v22 = vpop.f32.mrb[39].mxu1 }
 0x16b   : > { %v2049_v23 = vpack.c.bf16 %v1027_v16, %v1027_v16  ;;  %v2081_v24 = vpack.c.bf16 %v1059_v18, %v1059_v18  ;;  %v1028_v25 = vmax.f32 %v830_v19, 0.0  ;;  %v1060_v26 = vmax.f32 %v958_v20, 0.0 }
 0x16d   : > { %1348 = vst.msk [vmem:[%s2633_s12 + $0x48] sm:$0xf] %vm1329_vm0, %v2049_v23  ;;  %1380 = vst.msk [vmem:[%s2633_s12 + $0xc8] sm:$0xf] %vm1329_vm0, %v2081_v24  ;;  %v2050_v27 = vpack.c.bf16 %v1028_v25, %v1028_v25  ;;  %v2082_v28 = vpack.c.bf16 %v1060_v26, %v1060_v26 }
 0x16e   : > { %v834_v29 = vpop.f32.mrb[40].mxu0  ;;  %v962_v30 = vpop.f32.mrb[40].mxu1 }
 0x16f   : > { %1349 = vst.msk [vmem:[%s2633_s12 + $0x4c] sm:$0xf] %vm1329_vm0, %v2050_v27  ;;  %1381 = vst.msk [vmem:[%s2633_s12 + $0xcc] sm:$0xf] %vm1329_vm0, %v2082_v28  ;;  %v835_v31 = vadd.f32 %v2627_v17, %v834_v29  ;;  %v963_v32 = vadd.f32 %v2627_v17, %v962_v30  ;;  %v836_v33 = vpop.f32.mrb[41].mxu0  ;;  %v964_v34 = vpop.f32.mrb[41].mxu1 }
 0x170   : > { %v837_v35 = vpop.f32.mrb[42].mxu0  ;;  %v965_v36 = vpop.f32.mrb[42].mxu1 }
 0x171   : > { %v1029_v37 = vmax.f32 %v835_v31, 0.0  ;;  %v1061_v38 = vmax.f32 %v963_v32, 0.0  ;;  %v838_v39 = vadd.f32 %v2627_v17, %v837_v35  ;;  %v966_v40 = vadd.f32 %v2627_v17, %v965_v36  ;;  %v839_v41 = vpop.f32.mrb[43].mxu0  ;;  %v967_v42 = vpop.f32.mrb[43].mxu1 }
 0x173   : > { %v2051_v43 = vpack.c.bf16 %v1029_v37, %v1029_v37  ;;  %v2083_v44 = vpack.c.bf16 %v1061_v38, %v1061_v38  ;;  %v1030_v45 = vmax.f32 %v838_v39, 0.0  ;;  %v1062_v46 = vmax.f32 %v966_v40, 0.0 }
 0x175   : > { %1350 = vst.msk [vmem:[%s2633_s12 + $0x50] sm:$0xf] %vm1329_vm0, %v2051_v43  ;;  %1382 = vst.msk [vmem:[%s2633_s12 + $0xd0] sm:$0xf] %vm1329_vm0, %v2083_v44  ;;  %v2052_v47 = vpack.c.bf16 %v1030_v45, %v1030_v45  ;;  %v2084_v48 = vpack.c.bf16 %v1062_v46, %v1062_v46 }
 0x176   : > { %v842_v49 = vpop.f32.mrb[44].mxu0  ;;  %v970_v50 = vpop.f32.mrb[44].mxu1 }
 0x177   : > { %1351 = vst.msk [vmem:[%s2633_s12 + $0x54] sm:$0xf] %vm1329_vm0, %v2052_v47  ;;  %1383 = vst.msk [vmem:[%s2633_s12 + $0xd4] sm:$0xf] %vm1329_vm0, %v2084_v48  ;;  %v843_v51 = vadd.f32 %v2627_v17, %v842_v49  ;;  %v971_v52 = vadd.f32 %v2627_v17, %v970_v50  ;;  %v844_v53 = vpop.f32.mrb[45].mxu0  ;;  %v972_v54 = vpop.f32.mrb[45].mxu1 }
 0x178   : > { %v845_v55 = vpop.f32.mrb[46].mxu0  ;;  %v973_v56 = vpop.f32.mrb[46].mxu1 }
 0x179   : > { %v1031_v57 = vmax.f32 %v843_v51, 0.0  ;;  %v1063_v58 = vmax.f32 %v971_v52, 0.0  ;;  %v846_v59 = vadd.f32 %v2627_v17, %v845_v55  ;;  %v974_v60 = vadd.f32 %v2627_v17, %v973_v56  ;;  %v847_v61 = vpop.f32.mrb[47].mxu0  ;;  %v975_v62 = vpop.f32.mrb[47].mxu1 }
 0x17b   : > { %v2053_v63 = vpack.c.bf16 %v1031_v57, %v1031_v57  ;;  %v2085_v0 = vpack.c.bf16 %v1063_v58, %v1063_v58  ;;  %v1032_v1 = vmax.f32 %v846_v59, 0.0  ;;  %v1064_v2 = vmax.f32 %v974_v60, 0.0 }
 0x17d   : > { %1352 = vst.msk [vmem:[%s2633_s12 + $0x58] sm:$0xf] %vm1329_vm0, %v2053_v63  ;;  %1384 = vst.msk [vmem:[%s2633_s12 + $0xd8] sm:$0xf] %vm1329_vm0, %v2085_v0  ;;  %v2054_v3 = vpack.c.bf16 %v1032_v1, %v1032_v1  ;;  %v2086_v4 = vpack.c.bf16 %v1064_v2, %v1064_v2 }
 0x17e   : > { %v850_v5 = vpop.f32.mrb[48].mxu0  ;;  %v978_v6 = vpop.f32.mrb[48].mxu1 }
 0x17f   : > { %1353 = vst.msk [vmem:[%s2633_s12 + $0x5c] sm:$0xf] %vm1329_vm0, %v2054_v3  ;;  %1385 = vst.msk [vmem:[%s2633_s12 + $0xdc] sm:$0xf] %vm1329_vm0, %v2086_v4  ;;  %v851_v7 = vadd.f32 %v2627_v17, %v850_v5  ;;  %v979_v8 = vadd.f32 %v2627_v17, %v978_v6  ;;  %v852_v9 = vpop.f32.mrb[49].mxu0  ;;  %v980_v10 = vpop.f32.mrb[49].mxu1 }
 0x180   : > { %v853_v11 = vpop.f32.mrb[50].mxu0  ;;  %v981_v12 = vpop.f32.mrb[50].mxu1 }
 0x181   : > { %v1033_v13 = vmax.f32 %v851_v7, 0.0  ;;  %v1065_v14 = vmax.f32 %v979_v8, 0.0  ;;  %v854_v15 = vadd.f32 %v2627_v17, %v853_v11  ;;  %v982_v16 = vadd.f32 %v2627_v17, %v981_v12  ;;  %v855_v18 = vpop.f32.mrb[51].mxu0  ;;  %v983_v19 = vpop.f32.mrb[51].mxu1 }
 0x183   : > { %v2055_v20 = vpack.c.bf16 %v1033_v13, %v1033_v13  ;;  %v2087_v21 = vpack.c.bf16 %v1065_v14, %v1065_v14  ;;  %v1034_v22 = vmax.f32 %v854_v15, 0.0  ;;  %v1066_v23 = vmax.f32 %v982_v16, 0.0 }
 0x185   : > { %1354 = vst.msk [vmem:[%s2633_s12 + $0x60] sm:$0xf] %vm1329_vm0, %v2055_v20  ;;  %1386 = vst.msk [vmem:[%s2633_s12 + $0xe0] sm:$0xf] %vm1329_vm0, %v2087_v21  ;;  %v2056_v24 = vpack.c.bf16 %v1034_v22, %v1034_v22  ;;  %v2088_v25 = vpack.c.bf16 %v1066_v23, %v1066_v23 }
 0x186   : > { %v858_v26 = vpop.f32.mrb[52].mxu0  ;;  %v986_v27 = vpop.f32.mrb[52].mxu1 }
 0x187   : > { %1355 = vst.msk [vmem:[%s2633_s12 + $0x64] sm:$0xf] %vm1329_vm0, %v2056_v24  ;;  %1387 = vst.msk [vmem:[%s2633_s12 + $0xe4] sm:$0xf] %vm1329_vm0, %v2088_v25  ;;  %v859_v28 = vadd.f32 %v2627_v17, %v858_v26  ;;  %v987_v29 = vadd.f32 %v2627_v17, %v986_v27  ;;  %v860_v30 = vpop.f32.mrb[53].mxu0  ;;  %v988_v31 = vpop.f32.mrb[53].mxu1 }
 0x188   : > { %v861_v32 = vpop.f32.mrb[54].mxu0  ;;  %v989_v33 = vpop.f32.mrb[54].mxu1 }
 0x189   : > { %v1035_v34 = vmax.f32 %v859_v28, 0.0  ;;  %v1067_v35 = vmax.f32 %v987_v29, 0.0  ;;  %v862_v36 = vadd.f32 %v2627_v17, %v861_v32  ;;  %v990_v37 = vadd.f32 %v2627_v17, %v989_v33  ;;  %v863_v38 = vpop.f32.mrb[55].mxu0  ;;  %v991_v39 = vpop.f32.mrb[55].mxu1 }
 0x18b   : > { %v2057_v40 = vpack.c.bf16 %v1035_v34, %v1035_v34  ;;  %v2089_v41 = vpack.c.bf16 %v1067_v35, %v1067_v35  ;;  %v1036_v42 = vmax.f32 %v862_v36, 0.0  ;;  %v1068_v43 = vmax.f32 %v990_v37, 0.0 }
 0x18d   : > { %1356 = vst.msk [vmem:[%s2633_s12 + $0x68] sm:$0xf] %vm1329_vm0, %v2057_v40  ;;  %1388 = vst.msk [vmem:[%s2633_s12 + $0xe8] sm:$0xf] %vm1329_vm0, %v2089_v41  ;;  %v2058_v44 = vpack.c.bf16 %v1036_v42, %v1036_v42  ;;  %v2090_v45 = vpack.c.bf16 %v1068_v43, %v1068_v43 }
 0x18e   : > { %v866_v46 = vpop.f32.mrb[56].mxu0  ;;  %v994_v47 = vpop.f32.mrb[56].mxu1 }
 0x18f   : > { %1357 = vst.msk [vmem:[%s2633_s12 + $0x6c] sm:$0xf] %vm1329_vm0, %v2058_v44  ;;  %1389 = vst.msk [vmem:[%s2633_s12 + $0xec] sm:$0xf] %vm1329_vm0, %v2090_v45  ;;  %v867_v48 = vadd.f32 %v2627_v17, %v866_v46  ;;  %v995_v49 = vadd.f32 %v2627_v17, %v994_v47  ;;  %v868_v50 = vpop.f32.mrb[57].mxu0  ;;  %v996_v51 = vpop.f32.mrb[57].mxu1 }
 0x190   : > { %v869_v52 = vpop.f32.mrb[58].mxu0  ;;  %v997_v53 = vpop.f32.mrb[58].mxu1 }
 0x191   : > { %v1037_v54 = vmax.f32 %v867_v48, 0.0  ;;  %v1069_v55 = vmax.f32 %v995_v49, 0.0  ;;  %v870_v56 = vadd.f32 %v2627_v17, %v869_v52  ;;  %v998_v57 = vadd.f32 %v2627_v17, %v997_v53  ;;  %v871_v58 = vpop.f32.mrb[59].mxu0  ;;  %v999_v59 = vpop.f32.mrb[59].mxu1 }
 0x193   : > { %v2059_v60 = vpack.c.bf16 %v1037_v54, %v1037_v54  ;;  %v2091_v61 = vpack.c.bf16 %v1069_v55, %v1069_v55  ;;  %v1038_v62 = vmax.f32 %v870_v56, 0.0  ;;  %v1070_v63 = vmax.f32 %v998_v57, 0.0 }
 0x195   : > { %1358 = vst.msk [vmem:[%s2633_s12 + $0x70] sm:$0xf] %vm1329_vm0, %v2059_v60  ;;  %1390 = vst.msk [vmem:[%s2633_s12 + $0xf0] sm:$0xf] %vm1329_vm0, %v2091_v61  ;;  %v2060_v0 = vpack.c.bf16 %v1038_v62, %v1038_v62  ;;  %v2092_v1 = vpack.c.bf16 %v1070_v63, %v1070_v63 }
 0x196   : > { %v874_v2 = vpop.f32.mrb[60].mxu0  ;;  %v1002_v3 = vpop.f32.mrb[60].mxu1 }
 0x197   : > { %1359 = vst.msk [vmem:[%s2633_s12 + $0x74] sm:$0xf] %vm1329_vm0, %v2060_v0  ;;  %1391 = vst.msk [vmem:[%s2633_s12 + $0xf4] sm:$0xf] %vm1329_vm0, %v2092_v1  ;;  %v875_v4 = vadd.f32 %v2627_v17, %v874_v2  ;;  %v1003_v5 = vadd.f32 %v2627_v17, %v1002_v3  ;;  %v876_v6 = vpop.f32.mrb[61].mxu0  ;;  %v1004_v7 = vpop.f32.mrb[61].mxu1 }
 0x198   : > { %v877_v8 = vpop.f32.mrb[62].mxu0  ;;  %v1005_v9 = vpop.f32.mrb[62].mxu1 }
 0x199   : > { %v1039_v10 = vmax.f32 %v875_v4, 0.0  ;;  %v1071_v11 = vmax.f32 %v1003_v5, 0.0  ;;  %v878_v12 = vadd.f32 %v2627_v17, %v877_v8  ;;  %v1006_v13 = vadd.f32 %v2627_v17, %v1005_v9  ;;  %v879_v14 = vpop.f32.mrb[63].mxu0  ;;  %v1007_v15 = vpop.f32.mrb[63].mxu1  ;;  %1400 = sbr.rel (!%p2465_p4) target bundleno = 507 (0x1fb), region = 36 }
 0x19b   : > { %v2061_v16 = vpack.c.bf16 %v1039_v10, %v1039_v10  ;;  %v2093_v18 = vpack.c.bf16 %v1071_v11, %v1071_v11  ;;  %v1040_v19 = vmax.f32 %v878_v12, 0.0  ;;  %v1072_v20 = vmax.f32 %v1006_v13, 0.0 }
 0x19d   : > { %1360 = vst.msk [vmem:[%s2633_s12 + $0x78] sm:$0xf] %vm1329_vm0, %v2061_v16  ;;  %1392 = vst.msk [vmem:[%s2633_s12 + $0xf8] sm:$0xf] %vm1329_vm0, %v2093_v18  ;;  %v2062_v21 = vpack.c.bf16 %v1040_v19, %v1040_v19  ;;  %v2094_v22 = vpack.c.bf16 %v1072_v20, %v1072_v20 }
 0x19f   : > { %1361 = vst.msk [vmem:[%s2633_s12 + $0x7c] sm:$0xf] %vm1329_vm0, %v2062_v21  ;;  %1393 = vst.msk [vmem:[%s2633_s12 + $0xfc] sm:$0xf] %vm1329_vm0, %v2094_v22 }
 0x1a0   : > { %s3034_s9 = smov (!%p1403_p8, %s1402_s9), 64 }
 0x1a1   : > { %s2015_s28 = sshll.u32 %s3034_s9, 6 }
 0x1a2   : > { %p2018_p9 = scmp.eq.s32.totalorder %s2015_s28, 0 }
 0x1a3   : > { %s2836_s29 = sshrl.u32 (!%p2018_p9), %s3034_s9, 6 }
 0x1a4   : > { %1411 = sbr.rel (%p2018_p9) target bundleno = 507 (0x1fb), region = 40  ;;  %p2019_p10 = scmp.le.s32.totalorder (!%p2018_p9), %s2836_s29, 0 }
 0x1ab   : > { %1816 = sbr.rel (%p2019_p10) target bundleno = 486 (0x1e6), region = 112  ;;  %s3027_s15 = smov (!%p2019_p10), %s2830_s27 }
 0x1ac   : > { %s3028_s20 = smov (!%p2019_p10), %s2633_s12  ;;  %s2845_s23 = smov (!%p2019_p10), 0  }
 0x1ad   : > { %s2847_s30 = smov (!%p2019_p10), 0  }
 0x1b2 LB: >> { %v1427_v17 = vld [vmem:[%s2393_s20] sm:$0xf]  ;;  %v1429_v23 = vld [vmem:[%s2393_s20 + $0x4] sm:$0xf]  ;;  %v1431_v24 = vld [vmem:[%s2393_s20 + $0x8] sm:$0xf]  ;;  %s2401_s30 = sphi %s2847_s30, %s1421_s30   ;;  %s2397_s23 = sphi %s2845_s23, %s3029_s23   ;;  %s2393_s20 = sphi %s3028_s20, %s1560_s20   ;;  %s2389_s15 = sphi %s3027_s15, %s1561_s15  }
 0x1b3   : >> { %1428 = vst [vmem:[%s2389_s15] sm:$0xf] %v1427_v17  ;;  %1430 = vst [vmem:[%s2389_s15 + $0x4] sm:$0xf] %v1429_v23  ;;  %v1433_v25 = vld [vmem:[%s2393_s20 + $0xc] sm:$0xf]  ;;  %s1555_s4 = sadd.s32 1, %s2397_s23 }
 0x1b4   : >> { %1432 = vst [vmem:[%s2389_s15 + $0x8] sm:$0xf] %v1431_v24  ;;  %v1435_v26 = vld [vmem:[%s2393_s20 + $0x10] sm:$0xf]  ;;  %v1437_v27 = vld [vmem:[%s2393_s20 + $0x14] sm:$0xf]  ;;  %p1556_p11 = scmp.ge.s32.totalorder %s1555_s4, %s2836_s29 }
 0x1b5   : >> { %1434 = vst [vmem:[%s2389_s15 + $0xc] sm:$0xf] %v1433_v25  ;;  %1436 = vst [vmem:[%s2389_s15 + $0x10] sm:$0xf] %v1435_v26  ;;  %v1439_v28 = vld [vmem:[%s2393_s20 + $0x18] sm:$0xf] }
 0x1b6   : >> { %1438 = vst [vmem:[%s2389_s15 + $0x14] sm:$0xf] %v1437_v27  ;;  %v1441_v29 = vld [vmem:[%s2393_s20 + $0x1c] sm:$0xf]  ;;  %v1443_v30 = vld [vmem:[%s2393_s20 + $0x20] sm:$0xf] }
 0x1b7   : >> { %1440 = vst [vmem:[%s2389_s15 + $0x18] sm:$0xf] %v1439_v28  ;;  %1442 = vst [vmem:[%s2389_s15 + $0x1c] sm:$0xf] %v1441_v29  ;;  %v1445_v31 = vld [vmem:[%s2393_s20 + $0x24] sm:$0xf] }
 0x1b8   : >> { %1444 = vst [vmem:[%s2389_s15 + $0x20] sm:$0xf] %v1443_v30  ;;  %v1447_v32 = vld [vmem:[%s2393_s20 + $0x28] sm:$0xf]  ;;  %v1449_v33 = vld [vmem:[%s2393_s20 + $0x2c] sm:$0xf] }
 0x1b9   : >> { %1446 = vst [vmem:[%s2389_s15 + $0x24] sm:$0xf] %v1445_v31  ;;  %1448 = vst [vmem:[%s2389_s15 + $0x28] sm:$0xf] %v1447_v32  ;;  %v1451_v34 = vld [vmem:[%s2393_s20 + $0x30] sm:$0xf] }
 0x1ba   : >> { %1450 = vst [vmem:[%s2389_s15 + $0x2c] sm:$0xf] %v1449_v33  ;;  %v1453_v35 = vld [vmem:[%s2393_s20 + $0x34] sm:$0xf]  ;;  %v1455_v36 = vld [vmem:[%s2393_s20 + $0x38] sm:$0xf] }
 0x1bb   : >> { %1452 = vst [vmem:[%s2389_s15 + $0x30] sm:$0xf] %v1451_v34  ;;  %1454 = vst [vmem:[%s2389_s15 + $0x34] sm:$0xf] %v1453_v35  ;;  %v1457_v37 = vld [vmem:[%s2393_s20 + $0x3c] sm:$0xf] }
 0x1bc   : >> { %1456 = vst [vmem:[%s2389_s15 + $0x38] sm:$0xf] %v1455_v36  ;;  %v1459_v38 = vld [vmem:[%s2393_s20 + $0x40] sm:$0xf]  ;;  %v1461_v39 = vld [vmem:[%s2393_s20 + $0x44] sm:$0xf] }
 0x1bd   : >> { %1458 = vst [vmem:[%s2389_s15 + $0x3c] sm:$0xf] %v1457_v37  ;;  %1460 = vst [vmem:[%s2389_s15 + $0x40] sm:$0xf] %v1459_v38  ;;  %v1463_v40 = vld [vmem:[%s2393_s20 + $0x48] sm:$0xf] }
 0x1be   : >> { %1462 = vst [vmem:[%s2389_s15 + $0x44] sm:$0xf] %v1461_v39  ;;  %v1465_v41 = vld [vmem:[%s2393_s20 + $0x4c] sm:$0xf]  ;;  %v1467_v42 = vld [vmem:[%s2393_s20 + $0x50] sm:$0xf] }
 0x1bf   : >> { %1464 = vst [vmem:[%s2389_s15 + $0x48] sm:$0xf] %v1463_v40  ;;  %1466 = vst [vmem:[%s2389_s15 + $0x4c] sm:$0xf] %v1465_v41  ;;  %v1469_v43 = vld [vmem:[%s2393_s20 + $0x54] sm:$0xf] }
 0x1c0   : >> { %1468 = vst [vmem:[%s2389_s15 + $0x50] sm:$0xf] %v1467_v42  ;;  %v1471_v44 = vld [vmem:[%s2393_s20 + $0x58] sm:$0xf]  ;;  %v1473_v45 = vld [vmem:[%s2393_s20 + $0x5c] sm:$0xf] }
 0x1c1   : >> { %1470 = vst [vmem:[%s2389_s15 + $0x54] sm:$0xf] %v1469_v43  ;;  %1472 = vst [vmem:[%s2389_s15 + $0x58] sm:$0xf] %v1471_v44  ;;  %v1475_v46 = vld [vmem:[%s2393_s20 + $0x60] sm:$0xf] }
 0x1c2   : >> { %1474 = vst [vmem:[%s2389_s15 + $0x5c] sm:$0xf] %v1473_v45  ;;  %v1477_v47 = vld [vmem:[%s2393_s20 + $0x64] sm:$0xf]  ;;  %v1479_v48 = vld [vmem:[%s2393_s20 + $0x68] sm:$0xf] }
 0x1c3   : >> { %1476 = vst [vmem:[%s2389_s15 + $0x60] sm:$0xf] %v1475_v46  ;;  %1478 = vst [vmem:[%s2389_s15 + $0x64] sm:$0xf] %v1477_v47  ;;  %v1481_v49 = vld [vmem:[%s2393_s20 + $0x6c] sm:$0xf] }
 0x1c4   : >> { %1480 = vst [vmem:[%s2389_s15 + $0x68] sm:$0xf] %v1479_v48  ;;  %v1483_v50 = vld [vmem:[%s2393_s20 + $0x70] sm:$0xf]  ;;  %v1485_v51 = vld [vmem:[%s2393_s20 + $0x74] sm:$0xf] }
 0x1c5   : >> { %1482 = vst [vmem:[%s2389_s15 + $0x6c] sm:$0xf] %v1481_v49  ;;  %1484 = vst [vmem:[%s2389_s15 + $0x70] sm:$0xf] %v1483_v50  ;;  %v1487_v52 = vld [vmem:[%s2393_s20 + $0x78] sm:$0xf] }
 0x1c6   : >> { %1486 = vst [vmem:[%s2389_s15 + $0x74] sm:$0xf] %v1485_v51  ;;  %v1489_v53 = vld [vmem:[%s2393_s20 + $0x7c] sm:$0xf]  ;;  %v1491_v54 = vld [vmem:[%s2393_s20 + $0x80] sm:$0xf] }
 0x1c7   : >> { %1488 = vst [vmem:[%s2389_s15 + $0x78] sm:$0xf] %v1487_v52  ;;  %1490 = vst [vmem:[%s2389_s15 + $0x7c] sm:$0xf] %v1489_v53  ;;  %v1493_v55 = vld [vmem:[%s2393_s20 + $0x84] sm:$0xf] }
 0x1c8   : >> { %1492 = vst [vmem:[%s2389_s15 + $0x80] sm:$0xf] %v1491_v54  ;;  %v1495_v56 = vld [vmem:[%s2393_s20 + $0x88] sm:$0xf]  ;;  %v1497_v57 = vld [vmem:[%s2393_s20 + $0x8c] sm:$0xf] }
 0x1c9   : >> { %1494 = vst [vmem:[%s2389_s15 + $0x84] sm:$0xf] %v1493_v55  ;;  %1496 = vst [vmem:[%s2389_s15 + $0x88] sm:$0xf] %v1495_v56  ;;  %v1499_v58 = vld [vmem:[%s2393_s20 + $0x90] sm:$0xf] }
 0x1ca   : >> { %1498 = vst [vmem:[%s2389_s15 + $0x8c] sm:$0xf] %v1497_v57  ;;  %v1501_v59 = vld [vmem:[%s2393_s20 + $0x94] sm:$0xf]  ;;  %v1503_v60 = vld [vmem:[%s2393_s20 + $0x98] sm:$0xf] }
 0x1cb   : >> { %1500 = vst [vmem:[%s2389_s15 + $0x90] sm:$0xf] %v1499_v58  ;;  %1502 = vst [vmem:[%s2389_s15 + $0x94] sm:$0xf] %v1501_v59  ;;  %v1505_v61 = vld [vmem:[%s2393_s20 + $0x9c] sm:$0xf] }
 0x1cc   : >> { %1504 = vst [vmem:[%s2389_s15 + $0x98] sm:$0xf] %v1503_v60  ;;  %v1507_v62 = vld [vmem:[%s2393_s20 + $0xa0] sm:$0xf]  ;;  %v1509_v63 = vld [vmem:[%s2393_s20 + $0xa4] sm:$0xf] }
 0x1cd   : >> { %1506 = vst [vmem:[%s2389_s15 + $0x9c] sm:$0xf] %v1505_v61  ;;  %1508 = vst [vmem:[%s2389_s15 + $0xa0] sm:$0xf] %v1507_v62  ;;  %v1511_v0 = vld [vmem:[%s2393_s20 + $0xa8] sm:$0xf] }
 0x1ce   : >> { %1510 = vst [vmem:[%s2389_s15 + $0xa4] sm:$0xf] %v1509_v63  ;;  %v1513_v1 = vld [vmem:[%s2393_s20 + $0xac] sm:$0xf]  ;;  %v1515_v2 = vld [vmem:[%s2393_s20 + $0xb0] sm:$0xf] }
 0x1cf   : >> { %1512 = vst [vmem:[%s2389_s15 + $0xa8] sm:$0xf] %v1511_v0  ;;  %1514 = vst [vmem:[%s2389_s15 + $0xac] sm:$0xf] %v1513_v1  ;;  %v1517_v3 = vld [vmem:[%s2393_s20 + $0xb4] sm:$0xf] }
 0x1d0   : >> { %1516 = vst [vmem:[%s2389_s15 + $0xb0] sm:$0xf] %v1515_v2  ;;  %v1519_v4 = vld [vmem:[%s2393_s20 + $0xb8] sm:$0xf]  ;;  %v1521_v5 = vld [vmem:[%s2393_s20 + $0xbc] sm:$0xf] }
 0x1d1   : >> { %1518 = vst [vmem:[%s2389_s15 + $0xb4] sm:$0xf] %v1517_v3  ;;  %1520 = vst [vmem:[%s2389_s15 + $0xb8] sm:$0xf] %v1519_v4  ;;  %v1523_v6 = vld [vmem:[%s2393_s20 + $0xc0] sm:$0xf] }
 0x1d2   : >> { %1522 = vst [vmem:[%s2389_s15 + $0xbc] sm:$0xf] %v1521_v5  ;;  %v1525_v7 = vld [vmem:[%s2393_s20 + $0xc4] sm:$0xf]  ;;  %v1527_v8 = vld [vmem:[%s2393_s20 + $0xc8] sm:$0xf] }
 0x1d3   : >> { %1524 = vst [vmem:[%s2389_s15 + $0xc0] sm:$0xf] %v1523_v6  ;;  %1526 = vst [vmem:[%s2389_s15 + $0xc4] sm:$0xf] %v1525_v7  ;;  %v1529_v9 = vld [vmem:[%s2393_s20 + $0xcc] sm:$0xf] }
 0x1d4   : >> { %1528 = vst [vmem:[%s2389_s15 + $0xc8] sm:$0xf] %v1527_v8  ;;  %v1531_v10 = vld [vmem:[%s2393_s20 + $0xd0] sm:$0xf]  ;;  %v1533_v11 = vld [vmem:[%s2393_s20 + $0xd4] sm:$0xf] }
 0x1d5   : >> { %1530 = vst [vmem:[%s2389_s15 + $0xcc] sm:$0xf] %v1529_v9  ;;  %1532 = vst [vmem:[%s2389_s15 + $0xd0] sm:$0xf] %v1531_v10  ;;  %v1535_v12 = vld [vmem:[%s2393_s20 + $0xd8] sm:$0xf] }
 0x1d6   : >> { %1534 = vst [vmem:[%s2389_s15 + $0xd4] sm:$0xf] %v1533_v11  ;;  %v1537_v13 = vld [vmem:[%s2393_s20 + $0xdc] sm:$0xf]  ;;  %v1539_v14 = vld [vmem:[%s2393_s20 + $0xe0] sm:$0xf] }
 0x1d7   : >> { %1536 = vst [vmem:[%s2389_s15 + $0xd8] sm:$0xf] %v1535_v12  ;;  %1538 = vst [vmem:[%s2389_s15 + $0xdc] sm:$0xf] %v1537_v13  ;;  %v1541_v15 = vld [vmem:[%s2393_s20 + $0xe4] sm:$0xf] }
 0x1d8   : >> { %1540 = vst [vmem:[%s2389_s15 + $0xe0] sm:$0xf] %v1539_v14  ;;  %v1543_v16 = vld [vmem:[%s2393_s20 + $0xe8] sm:$0xf]  ;;  %v1545_v18 = vld [vmem:[%s2393_s20 + $0xec] sm:$0xf] }
 0x1d9   : >> { %1542 = vst [vmem:[%s2389_s15 + $0xe4] sm:$0xf] %v1541_v15  ;;  %1544 = vst [vmem:[%s2389_s15 + $0xe8] sm:$0xf] %v1543_v16  ;;  %v1547_v19 = vld [vmem:[%s2393_s20 + $0xf0] sm:$0xf] }
 0x1da   : >> { %1546 = vst [vmem:[%s2389_s15 + $0xec] sm:$0xf] %v1545_v18  ;;  %v1549_v20 = vld [vmem:[%s2393_s20 + $0xf4] sm:$0xf]  ;;  %v1551_v21 = vld [vmem:[%s2393_s20 + $0xf8] sm:$0xf] }
 0x1db   : >> { %1548 = vst [vmem:[%s2389_s15 + $0xf0] sm:$0xf] %v1547_v19  ;;  %1550 = vst [vmem:[%s2389_s15 + $0xf4] sm:$0xf] %v1549_v20  ;;  %v1553_v22 = vld [vmem:[%s2393_s20 + $0xfc] sm:$0xf] }
 0x1dc   : >> { %1552 = vst [vmem:[%s2389_s15 + $0xf8] sm:$0xf] %v1551_v21  ;;  %1554 = vst [vmem:[%s2389_s15 + $0xfc] sm:$0xf] %v1553_v22  ;;  %s3036_s4 = smov (%p1556_p11, %s1555_s4), 0  ;;  %s1421_s30 = sadd.s32 1, %s2401_s30  }
 0x1dd   : >> { %s2020_s5 = sshll.u32 %s3036_s4, 8  ;;  %p1420_p12 = scmp.ge.s32.totalorder %s1421_s30, %s2836_s29 }
 0x1de   : >> { %s1560_s20 = scalar_lea.vmem %s2633_s12, %s2020_s5 [#allocation2]   ;;  %s1561_s15 = scalar_lea.vmem %s2830_s27, %s2020_s5  }
 0x1df   : >> { %s3029_s23 = smov %s3036_s4  ;;  %1423 = sbr.rel (!%p1420_p12) target bundleno = 434 (0x1b2), region = 118 }
 0x1e6 PF: > { %s3004_s6 = sand.u32 63, %s3034_s9   ;;  %s2096_s7 = sshll.u32 %s2836_s29, 8 }
 0x1e7   : > { %s1566_s8 = scalar_lea.vmem %s2633_s12, %s2096_s7 [#allocation2]   ;;  %s1568_s10 = scalar_lea.vmem %s2830_s27, %s2096_s7  }
 0x1e8   : > { %p2025_p13 = scmp.le.s32.totalorder %s3004_s6, 0 }
 0x1e9   : > { %s2403_s11 = smov (!%p2025_p13), %s1568_s10   ;;  %s2407_s14 = smov (!%p2025_p13), %s1566_s8  }
 0x1ea   : > { %1830 = sbr.rel (%p2025_p13) target bundleno = 507 (0x1fb), region = 123  ;;  %s2411_s17 = smov (!%p2025_p13), 0  }
 0x1eb   : > { %s2415_s18 = smov (!%p2025_p13), 0  }
 0x1f1 LB: >> { %v1578_v17 = vld [vmem:[%s2409_s14] sm:$0xf]  ;;  %s1580_s21 = sadd.s32 1, %s2413_s17  ;;  %s1572_s18 = sadd.s32 1, %s2417_s18   ;;  %s2417_s18 = sphi %s2415_s18, %s1572_s18   ;;  %s2413_s17 = sphi %s2411_s17, %s2412_s17   ;;  %s2409_s14 = sphi %s2407_s14, %s1585_s14   ;;  %s2405_s11 = sphi %s2403_s11, %s1586_s11  }
 0x1f2   : >> { %1579 = vst [vmem:[%s2405_s11] sm:$0xf] %v1578_v17  ;;  %p1581_p0 = scmp.ge.s32.totalorder %s1580_s21, %s3004_s6  ;;  %p1571_p1 = scmp.ge.s32.totalorder %s1572_s18, %s3004_s6 }
 0x1f4   : >> { %s3038_s21 = smov (%p1581_p0, %s1580_s21), 0  ;;  %1574 = sbr.rel (!%p1571_p1) target bundleno = 497 (0x1f1), region = 129 }
 0x1f5   : >> { %s2026_s22 = sshll.u32 %s3038_s21, 2  ;;  %s2412_s17 = smov %s3038_s21  }
 0x1f6   : >> { %s1585_s14 = scalar_lea.vmem %s1566_s8, %s2026_s22 [#allocation2]   ;;  %s1586_s11 = scalar_lea.vmem %s1568_s10, %s2026_s22  }
 0x1fb PF: > { %p10_p2 = scmp.ge.s32.totalorder %s2455_s16, 4   ;;  %s3030_s12 = smov %s2381_s13 }
 0x1fc   : > { %s3031_s13 = smov %s2463_s19  ;;  %s3032_s14 = smov %s2455_s16 }
 0x1fd   :  { %12 = sbr.rel (!%p10_p2) target bundleno = 2 (0x2), region = 140 }

// kernel: critic_forward.5
= control target key start
LH: loop header
LB: loop body
LE: loop exit
PB: predicated region body
PF: predicated region fallthrough
CT: control target
= control target key end

     0   :  { %vm880_vm0 = vcmask 519168   ;;  %vm901_vm1 = vcmask 516096   ;;  %s1637_s1 = inlined_call_operand.vmem [shape: bf16[512,64], index: 1, kind: input, shape index: {}]   ;;  %s1638_s0 = inlined_call_operand.vmem [shape: bf16[162,512], index: 0, kind: input, shape index: {}]   ;;  %s1639_s2 = inlined_call_operand.vmem [shape: f32[1,64], index: 2, kind: input, shape index: {}]   ;;  %s1640_s3 = inlined_call_operand.vmem [shape: bf16[162,64], index: 3, kind: output, shape index: {}]  }
   0x1   :  { %v1190_v0 = vld [vmem:[%s1637_s1 + $0x40] sm:$0xff]   ;;  %v1194_v4 = vld [vmem:[%s1637_s1 + $0x48] sm:$0xff]   ;;  %v1198_v8 = vld [vmem:[%s1637_s1 + $0x50] sm:$0xff]  }
   0x2   :  { %v1191_v1 = vld [vmem:[%s1637_s1 + $0xc0] sm:$0xff]   ;;  %1026 = vmatprep.subr.bf16.mxu0 %v1190_v0  ;;  %v1195_v5 = vld [vmem:[%s1637_s1 + $0xc8] sm:$0xff]   ;;  %v1199_v9 = vld [vmem:[%s1637_s1 + $0xd0] sm:$0xff]  }
   0x3   :  { %v1192_v2 = vld [vmem:[%s1637_s1] sm:$0xff]   ;;  %1108 = vmatprep.subr.bf16.mxu1 %v1191_v1  ;;  %v1196_v6 = vld [vmem:[%s1637_s1 + $0x8] sm:$0xff]   ;;  %v1200_v10 = vld [vmem:[%s1637_s1 + $0x10] sm:$0xff]  }
   0x4   :  { %v1193_v3 = vld [vmem:[%s1637_s1 + $0x80] sm:$0xff]   ;;  %1027 = vmatpush3.bf16.msra.mxu0 %v1192_v2  ;;  %v1197_v7 = vld [vmem:[%s1637_s1 + $0x88] sm:$0xff]   ;;  %v1201_v11 = vld [vmem:[%s1637_s1 + $0x90] sm:$0xff]  }
   0x5   :  { %1109 = vmatpush3.bf16.msra.mxu1 %v1193_v3  ;;  %1028 = vmatprep.subr.bf16.mxu0 %v1194_v4  ;;  %v1202_v12 = vld [vmem:[%s1637_s1 + $0x58] sm:$0xff]   ;;  %v1206_v16 = vld [vmem:[%s1637_s1 + $0x60] sm:$0xff]   ;;  %v1210_v20 = vld [vmem:[%s1637_s1 + $0x68] sm:$0xff]  }
   0x6   :  { %1110 = vmatprep.subr.bf16.mxu1 %v1195_v5  ;;  %v1203_v13 = vld [vmem:[%s1637_s1 + $0xd8] sm:$0xff]   ;;  %v1207_v17 = vld [vmem:[%s1637_s1 + $0xe0] sm:$0xff]   ;;  %v1211_v21 = vld [vmem:[%s1637_s1 + $0xe8] sm:$0xff]  }
   0x7   :  { %v1204_v14 = vld [vmem:[%s1637_s1 + $0x18] sm:$0xff]   ;;  %v1208_v18 = vld [vmem:[%s1637_s1 + $0x20] sm:$0xff]   ;;  %v1212_v22 = vld [vmem:[%s1637_s1 + $0x28] sm:$0xff]  }
   0x8   :  { %1029 = vmatpush3.bf16.msra.mxu0 %v1196_v6  ;;  %v1205_v15 = vld [vmem:[%s1637_s1 + $0x98] sm:$0xff]   ;;  %v1209_v19 = vld [vmem:[%s1637_s1 + $0xa0] sm:$0xff]   ;;  %v1213_v23 = vld [vmem:[%s1637_s1 + $0xa8] sm:$0xff]  }
   0x9   :  { %1111 = vmatpush3.bf16.msra.mxu1 %v1197_v7  ;;  %1030 = vmatprep.subr.bf16.mxu0 %v1198_v8  ;;  %v1214_v24 = vld [vmem:[%s1637_s1 + $0x70] sm:$0xff]   ;;  %v1218_v28 = vld [vmem:[%s1637_s1 + $0x78] sm:$0xff]   ;;  %v55_v6 = vld [vmem:[%s1638_s0 + $0x140] sm:$0x11] }
   0xa   :  { %1112 = vmatprep.subr.bf16.mxu1 %v1199_v9  ;;  %v1215_v25 = vld [vmem:[%s1637_s1 + $0xf0] sm:$0xff]   ;;  %v1219_v29 = vld [vmem:[%s1637_s1 + $0xf8] sm:$0xff]   ;;  %v56_v7 = vld [vmem:[%s1638_s0 + $0x148] sm:$0x11] }
   0xb   :  { %v1216_v26 = vld [vmem:[%s1637_s1 + $0x30] sm:$0xff]   ;;  %v1220_v30 = vld [vmem:[%s1637_s1 + $0x38] sm:$0xff]  }
   0xc   :  { %1031 = vmatpush3.bf16.msra.mxu0 %v1200_v10  ;;  %v1217_v27 = vld [vmem:[%s1637_s1 + $0xb0] sm:$0xff]   ;;  %v1221_v31 = vld [vmem:[%s1637_s1 + $0xb8] sm:$0xff]   ;;  %v949_v10 = vcombine.high %v55_v6, %v55_v6 }
   0xd   :  { %1113 = vmatpush3.bf16.msra.mxu1 %v1201_v11  ;;  %1032 = vmatprep.subr.bf16.mxu0 %v1202_v12  ;;  %v1222_v32 = vld [vmem:[%s1638_s0] ss:$16 sps:$4 sm:$0xff]   ;;  %v1224_v33 = vld [vmem:[%s1638_s0 + $0x4] ss:$16 sps:$4 sm:$0xff]   ;;  %v1225_v34 = vld [vmem:[%s1638_s0 + $0x8] ss:$16 sps:$4 sm:$0xff]   ;;  %v951_v11 = vcombine.high %v56_v7, %v56_v7  ;;  %v948_v12 = vcombine.low %v55_v6, %v55_v6 }
   0xe   :  { %1114 = vmatprep.subr.bf16.mxu1 %v1203_v13  ;;  %v1227_v35 = vld [vmem:[%s1638_s0 + $0xc] ss:$16 sps:$4 sm:$0xff]   ;;  %566 = vmatprep.mubr.bf16.mxu0 %v1224_v33  ;;  %v1228_v36 = vld [vmem:[%s1638_s0 + $0x24] ss:$16 sps:$4 sm:$0xff]   ;;  %v1232_v38 = vld [vmem:[%s1638_s0 + $0x20] ss:$16 sps:$4 sm:$0xff]   ;;  %v950_v13 = vcombine.low %v56_v7, %v56_v7 }
   0xf   :  { %686 = vmatprep.mubr.bf16.mxu1 %v1227_v35  ;;  %v1230_v37 = vld [vmem:[%s1638_s0 + $0x2c] ss:$16 sps:$4 sm:$0xff]   ;;  %v1233_v39 = vld [vmem:[%s1638_s0 + $0x28] ss:$16 sps:$4 sm:$0xff]   ;;  %v1234_v40 = vld [vmem:[%s1638_s0 + $0x44] ss:$16 sps:$4 sm:$0xff]  }
  0x10   :  { %1033 = vmatpush3.bf16.msra.mxu0 %v1204_v14  ;;  %v1236_v41 = vld [vmem:[%s1638_s0 + $0x4c] ss:$16 sps:$4 sm:$0xff]   ;;  %v1238_v42 = vld [vmem:[%s1638_s0 + $0x40] ss:$16 sps:$4 sm:$0xff]   ;;  %v1239_v43 = vld [vmem:[%s1638_s0 + $0x48] ss:$16 sps:$4 sm:$0xff]  }
  0x11   :  { %1115 = vmatpush3.bf16.msra.mxu1 %v1205_v15  ;;  %1034 = vmatprep.subr.bf16.mxu0 %v1206_v16  ;;  %v1240_v44 = vld [vmem:[%s1638_s0 + $0x64] ss:$16 sps:$4 sm:$0xff]   ;;  %v1242_v45 = vld [vmem:[%s1638_s0 + $0x6c] ss:$16 sps:$4 sm:$0xff]   ;;  %v1244_v46 = vld [vmem:[%s1638_s0 + $0x60] ss:$16 sps:$4 sm:$0xff]  }
  0x12   :  { %1116 = vmatprep.subr.bf16.mxu1 %v1207_v17  ;;  %v1245_v47 = vld [vmem:[%s1638_s0 + $0x68] ss:$16 sps:$4 sm:$0xff]   ;;  %v1246_v48 = vld [vmem:[%s1638_s0 + $0x84] ss:$16 sps:$4 sm:$0xff]   ;;  %v1248_v49 = vld [vmem:[%s1638_s0 + $0x8c] ss:$16 sps:$4 sm:$0xff]  }
  0x13   :  { %v1250_v50 = vld [vmem:[%s1638_s0 + $0x80] ss:$16 sps:$4 sm:$0xff]   ;;  %v1251_v51 = vld [vmem:[%s1638_s0 + $0x88] ss:$16 sps:$4 sm:$0xff]   ;;  %v1252_v52 = vld [vmem:[%s1638_s0 + $0xa4] ss:$16 sps:$4 sm:$0xff]  }
  0x14   :  { %1035 = vmatpush3.bf16.msra.mxu0 %v1208_v18  ;;  %v1254_v53 = vld [vmem:[%s1638_s0 + $0xac] ss:$16 sps:$4 sm:$0xff]   ;;  %v1256_v54 = vld [vmem:[%s1638_s0 + $0xa0] ss:$16 sps:$4 sm:$0xff]   ;;  %v1257_v55 = vld [vmem:[%s1638_s0 + $0xa8] ss:$16 sps:$4 sm:$0xff]  }
  0x15   :  { %1117 = vmatpush3.bf16.msra.mxu1 %v1209_v19  ;;  %1036 = vmatprep.subr.bf16.mxu0 %v1210_v20  ;;  %v1258_v56 = vld [vmem:[%s1638_s0 + $0xc4] ss:$16 sps:$4 sm:$0xff]   ;;  %v1260_v57 = vld [vmem:[%s1638_s0 + $0xcc] ss:$16 sps:$4 sm:$0xff]   ;;  %v1262_v58 = vld [vmem:[%s1638_s0 + $0xc0] ss:$16 sps:$4 sm:$0xff]  }
  0x16   :  { %1118 = vmatprep.subr.bf16.mxu1 %v1211_v21  ;;  %v1263_v59 = vld [vmem:[%s1638_s0 + $0xc8] ss:$16 sps:$4 sm:$0xff]   ;;  %v1264_v60 = vld [vmem:[%s1638_s0 + $0xe4] ss:$16 sps:$4 sm:$0xff]   ;;  %v1266_v61 = vld [vmem:[%s1638_s0 + $0xec] ss:$16 sps:$4 sm:$0xff]  }
  0x17   :  { %v1268_v62 = vld [vmem:[%s1638_s0 + $0xe0] ss:$16 sps:$4 sm:$0xff]   ;;  %v1269_v63 = vld [vmem:[%s1638_s0 + $0xe8] ss:$16 sps:$4 sm:$0xff]   ;;  %v1270_v0 = vld [vmem:[%s1638_s0 + $0x104] ss:$16 sps:$4 sm:$0xff]  }
  0x18   :  { %1037 = vmatpush3.bf16.msra.mxu0 %v1212_v22  ;;  %v1272_v1 = vld [vmem:[%s1638_s0 + $0x10c] ss:$16 sps:$4 sm:$0xff]   ;;  %v1274_v2 = vld [vmem:[%s1638_s0 + $0x100] ss:$16 sps:$4 sm:$0xff]   ;;  %v1275_v3 = vld [vmem:[%s1638_s0 + $0x108] ss:$16 sps:$4 sm:$0xff]  }
  0x19   :  { %1119 = vmatpush3.bf16.msra.mxu1 %v1213_v23  ;;  %1038 = vmatprep.subr.bf16.mxu0 %v1214_v24  ;;  %v1276_v4 = vld [vmem:[%s1638_s0 + $0x124] ss:$16 sps:$4 sm:$0xff]   ;;  %v1278_v5 = vld [vmem:[%s1638_s0 + $0x12c] ss:$16 sps:$4 sm:$0xff]   ;;  %v1280_v8 = vld [vmem:[%s1638_s0 + $0x120] ss:$16 sps:$4 sm:$0xff]  }
  0x1a   :  { %1120 = vmatprep.subr.bf16.mxu1 %v1215_v25  ;;  %v1281_v9 = vld [vmem:[%s1638_s0 + $0x128] ss:$16 sps:$4 sm:$0xff]   ;;  %v1531_v16 = vld [vmem:[%s1639_s2] ss:$0 sm:$0xff] }
  0x1c   :  { %1039 = vmatpush3.bf16.msra.mxu0 %v1216_v26 }
  0x1d   :  { %1121 = vmatpush3.bf16.msra.mxu1 %v1217_v27  ;;  %1040 = vmatprep.subr.bf16.mxu0 %v1218_v28 }
  0x1e   :  { %1122 = vmatprep.subr.bf16.mxu1 %v1219_v29 }
  0x20   :  { %1041 = vmatpush3.bf16.msra.mxu0 %v1220_v30 }
  0x21   :  { %1123 = vmatpush3.bf16.msra.mxu1 %v1221_v31 }
  0x23   :  { %567 = vmatmul.mubr.bf16.vlgmr.msra.gmra.mrb[0].mxu0 %v1222_v32 }
  0x24   :  { %687 = vmatmul.mubr.bf16.vlgmr.msra.gmra.mrb[0].mxu1 %v1225_v34  ;;  %574 = vmatprep.mubr.bf16.mxu0 %v1228_v36 }
  0x25   :  { %694 = vmatprep.mubr.bf16.mxu1 %v1230_v37 }
  0x2b   :  { %575 = vmatmul.mubr.bf16.gmra.mrb[4].mxu0 %v1232_v38 }
  0x2c   :  { %695 = vmatmul.mubr.bf16.gmra.mrb[4].mxu1 %v1233_v39  ;;  %582 = vmatprep.mubr.bf16.mxu0 %v1234_v40 }
  0x2d   :  { %702 = vmatprep.mubr.bf16.mxu1 %v1236_v41 }
  0x33   :  { %583 = vmatmul.mubr.bf16.gmra.mrb[8].mxu0 %v1238_v42 }
  0x34   :  { %703 = vmatmul.mubr.bf16.gmra.mrb[8].mxu1 %v1239_v43  ;;  %590 = vmatprep.mubr.bf16.mxu0 %v1240_v44 }
  0x35   :  { %710 = vmatprep.mubr.bf16.mxu1 %v1242_v45 }
  0x3b   :  { %591 = vmatmul.mubr.bf16.gmra.mrb[12].mxu0 %v1244_v46 }
  0x3c   :  { %711 = vmatmul.mubr.bf16.gmra.mrb[12].mxu1 %v1245_v47  ;;  %598 = vmatprep.mubr.bf16.mxu0 %v1246_v48 }
  0x3d   :  { %718 = vmatprep.mubr.bf16.mxu1 %v1248_v49 }
  0x43   :  { %599 = vmatmul.mubr.bf16.gmra.mrb[16].mxu0 %v1250_v50 }
  0x44   :  { %719 = vmatmul.mubr.bf16.gmra.mrb[16].mxu1 %v1251_v51  ;;  %606 = vmatprep.mubr.bf16.mxu0 %v1252_v52 }
  0x45   :  { %726 = vmatprep.mubr.bf16.mxu1 %v1254_v53 }
  0x4b   :  { %607 = vmatmul.mubr.bf16.gmra.mrb[20].mxu0 %v1256_v54 }
  0x4c   :  { %727 = vmatmul.mubr.bf16.gmra.mrb[20].mxu1 %v1257_v55  ;;  %614 = vmatprep.mubr.bf16.mxu0 %v1258_v56 }
  0x4d   :  { %734 = vmatprep.mubr.bf16.mxu1 %v1260_v57 }
  0x53   :  { %615 = vmatmul.mubr.bf16.gmra.mrb[24].mxu0 %v1262_v58 }
  0x54   :  { %735 = vmatmul.mubr.bf16.gmra.mrb[24].mxu1 %v1263_v59  ;;  %622 = vmatprep.mubr.bf16.mxu0 %v1264_v60 }
  0x55   :  { %742 = vmatprep.mubr.bf16.mxu1 %v1266_v61 }
  0x5b   :  { %623 = vmatmul.mubr.bf16.gmra.mrb[28].mxu0 %v1268_v62 }
  0x5c   :  { %743 = vmatmul.mubr.bf16.gmra.mrb[28].mxu1 %v1269_v63  ;;  %630 = vmatprep.mubr.bf16.mxu0 %v1270_v0 }
  0x5d   :  { %750 = vmatprep.mubr.bf16.mxu1 %v1272_v1 }
  0x63   :  { %631 = vmatmul.mubr.bf16.gmra.mrb[32].mxu0 %v1274_v2 }
  0x64   :  { %751 = vmatmul.mubr.bf16.gmra.mrb[32].mxu1 %v1275_v3  ;;  %638 = vmatprep.mubr.bf16.mxu0 %v1276_v4 }
  0x65   :  { %758 = vmatprep.mubr.bf16.mxu1 %v1278_v5 }
  0x6b   :  { %639 = vmatmul.mubr.bf16.gmra.mrb[36].mxu0 %v1280_v8 }
  0x6c   :  { %759 = vmatmul.mubr.bf16.gmra.mrb[36].mxu1 %v1281_v9  ;;  %646 = vmatprep.mubr.bf16.mxu0 %v949_v10 }
  0x6d   :  { %766 = vmatprep.mubr.bf16.mxu1 %v951_v11 }
  0x73   :  { %647 = vmatmul.mubr.bf16.gmra.mrb[40].mxu0 %v948_v12 }
  0x74   :  { %767 = vmatmul.mubr.bf16.gmra.mrb[40].mxu1 %v950_v13 }
  0xf6   :  { %v1042_v14 = vpop.f32.mrb[0].mxu0 }
  0xf7   :  { %v1124_v15 = vpop.f32.mrb[0].mxu1  ;;  %v1043_v17 = vpop.f32.mrb[1].mxu0 }
  0xf8   :  { %v1044_v18 = vadd.f32 %v1043_v17, %v1042_v14  ;;  %v1125_v19 = vpop.f32.mrb[1].mxu1  ;;  %v1045_v20 = vpop.f32.mrb[2].mxu0 }
  0xf9   :  { %v1126_v21 = vadd.f32 %v1125_v19, %v1124_v15  ;;  %v1127_v22 = vpop.f32.mrb[2].mxu1  ;;  %v1046_v23 = vpop.f32.mrb[3].mxu0 }
  0xfa   :  { %v569_v24 = vadd.f32 %v1044_v18, %v1531_v16  ;;  %v1047_v25 = vadd.f32 %v1046_v23, %v1045_v20  ;;  %v1128_v26 = vpop.f32.mrb[3].mxu1 }
  0xfb   :  { %v1129_v27 = vadd.f32 %v1128_v26, %v1127_v22 }
  0xfc   :  { %v689_v28 = vadd.f32 %v1126_v21, %v569_v24  ;;  %v572_v29 = vadd.f32 %v1047_v25, %v1531_v16 }
  0xfe   :  { %v774_v30 = vmax.f32 %v689_v28, 0.0  ;;  %v692_v31 = vadd.f32 %v1129_v27, %v572_v29  ;;  %v1048_v32 = vpop.f32.mrb[4].mxu0 }
  0xff   :  { %v1130_v33 = vpop.f32.mrb[4].mxu1  ;;  %v1049_v34 = vpop.f32.mrb[5].mxu0 }
 0x100   :  { %v1005_v35 = vpack.c.bf16 %v774_v30, %v774_v30  ;;  %v775_v36 = vmax.f32 %v692_v31, 0.0  ;;  %v1050_v37 = vadd.f32 %v1049_v34, %v1048_v32  ;;  %v1131_v38 = vpop.f32.mrb[5].mxu1  ;;  %v1051_v39 = vpop.f32.mrb[6].mxu0 }
 0x101   :  { %v1132_v40 = vadd.f32 %v1131_v38, %v1130_v33  ;;  %v1133_v41 = vpop.f32.mrb[6].mxu1  ;;  %v1052_v42 = vpop.f32.mrb[7].mxu0 }
 0x102   :  { %881 = vst.msk [vmem:[%s1640_s3] sm:$0xf] %vm880_vm0, %v1005_v35  ;;  %v1006_v43 = vpack.c.bf16 %v775_v36, %v775_v36  ;;  %v577_v44 = vadd.f32 %v1050_v37, %v1531_v16  ;;  %v1053_v45 = vadd.f32 %v1052_v42, %v1051_v39  ;;  %v1134_v46 = vpop.f32.mrb[7].mxu1 }
 0x103   :  { %v1135_v47 = vadd.f32 %v1134_v46, %v1133_v41 }
 0x104   :  { %882 = vst.msk [vmem:[%s1640_s3 + $0x4] sm:$0xf] %vm880_vm0, %v1006_v43  ;;  %v697_v48 = vadd.f32 %v1132_v40, %v577_v44  ;;  %v580_v49 = vadd.f32 %v1053_v45, %v1531_v16 }
 0x106   :  { %v776_v50 = vmax.f32 %v697_v48, 0.0  ;;  %v700_v51 = vadd.f32 %v1135_v47, %v580_v49  ;;  %v1054_v52 = vpop.f32.mrb[8].mxu0 }
 0x107   :  { %v1136_v53 = vpop.f32.mrb[8].mxu1  ;;  %v1055_v54 = vpop.f32.mrb[9].mxu0 }
 0x108   :  { %v1007_v55 = vpack.c.bf16 %v776_v50, %v776_v50  ;;  %v777_v56 = vmax.f32 %v700_v51, 0.0  ;;  %v1056_v57 = vadd.f32 %v1055_v54, %v1054_v52  ;;  %v1137_v58 = vpop.f32.mrb[9].mxu1  ;;  %v1057_v59 = vpop.f32.mrb[10].mxu0 }
 0x109   :  { %v1138_v60 = vadd.f32 %v1137_v58, %v1136_v53  ;;  %v1139_v61 = vpop.f32.mrb[10].mxu1  ;;  %v1058_v62 = vpop.f32.mrb[11].mxu0 }
 0x10a   :  { %883 = vst.msk [vmem:[%s1640_s3 + $0x8] sm:$0xf] %vm880_vm0, %v1007_v55  ;;  %v1008_v63 = vpack.c.bf16 %v777_v56, %v777_v56  ;;  %v585_v0 = vadd.f32 %v1056_v57, %v1531_v16  ;;  %v1059_v1 = vadd.f32 %v1058_v62, %v1057_v59  ;;  %v1140_v2 = vpop.f32.mrb[11].mxu1 }
 0x10b   :  { %v1141_v3 = vadd.f32 %v1140_v2, %v1139_v61 }
 0x10c   :  { %884 = vst.msk [vmem:[%s1640_s3 + $0xc] sm:$0xf] %vm880_vm0, %v1008_v63  ;;  %v705_v4 = vadd.f32 %v1138_v60, %v585_v0  ;;  %v588_v5 = vadd.f32 %v1059_v1, %v1531_v16 }
 0x10e   :  { %v778_v6 = vmax.f32 %v705_v4, 0.0  ;;  %v708_v7 = vadd.f32 %v1141_v3, %v588_v5  ;;  %v1060_v8 = vpop.f32.mrb[12].mxu0 }
 0x10f   :  { %v1142_v9 = vpop.f32.mrb[12].mxu1  ;;  %v1061_v10 = vpop.f32.mrb[13].mxu0 }
 0x110   :  { %v1009_v11 = vpack.c.bf16 %v778_v6, %v778_v6  ;;  %v779_v12 = vmax.f32 %v708_v7, 0.0  ;;  %v1062_v13 = vadd.f32 %v1061_v10, %v1060_v8  ;;  %v1143_v14 = vpop.f32.mrb[13].mxu1  ;;  %v1063_v15 = vpop.f32.mrb[14].mxu0 }
 0x111   :  { %v1144_v17 = vadd.f32 %v1143_v14, %v1142_v9  ;;  %v1145_v18 = vpop.f32.mrb[14].mxu1  ;;  %v1064_v19 = vpop.f32.mrb[15].mxu0 }
 0x112   :  { %885 = vst.msk [vmem:[%s1640_s3 + $0x10] sm:$0xf] %vm880_vm0, %v1009_v11  ;;  %v1010_v20 = vpack.c.bf16 %v779_v12, %v779_v12  ;;  %v593_v21 = vadd.f32 %v1062_v13, %v1531_v16  ;;  %v1065_v22 = vadd.f32 %v1064_v19, %v1063_v15  ;;  %v1146_v23 = vpop.f32.mrb[15].mxu1 }
 0x113   :  { %v1147_v24 = vadd.f32 %v1146_v23, %v1145_v18 }
 0x114   :  { %886 = vst.msk [vmem:[%s1640_s3 + $0x14] sm:$0xf] %vm880_vm0, %v1010_v20  ;;  %v713_v25 = vadd.f32 %v1144_v17, %v593_v21  ;;  %v596_v26 = vadd.f32 %v1065_v22, %v1531_v16 }
 0x116   :  { %v780_v27 = vmax.f32 %v713_v25, 0.0  ;;  %v716_v28 = vadd.f32 %v1147_v24, %v596_v26  ;;  %v1066_v29 = vpop.f32.mrb[16].mxu0 }
 0x117   :  { %v1148_v30 = vpop.f32.mrb[16].mxu1  ;;  %v1067_v31 = vpop.f32.mrb[17].mxu0 }
 0x118   :  { %v1011_v32 = vpack.c.bf16 %v780_v27, %v780_v27  ;;  %v781_v33 = vmax.f32 %v716_v28, 0.0  ;;  %v1068_v34 = vadd.f32 %v1067_v31, %v1066_v29  ;;  %v1149_v35 = vpop.f32.mrb[17].mxu1  ;;  %v1069_v36 = vpop.f32.mrb[18].mxu0 }
 0x119   :  { %v1150_v37 = vadd.f32 %v1149_v35, %v1148_v30  ;;  %v1151_v38 = vpop.f32.mrb[18].mxu1  ;;  %v1070_v39 = vpop.f32.mrb[19].mxu0 }
 0x11a   :  { %887 = vst.msk [vmem:[%s1640_s3 + $0x18] sm:$0xf] %vm880_vm0, %v1011_v32  ;;  %v1012_v40 = vpack.c.bf16 %v781_v33, %v781_v33  ;;  %v601_v41 = vadd.f32 %v1068_v34, %v1531_v16  ;;  %v1071_v42 = vadd.f32 %v1070_v39, %v1069_v36  ;;  %v1152_v43 = vpop.f32.mrb[19].mxu1 }
 0x11b   :  { %v1153_v44 = vadd.f32 %v1152_v43, %v1151_v38 }
 0x11c   :  { %888 = vst.msk [vmem:[%s1640_s3 + $0x1c] sm:$0xf] %vm880_vm0, %v1012_v40  ;;  %v721_v45 = vadd.f32 %v1150_v37, %v601_v41  ;;  %v604_v46 = vadd.f32 %v1071_v42, %v1531_v16 }
 0x11e   :  { %v782_v47 = vmax.f32 %v721_v45, 0.0  ;;  %v724_v48 = vadd.f32 %v1153_v44, %v604_v46  ;;  %v1072_v49 = vpop.f32.mrb[20].mxu0 }
 0x11f   :  { %v1154_v50 = vpop.f32.mrb[20].mxu1  ;;  %v1073_v51 = vpop.f32.mrb[21].mxu0 }
 0x120   :  { %v1013_v52 = vpack.c.bf16 %v782_v47, %v782_v47  ;;  %v783_v53 = vmax.f32 %v724_v48, 0.0  ;;  %v1074_v54 = vadd.f32 %v1073_v51, %v1072_v49  ;;  %v1155_v55 = vpop.f32.mrb[21].mxu1  ;;  %v1075_v56 = vpop.f32.mrb[22].mxu0 }
 0x121   :  { %v1156_v57 = vadd.f32 %v1155_v55, %v1154_v50  ;;  %v1157_v58 = vpop.f32.mrb[22].mxu1  ;;  %v1076_v59 = vpop.f32.mrb[23].mxu0 }
 0x122   :  { %889 = vst.msk [vmem:[%s1640_s3 + $0x20] sm:$0xf] %vm880_vm0, %v1013_v52  ;;  %v1014_v60 = vpack.c.bf16 %v783_v53, %v783_v53  ;;  %v609_v61 = vadd.f32 %v1074_v54, %v1531_v16  ;;  %v1077_v62 = vadd.f32 %v1076_v59, %v1075_v56  ;;  %v1158_v63 = vpop.f32.mrb[23].mxu1 }
 0x123   :  { %v1159_v0 = vadd.f32 %v1158_v63, %v1157_v58 }
 0x124   :  { %890 = vst.msk [vmem:[%s1640_s3 + $0x24] sm:$0xf] %vm880_vm0, %v1014_v60  ;;  %v729_v1 = vadd.f32 %v1156_v57, %v609_v61  ;;  %v612_v2 = vadd.f32 %v1077_v62, %v1531_v16 }
 0x126   :  { %v784_v3 = vmax.f32 %v729_v1, 0.0  ;;  %v732_v4 = vadd.f32 %v1159_v0, %v612_v2  ;;  %v1078_v5 = vpop.f32.mrb[24].mxu0 }
 0x127   :  { %v1160_v6 = vpop.f32.mrb[24].mxu1  ;;  %v1079_v7 = vpop.f32.mrb[25].mxu0 }
 0x128   :  { %v1015_v8 = vpack.c.bf16 %v784_v3, %v784_v3  ;;  %v785_v9 = vmax.f32 %v732_v4, 0.0  ;;  %v1080_v10 = vadd.f32 %v1079_v7, %v1078_v5  ;;  %v1161_v11 = vpop.f32.mrb[25].mxu1  ;;  %v1081_v12 = vpop.f32.mrb[26].mxu0 }
 0x129   :  { %v1162_v13 = vadd.f32 %v1161_v11, %v1160_v6  ;;  %v1163_v14 = vpop.f32.mrb[26].mxu1  ;;  %v1082_v15 = vpop.f32.mrb[27].mxu0 }
 0x12a   :  { %891 = vst.msk [vmem:[%s1640_s3 + $0x28] sm:$0xf] %vm880_vm0, %v1015_v8  ;;  %v1016_v17 = vpack.c.bf16 %v785_v9, %v785_v9  ;;  %v617_v18 = vadd.f32 %v1080_v10, %v1531_v16  ;;  %v1083_v19 = vadd.f32 %v1082_v15, %v1081_v12  ;;  %v1164_v20 = vpop.f32.mrb[27].mxu1 }
 0x12b   :  { %v1165_v21 = vadd.f32 %v1164_v20, %v1163_v14 }
 0x12c   :  { %892 = vst.msk [vmem:[%s1640_s3 + $0x2c] sm:$0xf] %vm880_vm0, %v1016_v17  ;;  %v737_v22 = vadd.f32 %v1162_v13, %v617_v18  ;;  %v620_v23 = vadd.f32 %v1083_v19, %v1531_v16 }
 0x12e   :  { %v786_v24 = vmax.f32 %v737_v22, 0.0  ;;  %v740_v25 = vadd.f32 %v1165_v21, %v620_v23  ;;  %v1084_v26 = vpop.f32.mrb[28].mxu0 }
 0x12f   :  { %v1166_v27 = vpop.f32.mrb[28].mxu1  ;;  %v1085_v28 = vpop.f32.mrb[29].mxu0 }
 0x130   :  { %v1017_v29 = vpack.c.bf16 %v786_v24, %v786_v24  ;;  %v787_v30 = vmax.f32 %v740_v25, 0.0  ;;  %v1086_v31 = vadd.f32 %v1085_v28, %v1084_v26  ;;  %v1167_v32 = vpop.f32.mrb[29].mxu1  ;;  %v1087_v33 = vpop.f32.mrb[30].mxu0 }
 0x131   :  { %v1168_v34 = vadd.f32 %v1167_v32, %v1166_v27  ;;  %v1169_v35 = vpop.f32.mrb[30].mxu1  ;;  %v1088_v36 = vpop.f32.mrb[31].mxu0 }
 0x132   :  { %893 = vst.msk [vmem:[%s1640_s3 + $0x30] sm:$0xf] %vm880_vm0, %v1017_v29  ;;  %v1018_v37 = vpack.c.bf16 %v787_v30, %v787_v30  ;;  %v625_v38 = vadd.f32 %v1086_v31, %v1531_v16  ;;  %v1089_v39 = vadd.f32 %v1088_v36, %v1087_v33  ;;  %v1170_v40 = vpop.f32.mrb[31].mxu1 }
 0x133   :  { %v1171_v41 = vadd.f32 %v1170_v40, %v1169_v35 }
 0x134   :  { %894 = vst.msk [vmem:[%s1640_s3 + $0x34] sm:$0xf] %vm880_vm0, %v1018_v37  ;;  %v745_v42 = vadd.f32 %v1168_v34, %v625_v38  ;;  %v628_v43 = vadd.f32 %v1089_v39, %v1531_v16 }
 0x136   :  { %v788_v44 = vmax.f32 %v745_v42, 0.0  ;;  %v748_v45 = vadd.f32 %v1171_v41, %v628_v43  ;;  %v1090_v46 = vpop.f32.mrb[32].mxu0 }
 0x137   :  { %v1172_v47 = vpop.f32.mrb[32].mxu1  ;;  %v1091_v48 = vpop.f32.mrb[33].mxu0 }
 0x138   :  { %v1019_v49 = vpack.c.bf16 %v788_v44, %v788_v44  ;;  %v789_v50 = vmax.f32 %v748_v45, 0.0  ;;  %v1092_v51 = vadd.f32 %v1091_v48, %v1090_v46  ;;  %v1173_v52 = vpop.f32.mrb[33].mxu1  ;;  %v1093_v53 = vpop.f32.mrb[34].mxu0 }
 0x139   :  { %v1174_v54 = vadd.f32 %v1173_v52, %v1172_v47  ;;  %v1175_v55 = vpop.f32.mrb[34].mxu1  ;;  %v1094_v56 = vpop.f32.mrb[35].mxu0 }
 0x13a   :  { %895 = vst.msk [vmem:[%s1640_s3 + $0x38] sm:$0xf] %vm880_vm0, %v1019_v49  ;;  %v1020_v57 = vpack.c.bf16 %v789_v50, %v789_v50  ;;  %v633_v58 = vadd.f32 %v1092_v51, %v1531_v16  ;;  %v1095_v59 = vadd.f32 %v1094_v56, %v1093_v53  ;;  %v1176_v60 = vpop.f32.mrb[35].mxu1 }
 0x13b   :  { %v1177_v61 = vadd.f32 %v1176_v60, %v1175_v55 }
 0x13c   :  { %896 = vst.msk [vmem:[%s1640_s3 + $0x3c] sm:$0xf] %vm880_vm0, %v1020_v57  ;;  %v753_v62 = vadd.f32 %v1174_v54, %v633_v58  ;;  %v636_v63 = vadd.f32 %v1095_v59, %v1531_v16 }
 0x13e   :  { %v790_v0 = vmax.f32 %v753_v62, 0.0  ;;  %v756_v1 = vadd.f32 %v1177_v61, %v636_v63  ;;  %v1096_v2 = vpop.f32.mrb[36].mxu0 }
 0x13f   :  { %v1178_v3 = vpop.f32.mrb[36].mxu1  ;;  %v1097_v4 = vpop.f32.mrb[37].mxu0 }
 0x140   :  { %v1021_v5 = vpack.c.bf16 %v790_v0, %v790_v0  ;;  %v791_v6 = vmax.f32 %v756_v1, 0.0  ;;  %v1098_v7 = vadd.f32 %v1097_v4, %v1096_v2  ;;  %v1179_v8 = vpop.f32.mrb[37].mxu1  ;;  %v1099_v9 = vpop.f32.mrb[38].mxu0 }
 0x141   :  { %v1180_v10 = vadd.f32 %v1179_v8, %v1178_v3  ;;  %v1181_v11 = vpop.f32.mrb[38].mxu1  ;;  %v1100_v12 = vpop.f32.mrb[39].mxu0 }
 0x142   :  { %897 = vst.msk [vmem:[%s1640_s3 + $0x40] sm:$0xf] %vm880_vm0, %v1021_v5  ;;  %v1022_v13 = vpack.c.bf16 %v791_v6, %v791_v6  ;;  %v641_v14 = vadd.f32 %v1098_v7, %v1531_v16  ;;  %v1101_v15 = vadd.f32 %v1100_v12, %v1099_v9  ;;  %v1182_v17 = vpop.f32.mrb[39].mxu1 }
 0x143   :  { %v1183_v18 = vadd.f32 %v1182_v17, %v1181_v11 }
 0x144   :  { %898 = vst.msk [vmem:[%s1640_s3 + $0x44] sm:$0xf] %vm880_vm0, %v1022_v13  ;;  %v761_v19 = vadd.f32 %v1180_v10, %v641_v14  ;;  %v644_v20 = vadd.f32 %v1101_v15, %v1531_v16 }
 0x146   :  { %v792_v21 = vmax.f32 %v761_v19, 0.0  ;;  %v764_v22 = vadd.f32 %v1183_v18, %v644_v20  ;;  %v1102_v23 = vpop.f32.mrb[40].mxu0 }
 0x147   :  { %v1184_v24 = vpop.f32.mrb[40].mxu1  ;;  %v1103_v25 = vpop.f32.mrb[41].mxu0 }
 0x148   :  { %v1023_v26 = vpack.c.bf16 %v792_v21, %v792_v21  ;;  %v793_v27 = vmax.f32 %v764_v22, 0.0  ;;  %v1104_v28 = vadd.f32 %v1103_v25, %v1102_v23  ;;  %v1185_v29 = vpop.f32.mrb[41].mxu1  ;;  %v1105_v30 = vpop.f32.mrb[42].mxu0 }
 0x149   :  { %v1186_v31 = vadd.f32 %v1185_v29, %v1184_v24  ;;  %v1187_v32 = vpop.f32.mrb[42].mxu1  ;;  %v1106_v33 = vpop.f32.mrb[43].mxu0 }
 0x14a   :  { %899 = vst.msk [vmem:[%s1640_s3 + $0x48] sm:$0xf] %vm880_vm0, %v1023_v26  ;;  %v1024_v34 = vpack.c.bf16 %v793_v27, %v793_v27  ;;  %v649_v35 = vadd.f32 %v1104_v28, %v1531_v16  ;;  %v1188_v36 = vpop.f32.mrb[43].mxu1 }
 0x14c   :  { %900 = vst.msk [vmem:[%s1640_s3 + $0x4c] sm:$0xf] %vm880_vm0, %v1024_v34  ;;  %v769_v37 = vadd.f32 %v1186_v31, %v649_v35 }
 0x14e   :  { %v794_v38 = vmax.f32 %v769_v37, 0.0 }
 0x150   :  { %v1025_v39 = vpack.c.bf16 %v794_v38, %v794_v38 }
 0x152   :  { %902 = vst.msk [vmem:[%s1640_s3 + $0x50] sm:$0x1] %vm901_vm1, %v1025_v39 }

// kernel: critic_forward.6
= control target key start
LH: loop header
LB: loop body
LE: loop exit
PB: predicated region body
PF: predicated region fallthrough
CT: control target
= control target key end

     0   :  { %v1248_v34 = vmov 0.0   ;;  %vm1249_vm0 = vmmov 0   ;;  %vm516_vm1 = vcmask 523264   ;;  %vm868_vm2 = vcmask 519168   ;;  %s1599_s1 = inlined_call_operand.vmem [shape: bf16[576,64], index: 1, kind: input, shape index: {}]   ;;  %s1600_s0 = inlined_call_operand.vmem [shape: bf16[98,576], index: 0, kind: input, shape index: {}]   ;;  %s1601_s2 = inlined_call_operand.vmem [shape: f32[1,64], index: 2, kind: input, shape index: {}]   ;;  %s1602_s3 = inlined_call_operand.vmem [shape: bf16[98,64], index: 3, kind: output, shape index: {}]  }
   0x1   :  { %v1165_v0 = vld [vmem:[%s1599_s1 + $0x40] sm:$0xff]   ;;  %v1169_v4 = vld [vmem:[%s1599_s1 + $0x48] sm:$0xff]   ;;  %v1173_v8 = vld [vmem:[%s1599_s1 + $0x50] sm:$0xff]   ;;  %vm881_vm3 = vcmask 516096  }
   0x2   :  { %v1166_v1 = vld [vmem:[%s1599_s1 + $0xc0] sm:$0xff]   ;;  %992 = vmatprep.subr.bf16.mxu0 %v1165_v0  ;;  %v1170_v5 = vld [vmem:[%s1599_s1 + $0xc8] sm:$0xff]   ;;  %v1174_v9 = vld [vmem:[%s1599_s1 + $0xd0] sm:$0xff]  }
   0x3   :  { %v1167_v2 = vld [vmem:[%s1599_s1] sm:$0xff]   ;;  %1050 = vmatprep.subr.bf16.mxu1 %v1166_v1  ;;  %v1171_v6 = vld [vmem:[%s1599_s1 + $0x8] sm:$0xff]   ;;  %v1175_v10 = vld [vmem:[%s1599_s1 + $0x10] sm:$0xff]  }
   0x4   :  { %v1168_v3 = vld [vmem:[%s1599_s1 + $0x80] sm:$0xff]   ;;  %993 = vmatpush3.bf16.msra.mxu0 %v1167_v2  ;;  %v1172_v7 = vld [vmem:[%s1599_s1 + $0x88] sm:$0xff]   ;;  %v1176_v11 = vld [vmem:[%s1599_s1 + $0x90] sm:$0xff]  }
   0x5   :  { %1051 = vmatpush3.bf16.msra.mxu1 %v1168_v3  ;;  %994 = vmatprep.subr.bf16.mxu0 %v1169_v4  ;;  %v1177_v12 = vld [vmem:[%s1599_s1 + $0x58] sm:$0xff]   ;;  %v1181_v16 = vld [vmem:[%s1599_s1 + $0x60] sm:$0xff]   ;;  %v1185_v20 = vld [vmem:[%s1599_s1 + $0x68] sm:$0xff]  }
   0x6   :  { %1052 = vmatprep.subr.bf16.mxu1 %v1170_v5  ;;  %v1178_v13 = vld [vmem:[%s1599_s1 + $0xd8] sm:$0xff]   ;;  %v1182_v17 = vld [vmem:[%s1599_s1 + $0xe0] sm:$0xff]   ;;  %v1186_v21 = vld [vmem:[%s1599_s1 + $0xe8] sm:$0xff]  }
   0x7   :  { %v1179_v14 = vld [vmem:[%s1599_s1 + $0x18] sm:$0xff]   ;;  %v1183_v18 = vld [vmem:[%s1599_s1 + $0x20] sm:$0xff]   ;;  %v1187_v22 = vld [vmem:[%s1599_s1 + $0x28] sm:$0xff]  }
   0x8   :  { %995 = vmatpush3.bf16.msra.mxu0 %v1171_v6  ;;  %v1180_v15 = vld [vmem:[%s1599_s1 + $0x98] sm:$0xff]   ;;  %v1184_v19 = vld [vmem:[%s1599_s1 + $0xa0] sm:$0xff]   ;;  %v1188_v23 = vld [vmem:[%s1599_s1 + $0xa8] sm:$0xff]  }
   0x9   :  { %1053 = vmatpush3.bf16.msra.mxu1 %v1172_v7  ;;  %996 = vmatprep.subr.bf16.mxu0 %v1173_v8  ;;  %v1189_v24 = vld [vmem:[%s1599_s1 + $0x70] sm:$0xff]   ;;  %v1193_v28 = vld [vmem:[%s1599_s1 + $0x78] sm:$0xff]   ;;  %v1202_v36 = vld [vmem:[%s1600_s0 + $0xc] ss:$20 sps:$4 sm:$0xff]  }
   0xa   :  { %1054 = vmatprep.subr.bf16.mxu1 %v1174_v9  ;;  %v1190_v25 = vld [vmem:[%s1599_s1 + $0xf0] sm:$0xff]   ;;  %v1194_v29 = vld [vmem:[%s1599_s1 + $0xf8] sm:$0xff]   ;;  %v1203_v37 = vld [vmem:[%s1599_s1 + $0x100] sm:$0xff]   ;;  %658 = vmatprep.mubr.bf16.mxu1 %v1202_v36 }
   0xb   :  { %v1191_v26 = vld [vmem:[%s1599_s1 + $0x30] sm:$0xff]   ;;  %v1195_v30 = vld [vmem:[%s1599_s1 + $0x38] sm:$0xff]   ;;  %v1204_v38 = vld [vmem:[%s1600_s0 + $0x2c] ss:$20 sps:$4 sm:$0xff]  }
   0xc   :  { %997 = vmatpush3.bf16.msra.mxu0 %v1175_v10  ;;  %v1192_v27 = vld [vmem:[%s1599_s1 + $0xb0] sm:$0xff]   ;;  %v1196_v31 = vld [vmem:[%s1599_s1 + $0xb8] sm:$0xff]   ;;  %v1214_v43 = vld [vmem:[%s1599_s1 + $0x108] sm:$0xff]  }
   0xd   :  { %1055 = vmatpush3.bf16.msra.mxu1 %v1176_v11  ;;  %998 = vmatprep.subr.bf16.mxu0 %v1177_v12  ;;  %v1197_v32 = vld [vmem:[%s1600_s0] ss:$20 sps:$4 sm:$0xff]   ;;  %v1199_v33 = vld [vmem:[%s1600_s0 + $0x4] ss:$20 sps:$4 sm:$0xff]   ;;  %v1200_v35 = vld [vmem:[%s1600_s0 + $0x8] ss:$20 sps:$4 sm:$0xff]  }
   0xe   :  { %1056 = vmatprep.subr.bf16.mxu1 %v1178_v13  ;;  %570 = vmatprep.mubr.bf16.mxu0 %v1199_v33  ;;  %v1206_v39 = vld [vmem:[%s1600_s0 + $0x34] ss:$20 sps:$4 sm:$0xff]   ;;  %v1209_v41 = vld [vmem:[%s1600_s0 + $0x30] ss:$20 sps:$4 sm:$0xff]   ;;  %v1216_v47 = vld [vmem:[%s1600_s0 + $0x58] ss:$20 sps:$4 sm:$0xff]  }
   0xf   :  { %v1208_v40 = vld [vmem:[%s1600_s0 + $0x28] ss:$20 sps:$4 sm:$0xff]   ;;  %v1223_v45 = vld [vmem:[%s1599_s1 + $0x110] sm:$0xff]   ;;  %v1219_v49 = vld [vmem:[%s1600_s0 + $0x84] ss:$20 sps:$4 sm:$0xff]  }
  0x10   :  { %999 = vmatpush3.bf16.msra.mxu0 %v1179_v14  ;;  %v1210_v42 = vld [vmem:[%s1600_s0 + $0x54] ss:$20 sps:$4 sm:$0xff]   ;;  %v1212_v44 = vld [vmem:[%s1600_s0 + $0x5c] ss:$20 sps:$4 sm:$0xff]   ;;  %v1221_v51 = vld [vmem:[%s1600_s0 + $0x78] ss:$20 sps:$4 sm:$0xff]  }
  0x11   :  { %1057 = vmatpush3.bf16.msra.mxu1 %v1180_v15  ;;  %1000 = vmatprep.subr.bf16.mxu0 %v1181_v16  ;;  %v1215_v46 = vld [vmem:[%s1600_s0 + $0x50] ss:$20 sps:$4 sm:$0xff]   ;;  %v1236_v50 = vld [vmem:[%s1599_s1 + $0x118] sm:$0xff]   ;;  %v1222_v52 = vld [vmem:[%s1600_s0 + $0x80] ss:$20 sps:$4 sm:$0xff]  }
  0x12   :  { %1058 = vmatprep.subr.bf16.mxu1 %v1182_v17  ;;  %v1217_v48 = vld [vmem:[%s1600_s0 + $0x7c] ss:$20 sps:$4 sm:$0xff]   ;;  %v1224_v53 = vld [vmem:[%s1600_s0 + $0xa4] ss:$20 sps:$4 sm:$0xff]   ;;  %v1226_v54 = vld [vmem:[%s1600_s0 + $0xac] ss:$20 sps:$4 sm:$0xff]  }
  0x13   :  { %v1228_v55 = vld [vmem:[%s1600_s0 + $0xa0] ss:$20 sps:$4 sm:$0xff]   ;;  %v1229_v56 = vld [vmem:[%s1600_s0 + $0xa8] ss:$20 sps:$4 sm:$0xff]   ;;  %v1235_v62 = vld [vmem:[%s1600_s0 + $0xd0] ss:$20 sps:$4 sm:$0xff]  }
  0x14   :  { %1001 = vmatpush3.bf16.msra.mxu0 %v1183_v18  ;;  %v1230_v57 = vld [vmem:[%s1600_s0 + $0xcc] ss:$20 sps:$4 sm:$0xff]   ;;  %v1232_v58 = vld [vmem:[%s1600_s0 + $0xd4] ss:$20 sps:$4 sm:$0xff]   ;;  %v52_v60 = vld [vmem:[%s1600_s0 + $0xf8] sm:$0x11] }
  0x15   :  { %1059 = vmatpush3.bf16.msra.mxu1 %v1184_v19  ;;  %1002 = vmatprep.subr.bf16.mxu0 %v1185_v20  ;;  %v51_v59 = vld [vmem:[%s1600_s0 + $0xf0] sm:$0x11]  ;;  %v1234_v61 = vld [vmem:[%s1600_s0 + $0xc8] ss:$20 sps:$4 sm:$0xff]   ;;  %v921_v0 = vcombine.high %v52_v60, %v52_v60  ;;  %v920_v2 = vcombine.low %v52_v60, %v52_v60  ;;  %v1243_v5 = vld [vmem:[%s1600_s0 + $0x38] ss:$20 sps:$4 sm:$0xff]  }
  0x16   :  { %1060 = vmatprep.subr.bf16.mxu1 %v1186_v21  ;;  %v919_v63 = vcombine.high %v51_v59, %v51_v59  ;;  %v918_v1 = vcombine.low %v51_v59, %v51_v59  ;;  %v1241_v3 = vld [vmem:[%s1600_s0 + $0x10] ss:$20 sps:$4 sm:$0xff]   ;;  %v1244_v6 = vld [vmem:[%s1600_s0 + $0xd8] ss:$20 sps:$4 sm:$0xff]   ;;  %v1245_v7 = vld [vmem:[%s1600_s0 + $0x60] ss:$20 sps:$4 sm:$0xff]  }
  0x17   :  { %v1242_v4 = vld [vmem:[%s1600_s0 + $0xb0] ss:$20 sps:$4 sm:$0xff]   ;;  %v1246_v8 = vld [vmem:[%s1600_s0 + $0x100] ss:$0 sps:$4 sm:$0x11]  }
  0x18   :  { %1003 = vmatpush3.bf16.msra.mxu0 %v1187_v22  ;;  %v1247_v9 = vld [vmem:[%s1600_s0 + $0x88] ss:$20 sps:$4 sm:$0xff]   ;;  %v1509_v11 = vld [vmem:[%s1601_s2] ss:$0 sm:$0xff] }
  0x19   :  { %1061 = vmatpush3.bf16.msra.mxu1 %v1188_v23  ;;  %1004 = vmatprep.subr.bf16.mxu0 %v1189_v24 }
  0x1a   :  { %1062 = vmatprep.subr.bf16.mxu1 %v1190_v25 }
  0x1c   :  { %1005 = vmatpush3.bf16.msra.mxu0 %v1191_v26 }
  0x1d   :  { %1063 = vmatpush3.bf16.msra.mxu1 %v1192_v27  ;;  %1006 = vmatprep.subr.bf16.mxu0 %v1193_v28 }
  0x1e   :  { %1064 = vmatprep.subr.bf16.mxu1 %v1194_v29 }
  0x20   :  { %1007 = vmatpush3.bf16.msra.mxu0 %v1195_v30 }
  0x21   :  { %1065 = vmatpush3.bf16.msra.mxu1 %v1196_v31  ;;  %1119 = vmatprep.subr.bf16.mxu0 %v1248_v34 }
  0x22   :  { %1155 = vmatprep.subr.bf16.mxu1 %v1248_v34 }
  0x23   :  { %571 = vmatmul.mubr.bf16.vlgmr.msra.gmra.mrb[0].mxu0 %v1197_v32 }
  0x24   :  { %659 = vmatmul.mubr.bf16.vlgmr.msra.gmra.mrb[0].mxu1 %v1200_v35  ;;  %1120 = vmatpush3.bf16.msra.mxu0 %v1203_v37 }
  0x25   :  { %578 = vmatprep.mubr.bf16.mxu0 %v1204_v38  ;;  %1159 = vmatpush3.bf16.msra.mxu1 %v1203_v37 }
  0x26   :  { %666 = vmatprep.mubr.bf16.mxu1 %v1206_v39  ;;  %1121 = vmatprep.subr.bf16.mxu0 %v1248_v34 }
  0x27   :  { %1156 = vmatprep.subr.bf16.mxu1 %v1248_v34 }
  0x28   :  { %1122 = vmatpush3.bf16.msra.mxu0 %v1214_v43 }
  0x29   :  { %1160 = vmatpush3.bf16.msra.mxu1 %v1214_v43  ;;  %1123 = vmatprep.subr.bf16.mxu0 %v1248_v34 }
  0x2a   :  { %1157 = vmatprep.subr.bf16.mxu1 %v1248_v34 }
  0x2b   :  { %579 = vmatmul.mubr.bf16.gmra.mrb[4].mxu0 %v1208_v40 }
  0x2c   :  { %667 = vmatmul.mubr.bf16.gmra.mrb[4].mxu1 %v1209_v41  ;;  %586 = vmatprep.mubr.bf16.mxu0 %v1210_v42 }
  0x2d   :  { %674 = vmatprep.mubr.bf16.mxu1 %v1212_v44  ;;  %1124 = vmatpush3.bf16.msra.mxu0 %v1223_v45 }
  0x2e   :  { %1161 = vmatpush3.bf16.msra.mxu1 %v1223_v45  ;;  %1125 = vmatprep.subr.bf16.mxu0 %v1248_v34 }
  0x2f   :  { %1158 = vmatprep.subr.bf16.mxu1 %v1248_v34 }
  0x31   :  { %1126 = vmatpush3.bf16.msra.mxu0 %v1236_v50 }
  0x32   :  { %1162 = vmatpush3.bf16.msra.mxu1 %v1236_v50 }
  0x33   :  { %587 = vmatmul.mubr.bf16.gmra.mrb[8].mxu0 %v1215_v46 }
  0x34   :  { %675 = vmatmul.mubr.bf16.gmra.mrb[8].mxu1 %v1216_v47  ;;  %594 = vmatprep.mubr.bf16.mxu0 %v1217_v48 }
  0x35   :  { %682 = vmatprep.mubr.bf16.mxu1 %v1219_v49 }
  0x3b   :  { %595 = vmatmul.mubr.bf16.gmra.mrb[12].mxu0 %v1221_v51 }
  0x3c   :  { %683 = vmatmul.mubr.bf16.gmra.mrb[12].mxu1 %v1222_v52  ;;  %602 = vmatprep.mubr.bf16.mxu0 %v1224_v53 }
  0x3d   :  { %690 = vmatprep.mubr.bf16.mxu1 %v1226_v54 }
  0x43   :  { %603 = vmatmul.mubr.bf16.gmra.mrb[16].mxu0 %v1228_v55 }
  0x44   :  { %691 = vmatmul.mubr.bf16.gmra.mrb[16].mxu1 %v1229_v56  ;;  %610 = vmatprep.mubr.bf16.mxu0 %v1230_v57 }
  0x45   :  { %698 = vmatprep.mubr.bf16.mxu1 %v1232_v58 }
  0x4b   :  { %611 = vmatmul.mubr.bf16.gmra.mrb[20].mxu0 %v1234_v61 }
  0x4c   :  { %699 = vmatmul.mubr.bf16.gmra.mrb[20].mxu1 %v1235_v62  ;;  %618 = vmatprep.mubr.bf16.mxu0 %v919_v63 }
  0x4d   :  { %706 = vmatprep.mubr.bf16.mxu1 %v921_v0 }
  0x53   :  { %619 = vmatmul.mubr.bf16.gmra.mrb[24].mxu0 %v918_v1 }
  0x54   :  { %707 = vmatmul.mubr.bf16.gmra.mrb[24].mxu1 %v920_v2  ;;  %1127 = vmatprep.mubr.msk.bf16.mxu0 %vm1249_vm0, %v1248_v34 }
  0x55   :  { %1143 = vmatprep.mubr.msk.bf16.mxu1 %vm1249_vm0, %v1248_v34 }
  0x5b   :  { %1128 = vmatmul.mubr.msk.bf16.vlgmr.msra.gmra.mrb[28].mxu0 %vm516_vm1, %v1241_v3 }
  0x5c   :  { %1144 = vmatmul.mubr.msk.bf16.vlgmr.msra.gmra.mrb[28].mxu1 %vm516_vm1, %v1242_v4  ;;  %1131 = vmatprep.mubr.msk.bf16.mxu0 %vm1249_vm0, %v1248_v34 }
  0x5d   :  { %1147 = vmatprep.mubr.msk.bf16.mxu1 %vm1249_vm0, %v1248_v34 }
  0x63   :  { %1132 = vmatmul.mubr.msk.bf16.gmra.mrb[32].mxu0 %vm516_vm1, %v1243_v5 }
  0x64   :  { %1148 = vmatmul.mubr.msk.bf16.gmra.mrb[32].mxu1 %vm516_vm1, %v1244_v6  ;;  %1135 = vmatprep.mubr.msk.bf16.mxu0 %vm1249_vm0, %v1248_v34 }
  0x65   :  { %1151 = vmatprep.mubr.msk.bf16.mxu1 %vm1249_vm0, %v1248_v34 }
  0x6b   :  { %1136 = vmatmul.mubr.msk.bf16.gmra.mrb[36].mxu0 %vm516_vm1, %v1245_v7 }
  0x6c   :  { %1152 = vmatmul.mubr.msk.bf16.gmra.mrb[36].mxu1 %vm516_vm1, %v1246_v8  ;;  %1139 = vmatprep.mubr.msk.bf16.mxu0 %vm1249_vm0, %v1248_v34 }
  0x73   :  { %1140 = vmatmul.mubr.msk.bf16.gmra.mrb[40].mxu0 %vm516_vm1, %v1247_v9 }
  0xf6   :  { %v1008_v10 = vpop.f32.mrb[0].mxu0 }
  0xf7   :  { %v1009_v12 = vpop.f32.mrb[1].mxu0  ;;  %v1066_v13 = vpop.f32.mrb[0].mxu1 }
  0xf8   :  { %v1010_v14 = vadd.f32 %v1009_v12, %v1008_v10  ;;  %v1011_v15 = vpop.f32.mrb[2].mxu0  ;;  %v1067_v16 = vpop.f32.mrb[1].mxu1 }
  0xf9   :  { %v1012_v17 = vpop.f32.mrb[3].mxu0  ;;  %v1068_v18 = vadd.f32 %v1067_v16, %v1066_v13  ;;  %v1069_v19 = vpop.f32.mrb[2].mxu1 }
  0xfa   :  { %v573_v20 = vadd.f32 %v1010_v14, %v1509_v11  ;;  %v1013_v21 = vadd.f32 %v1012_v17, %v1011_v15  ;;  %v1070_v22 = vpop.f32.mrb[3].mxu1 }
  0xfb   :  { %v1071_v23 = vadd.f32 %v1070_v22, %v1069_v19 }
  0xfc   :  { %v576_v24 = vadd.f32 %v1013_v21, %v1509_v11  ;;  %v1513_v25 = vadd.f32 %v1068_v18, %v573_v20 }
  0xfe   :  { %v1014_v26 = vpop.f32.mrb[4].mxu0  ;;  %v1515_v27 = vadd.f32 %v1071_v23, %v576_v24 }
  0xff   :  { %v1015_v28 = vpop.f32.mrb[5].mxu0  ;;  %v1072_v29 = vpop.f32.mrb[4].mxu1 }
 0x100   :  { %v1016_v30 = vadd.f32 %v1015_v28, %v1014_v26  ;;  %v1017_v31 = vpop.f32.mrb[6].mxu0  ;;  %v1073_v32 = vpop.f32.mrb[5].mxu1 }
 0x101   :  { %v1018_v33 = vpop.f32.mrb[7].mxu0  ;;  %v1074_v34 = vadd.f32 %v1073_v32, %v1072_v29  ;;  %v1075_v35 = vpop.f32.mrb[6].mxu1 }
 0x102   :  { %v581_v36 = vadd.f32 %v1016_v30, %v1509_v11  ;;  %v1019_v37 = vadd.f32 %v1018_v33, %v1017_v31  ;;  %v1076_v38 = vpop.f32.mrb[7].mxu1 }
 0x103   :  { %v1077_v39 = vadd.f32 %v1076_v38, %v1075_v35 }
 0x104   :  { %v584_v40 = vadd.f32 %v1019_v37, %v1509_v11  ;;  %v1519_v41 = vadd.f32 %v1074_v34, %v581_v36 }
 0x106   :  { %v1020_v42 = vpop.f32.mrb[8].mxu0  ;;  %v1521_v43 = vadd.f32 %v1077_v39, %v584_v40 }
 0x107   :  { %v1021_v44 = vpop.f32.mrb[9].mxu0  ;;  %v1078_v45 = vpop.f32.mrb[8].mxu1 }
 0x108   :  { %v1022_v46 = vadd.f32 %v1021_v44, %v1020_v42  ;;  %v1023_v47 = vpop.f32.mrb[10].mxu0  ;;  %v1079_v48 = vpop.f32.mrb[9].mxu1 }
 0x109   :  { %v1024_v49 = vpop.f32.mrb[11].mxu0  ;;  %v1080_v50 = vadd.f32 %v1079_v48, %v1078_v45  ;;  %v1081_v51 = vpop.f32.mrb[10].mxu1 }
 0x10a   :  { %v589_v52 = vadd.f32 %v1022_v46, %v1509_v11  ;;  %v1025_v53 = vadd.f32 %v1024_v49, %v1023_v47  ;;  %v1082_v54 = vpop.f32.mrb[11].mxu1 }
 0x10b   :  { %v1083_v55 = vadd.f32 %v1082_v54, %v1081_v51 }
 0x10c   :  { %v592_v56 = vadd.f32 %v1025_v53, %v1509_v11  ;;  %v1525_v57 = vadd.f32 %v1080_v50, %v589_v52 }
 0x10e   :  { %v1026_v58 = vpop.f32.mrb[12].mxu0  ;;  %v1527_v59 = vadd.f32 %v1083_v55, %v592_v56 }
 0x10f   :  { %v1027_v60 = vpop.f32.mrb[13].mxu0  ;;  %v1084_v61 = vpop.f32.mrb[12].mxu1 }
 0x110   :  { %v1028_v62 = vadd.f32 %v1027_v60, %v1026_v58  ;;  %v1029_v63 = vpop.f32.mrb[14].mxu0  ;;  %v1085_v0 = vpop.f32.mrb[13].mxu1 }
 0x111   :  { %v1030_v1 = vpop.f32.mrb[15].mxu0  ;;  %v1086_v2 = vadd.f32 %v1085_v0, %v1084_v61  ;;  %v1087_v3 = vpop.f32.mrb[14].mxu1 }
 0x112   :  { %v597_v4 = vadd.f32 %v1028_v62, %v1509_v11  ;;  %v1031_v5 = vadd.f32 %v1030_v1, %v1029_v63  ;;  %v1088_v6 = vpop.f32.mrb[15].mxu1 }
 0x113   :  { %v1089_v7 = vadd.f32 %v1088_v6, %v1087_v3 }
 0x114   :  { %v600_v8 = vadd.f32 %v1031_v5, %v1509_v11  ;;  %v1531_v9 = vadd.f32 %v1086_v2, %v597_v4 }
 0x116   :  { %v1032_v10 = vpop.f32.mrb[16].mxu0  ;;  %v1533_v12 = vadd.f32 %v1089_v7, %v600_v8 }
 0x117   :  { %v1033_v13 = vpop.f32.mrb[17].mxu0  ;;  %v1090_v14 = vpop.f32.mrb[16].mxu1 }
 0x118   :  { %v1034_v15 = vadd.f32 %v1033_v13, %v1032_v10  ;;  %v1035_v16 = vpop.f32.mrb[18].mxu0  ;;  %v1091_v17 = vpop.f32.mrb[17].mxu1 }
 0x119   :  { %v1036_v18 = vpop.f32.mrb[19].mxu0  ;;  %v1092_v19 = vadd.f32 %v1091_v17, %v1090_v14  ;;  %v1093_v20 = vpop.f32.mrb[18].mxu1 }
 0x11a   :  { %v605_v21 = vadd.f32 %v1034_v15, %v1509_v11  ;;  %v1037_v22 = vadd.f32 %v1036_v18, %v1035_v16  ;;  %v1094_v23 = vpop.f32.mrb[19].mxu1 }
 0x11b   :  { %v1095_v24 = vadd.f32 %v1094_v23, %v1093_v20 }
 0x11c   :  { %v608_v26 = vadd.f32 %v1037_v22, %v1509_v11  ;;  %v693_v28 = vadd.f32 %v1092_v19, %v605_v21 }
 0x11e   :  { %v1038_v29 = vpop.f32.mrb[20].mxu0  ;;  %v696_v30 = vadd.f32 %v1095_v24, %v608_v26 }
 0x11f   :  { %v1039_v31 = vpop.f32.mrb[21].mxu0  ;;  %v1096_v32 = vpop.f32.mrb[20].mxu1 }
 0x120   :  { %v1040_v33 = vadd.f32 %v1039_v31, %v1038_v29  ;;  %v1041_v34 = vpop.f32.mrb[22].mxu0  ;;  %v1097_v35 = vpop.f32.mrb[21].mxu1 }
 0x121   :  { %v1042_v36 = vpop.f32.mrb[23].mxu0  ;;  %v1098_v37 = vadd.f32 %v1097_v35, %v1096_v32  ;;  %v1099_v38 = vpop.f32.mrb[22].mxu1 }
 0x122   :  { %v613_v39 = vadd.f32 %v1040_v33, %v1509_v11  ;;  %v1043_v40 = vadd.f32 %v1042_v36, %v1041_v34  ;;  %v1100_v42 = vpop.f32.mrb[23].mxu1 }
 0x123   :  { %v1101_v44 = vadd.f32 %v1100_v42, %v1099_v38 }
 0x124   :  { %v616_v45 = vadd.f32 %v1043_v40, %v1509_v11  ;;  %v701_v46 = vadd.f32 %v1098_v37, %v613_v39 }
 0x126   :  { %v1044_v47 = vpop.f32.mrb[24].mxu0  ;;  %v704_v48 = vadd.f32 %v1101_v44, %v616_v45 }
 0x127   :  { %v1045_v49 = vpop.f32.mrb[25].mxu0  ;;  %v1102_v50 = vpop.f32.mrb[24].mxu1 }
 0x128   :  { %v1046_v51 = vadd.f32 %v1045_v49, %v1044_v47  ;;  %v1047_v52 = vpop.f32.mrb[26].mxu0  ;;  %v1103_v53 = vpop.f32.mrb[25].mxu1 }
 0x129   :  { %v1048_v54 = vpop.f32.mrb[27].mxu0  ;;  %v1104_v55 = vadd.f32 %v1103_v53, %v1102_v50  ;;  %v1105_v56 = vpop.f32.mrb[26].mxu1 }
 0x12a   :  { %v621_v58 = vadd.f32 %v1046_v51, %v1509_v11  ;;  %v1106_v60 = vpop.f32.mrb[27].mxu1 }
 0x12c   :  { %v709_v61 = vadd.f32 %v1104_v55, %v621_v58 }
 0x12e   :  { %v748_v62 = vpop.f32.mrb[28].mxu0 }
 0x12f   :  { %v749_v63 = vadd.f32 %v748_v62, %v1513_v25  ;;  %v780_v0 = vpop.f32.mrb[28].mxu1  ;;  %v1129_v1 = vpop.f32.mrb[29].mxu0 }
 0x130   :  { %v781_v2 = vadd.f32 %v780_v0, %v693_v28  ;;  %v1145_v3 = vpop.f32.mrb[29].mxu1  ;;  %v751_v4 = vpop.f32.mrb[30].mxu0 }
 0x131   :  { %v802_v5 = vmax.f32 %v749_v63, 0.0  ;;  %v752_v6 = vadd.f32 %v751_v4, %v1515_v27  ;;  %v783_v7 = vpop.f32.mrb[30].mxu1  ;;  %v1130_v8 = vpop.f32.mrb[31].mxu0 }
 0x132   :  { %v810_v10 = vmax.f32 %v781_v2, 0.0  ;;  %v784_v13 = vadd.f32 %v783_v7, %v696_v30  ;;  %v1146_v14 = vpop.f32.mrb[31].mxu1 }
 0x133   :  { %v979_v11 = vpack.c.bf16 %v802_v5, %v802_v5  ;;  %v803_v15 = vmax.f32 %v752_v6, 0.0 }
 0x134   :  { %v987_v16 = vpack.c.bf16 %v810_v10, %v810_v10  ;;  %v811_v17 = vmax.f32 %v784_v13, 0.0 }
 0x135   :  { %869 = vst.msk [vmem:[%s1602_s3] sm:$0xf] %vm868_vm2, %v979_v11  ;;  %v980_v25 = vpack.c.bf16 %v803_v15, %v803_v15 }
 0x136   :  { %877 = vst.msk [vmem:[%s1602_s3 + $0x20] sm:$0xf] %vm868_vm2, %v987_v16  ;;  %v988_v27 = vpack.c.bf16 %v811_v17, %v811_v17  ;;  %v756_v18 = vpop.f32.mrb[32].mxu0 }
 0x137   :  { %870 = vst.msk [vmem:[%s1602_s3 + $0x4] sm:$0xf] %vm868_vm2, %v980_v25  ;;  %v757_v19 = vadd.f32 %v756_v18, %v1519_v41  ;;  %v788_v20 = vpop.f32.mrb[32].mxu1  ;;  %v1133_v21 = vpop.f32.mrb[33].mxu0 }
 0x138   :  { %878 = vst.msk [vmem:[%s1602_s3 + $0x24] sm:$0xf] %vm868_vm2, %v988_v27  ;;  %v789_v22 = vadd.f32 %v788_v20, %v701_v46  ;;  %v1149_v23 = vpop.f32.mrb[33].mxu1  ;;  %v759_v24 = vpop.f32.mrb[34].mxu0 }
 0x139   :  { %v804_v26 = vmax.f32 %v757_v19, 0.0  ;;  %v760_v28 = vadd.f32 %v759_v24, %v1521_v43  ;;  %v791_v29 = vpop.f32.mrb[34].mxu1  ;;  %v1134_v30 = vpop.f32.mrb[35].mxu0 }
 0x13a   :  { %v812_v31 = vmax.f32 %v789_v22, 0.0  ;;  %v792_v32 = vadd.f32 %v791_v29, %v704_v48  ;;  %v1150_v33 = vpop.f32.mrb[35].mxu1 }
 0x13b   :  { %v981_v34 = vpack.c.bf16 %v804_v26, %v804_v26  ;;  %v805_v41 = vmax.f32 %v760_v28, 0.0 }
 0x13c   :  { %v989_v35 = vpack.c.bf16 %v812_v31, %v812_v31  ;;  %v813_v36 = vmax.f32 %v792_v32, 0.0 }
 0x13d   :  { %871 = vst.msk [vmem:[%s1602_s3 + $0x8] sm:$0xf] %vm868_vm2, %v981_v34  ;;  %v982_v37 = vpack.c.bf16 %v805_v41, %v805_v41 }
 0x13e   :  { %879 = vst.msk [vmem:[%s1602_s3 + $0x28] sm:$0xf] %vm868_vm2, %v989_v35  ;;  %v990_v43 = vpack.c.bf16 %v813_v36, %v813_v36  ;;  %v764_v38 = vpop.f32.mrb[36].mxu0 }
 0x13f   :  { %872 = vst.msk [vmem:[%s1602_s3 + $0xc] sm:$0xf] %vm868_vm2, %v982_v37  ;;  %v765_v39 = vadd.f32 %v764_v38, %v1525_v57  ;;  %v796_v40 = vpop.f32.mrb[36].mxu1  ;;  %v1137_v42 = vpop.f32.mrb[37].mxu0 }
 0x140   :  { %880 = vst.msk [vmem:[%s1602_s3 + $0x2c] sm:$0xf] %vm868_vm2, %v990_v43  ;;  %v797_v44 = vadd.f32 %v796_v40, %v709_v61  ;;  %v767_v45 = vpop.f32.mrb[38].mxu0  ;;  %v1153_v46 = vpop.f32.mrb[37].mxu1 }
 0x141   :  { %v806_v47 = vmax.f32 %v765_v39, 0.0  ;;  %v768_v48 = vadd.f32 %v767_v45, %v1527_v59  ;;  %v1138_v49 = vpop.f32.mrb[39].mxu0  ;;  %v799_v50 = vpop.f32.mrb[38].mxu1 }
 0x142   :  { %v814_v51 = vmax.f32 %v797_v44, 0.0  ;;  %v1154_v52 = vpop.f32.mrb[39].mxu1 }
 0x143   :  { %v983_v53 = vpack.c.bf16 %v806_v47, %v806_v47  ;;  %v807_v57 = vmax.f32 %v768_v48, 0.0 }
 0x144   :  { %v991_v54 = vpack.c.bf16 %v814_v51, %v814_v51 }
 0x145   :  { %873 = vst.msk [vmem:[%s1602_s3 + $0x10] sm:$0xf] %vm868_vm2, %v983_v53  ;;  %v984_v55 = vpack.c.bf16 %v807_v57, %v807_v57 }
 0x146   :  { %882 = vst.msk [vmem:[%s1602_s3 + $0x30] sm:$0x1] %vm881_vm3, %v991_v54  ;;  %v772_v56 = vpop.f32.mrb[40].mxu0 }
 0x147   :  { %874 = vst.msk [vmem:[%s1602_s3 + $0x14] sm:$0xf] %vm868_vm2, %v984_v55  ;;  %v773_v59 = vadd.f32 %v772_v56, %v1531_v9  ;;  %v1141_v58 = vpop.f32.mrb[41].mxu0 }
 0x148   :  { %v775_v60 = vpop.f32.mrb[42].mxu0 }
 0x149   :  { %v808_v61 = vmax.f32 %v773_v59, 0.0  ;;  %v776_v62 = vadd.f32 %v775_v60, %v1533_v12  ;;  %v1142_v63 = vpop.f32.mrb[43].mxu0 }
 0x14b   :  { %v985_v0 = vpack.c.bf16 %v808_v61, %v808_v61  ;;  %v809_v1 = vmax.f32 %v776_v62, 0.0 }
 0x14d   :  { %875 = vst.msk [vmem:[%s1602_s3 + $0x18] sm:$0xf] %vm868_vm2, %v985_v0  ;;  %v986_v2 = vpack.c.bf16 %v809_v1, %v809_v1 }
 0x14f   :  { %876 = vst.msk [vmem:[%s1602_s3 + $0x1c] sm:$0xf] %vm868_vm2, %v986_v2 }

// kernel: critic_forward.7
= control target key start
LH: loop header
LB: loop body
LE: loop exit
PB: predicated region body
PF: predicated region fallthrough
CT: control target
= control target key end

     0   :  { %v813_v36 = vlaneseq  ;;  %v8548_v37 = vmov 1966171168   ;;  %vm4942_vm0 = vcmask 523264   ;;  %vm6363_vm1 = vcmask 1024   ;;  %s11180_s1 = inlined_call_operand.vmem [shape: bf16[3136,512], index: 1, kind: input, shape index: {}]   ;;  %s11181_s0 = inlined_call_operand.vmem [shape: bf16[2,3136], index: 0, kind: input, shape index: {}]   ;;  %s11182_s3 = inlined_call_operand.vmem [shape: bf16[512,1], index: 3, kind: input, shape index: {}]   ;;  %s11183_s2 = inlined_call_operand.vmem [shape: f32[1,512], index: 2, kind: input, shape index: {}]   ;;  %s11184_s4 = inlined_call_operand.<no memory space> [shape: f32[1,1], index: 4, kind: input, shape index: {}]   ;;  %s11185_s5 = inlined_call_operand.vmem [shape: f32[2,1], index: 5, kind: output, shape index: {}]  }
   0x1   :  { %v7335_v0 = vld [vmem:[%s11180_s1 + $0x4] ss:$16 sps:$4 sm:$0xff]   ;;  %v7337_v1 = vld [vmem:[%s11180_s1 + $0xc] ss:$16 sps:$4 sm:$0xff]   ;;  %v7339_v2 = vld [vmem:[%s11180_s1] ss:$16 sps:$4 sm:$0xff]   ;;  %v839_v38 = vunpack.c.l.s4 %v8548_v37 }
   0x2   :  { %4946 = vmatprep.subr.bf16.mxu0 %v7335_v0  ;;  %v7340_v3 = vld [vmem:[%s11180_s1 + $0x8] ss:$16 sps:$4 sm:$0xff]   ;;  %5479 = vmatprep.subr.bf16.mxu1 %v7337_v1  ;;  %v7341_v4 = vld [vmem:[%s11180_s1 + $0x24] ss:$16 sps:$4 sm:$0xff]   ;;  %v7343_v5 = vld [vmem:[%s11180_s1 + $0x2c] ss:$16 sps:$4 sm:$0xff]  }
   0x3   :  { %4947 = vmatpush1.bf16.msra.mxu0 %v7339_v2  ;;  %5480 = vmatpush1.bf16.msra.mxu1 %v7340_v3  ;;  %v7345_v6 = vld [vmem:[%s11180_s1 + $0x20] ss:$16 sps:$4 sm:$0xff]   ;;  %v7346_v7 = vld [vmem:[%s11180_s1 + $0x28] ss:$16 sps:$4 sm:$0xff]   ;;  %v7347_v8 = vld [vmem:[%s11180_s1 + $0x44] ss:$16 sps:$4 sm:$0xff]   ;;  %v840_v43 = vunpack.c.0.s8 %v839_v38 }
   0x4   :  { %4948 = vmatprep.subr.bf16.mxu0 %v7341_v4  ;;  %5481 = vmatprep.subr.bf16.mxu1 %v7343_v5  ;;  %v7349_v9 = vld [vmem:[%s11180_s1 + $0x4c] ss:$16 sps:$4 sm:$0xff]   ;;  %v7351_v10 = vld [vmem:[%s11180_s1 + $0x40] ss:$16 sps:$4 sm:$0xff]   ;;  %v7352_v11 = vld [vmem:[%s11180_s1 + $0x48] ss:$16 sps:$4 sm:$0xff]  }
   0x5   :  { %v7353_v12 = vld [vmem:[%s11180_s1 + $0x64] ss:$16 sps:$4 sm:$0xff]   ;;  %v7355_v13 = vld [vmem:[%s11180_s1 + $0x6c] ss:$16 sps:$4 sm:$0xff]   ;;  %v7357_v14 = vld [vmem:[%s11180_s1 + $0x60] ss:$16 sps:$4 sm:$0xff]  }
   0x6   :  { %v7358_v15 = vld [vmem:[%s11180_s1 + $0x68] ss:$16 sps:$4 sm:$0xff]   ;;  %v7359_v16 = vld [vmem:[%s11180_s1 + $0x84] ss:$16 sps:$4 sm:$0xff]   ;;  %v7361_v17 = vld [vmem:[%s11180_s1 + $0x8c] ss:$16 sps:$4 sm:$0xff]  }
   0x7   :  { %4949 = vmatpush1.bf16.msra.mxu0 %v7345_v6  ;;  %5482 = vmatpush1.bf16.msra.mxu1 %v7346_v7  ;;  %v7363_v18 = vld [vmem:[%s11180_s1 + $0x80] ss:$16 sps:$4 sm:$0xff]   ;;  %v7364_v19 = vld [vmem:[%s11180_s1 + $0x88] ss:$16 sps:$4 sm:$0xff]   ;;  %v7365_v20 = vld [vmem:[%s11180_s1 + $0xa4] ss:$16 sps:$4 sm:$0xff]  }
   0x8   :  { %4950 = vmatprep.subr.bf16.mxu0 %v7347_v8  ;;  %5483 = vmatprep.subr.bf16.mxu1 %v7349_v9  ;;  %v7367_v21 = vld [vmem:[%s11180_s1 + $0xac] ss:$16 sps:$4 sm:$0xff]   ;;  %v7369_v22 = vld [vmem:[%s11180_s1 + $0xa0] ss:$16 sps:$4 sm:$0xff]   ;;  %v7370_v23 = vld [vmem:[%s11180_s1 + $0xa8] ss:$16 sps:$4 sm:$0xff]  }
   0x9   :  { %v7371_v24 = vld [vmem:[%s11180_s1 + $0xc4] ss:$16 sps:$4 sm:$0xff]   ;;  %v7373_v25 = vld [vmem:[%s11180_s1 + $0xcc] ss:$16 sps:$4 sm:$0xff]   ;;  %v7375_v26 = vld [vmem:[%s11180_s1 + $0xc0] ss:$16 sps:$4 sm:$0xff]  }
   0xa   :  { %v7376_v27 = vld [vmem:[%s11180_s1 + $0xc8] ss:$16 sps:$4 sm:$0xff]   ;;  %v7377_v28 = vld [vmem:[%s11180_s1 + $0xe4] ss:$16 sps:$4 sm:$0xff]   ;;  %v7379_v29 = vld [vmem:[%s11180_s1 + $0xec] ss:$16 sps:$4 sm:$0xff]  }
   0xb   :  { %4951 = vmatpush1.bf16.msra.mxu0 %v7351_v10  ;;  %5484 = vmatpush1.bf16.msra.mxu1 %v7352_v11  ;;  %v7381_v30 = vld [vmem:[%s11180_s1 + $0xe0] ss:$16 sps:$4 sm:$0xff]   ;;  %v7382_v31 = vld [vmem:[%s11180_s1 + $0xe8] ss:$16 sps:$4 sm:$0xff]   ;;  %v7383_v32 = vld [vmem:[%s11180_s1 + $0x104] ss:$16 sps:$4 sm:$0xff]  }
   0xc   :  { %4952 = vmatprep.subr.bf16.mxu0 %v7353_v12  ;;  %5485 = vmatprep.subr.bf16.mxu1 %v7355_v13  ;;  %v7385_v33 = vld [vmem:[%s11180_s1 + $0x10c] ss:$16 sps:$4 sm:$0xff]   ;;  %v7387_v34 = vld [vmem:[%s11180_s1 + $0x100] ss:$16 sps:$4 sm:$0xff]   ;;  %v7388_v35 = vld [vmem:[%s11180_s1 + $0x108] ss:$16 sps:$4 sm:$0xff]  }
   0xd   :  { %v7389_v39 = vld [vmem:[%s11180_s1 + $0x124] ss:$16 sps:$4 sm:$0xff]   ;;  %v7391_v40 = vld [vmem:[%s11180_s1 + $0x12c] ss:$16 sps:$4 sm:$0xff]   ;;  %v7393_v41 = vld [vmem:[%s11180_s1 + $0x120] ss:$16 sps:$4 sm:$0xff]  }
   0xe   :  { %v8697_v42 = vshrl.u32 %v813_v36, 7  ;;  %v7394_v44 = vld [vmem:[%s11180_s1 + $0x128] ss:$16 sps:$4 sm:$0xff]   ;;  %v7395_v45 = vld [vmem:[%s11180_s1 + $0x144] ss:$16 sps:$4 sm:$0xff]  }
   0xf   :  { %4953 = vmatpush1.bf16.msra.mxu0 %v7357_v14  ;;  %5486 = vmatpush1.bf16.msra.mxu1 %v7358_v15  ;;  %v7397_v46 = vld [vmem:[%s11180_s1 + $0x14c] ss:$16 sps:$4 sm:$0xff]   ;;  %v7399_v47 = vld [vmem:[%s11180_s1 + $0x140] ss:$16 sps:$4 sm:$0xff]   ;;  %v7400_v48 = vld [vmem:[%s11180_s1 + $0x148] ss:$16 sps:$4 sm:$0xff]  }
  0x10   :  { %4954 = vmatprep.subr.bf16.mxu0 %v7359_v16  ;;  %5487 = vmatprep.subr.bf16.mxu1 %v7361_v17  ;;  %v8715_v49 = vsub.s32 %v840_v43, %v8697_v42  ;;  %v7401_v50 = vld [vmem:[%s11180_s1 + $0x164] ss:$16 sps:$4 sm:$0xff]   ;;  %v7403_v51 = vld [vmem:[%s11180_s1 + $0x16c] ss:$16 sps:$4 sm:$0xff]   ;;  %v7405_v53 = vld [vmem:[%s11180_s1 + $0x160] ss:$16 sps:$4 sm:$0xff]  }
  0x11   :  { %v8726_v52 = vld [vmem:[%s11181_s0] sm:$0xff]  ;;  %v7406_v55 = vld [vmem:[%s11180_s1 + $0x168] ss:$16 sps:$4 sm:$0xff]   ;;  %v7409_v57 = vld [vmem:[%s11180_s1 + $0x18c] ss:$16 sps:$4 sm:$0xff]  }
  0x12   :  { %v844_v54 = vrot.slane %v8726_v52, %v8715_v49  ;;  %v7407_v56 = vld [vmem:[%s11180_s1 + $0x184] ss:$16 sps:$4 sm:$0xff]   ;;  %v7411_v59 = vld [vmem:[%s11180_s1 + $0x180] ss:$16 sps:$4 sm:$0xff]   ;;  %v7412_v61 = vld [vmem:[%s11180_s1 + $0x188] ss:$16 sps:$4 sm:$0xff]  }
  0x13   :  { %4955 = vmatpush1.bf16.msra.mxu0 %v7363_v18  ;;  %5488 = vmatpush1.bf16.msra.mxu1 %v7364_v19  ;;  %v7413_v62 = vld [vmem:[%s11180_s1 + $0x1a4] ss:$16 sps:$4 sm:$0xff]   ;;  %v7415_v63 = vld [vmem:[%s11180_s1 + $0x1ac] ss:$16 sps:$4 sm:$0xff]   ;;  %v7417_v0 = vld [vmem:[%s11180_s1 + $0x1a0] ss:$16 sps:$4 sm:$0xff]  }
  0x14   :  { %4956 = vmatprep.subr.bf16.mxu0 %v7365_v20  ;;  %5489 = vmatprep.subr.bf16.mxu1 %v7367_v21  ;;  %v852_v58 = vcombine.high %v844_v54, %v844_v54  ;;  %v7418_v1 = vld [vmem:[%s11180_s1 + $0x1a8] ss:$16 sps:$4 sm:$0xff]   ;;  %v7419_v2 = vld [vmem:[%s11180_s1 + $0x1c4] ss:$16 sps:$4 sm:$0xff]   ;;  %v7421_v3 = vld [vmem:[%s11180_s1 + $0x1cc] ss:$16 sps:$4 sm:$0xff]   ;;  %v8795_v13 = vrot.slane %v844_v54, %v8715_v49 }
  0x15   :  { %v7423_v4 = vld [vmem:[%s11180_s1 + $0x1c0] ss:$16 sps:$4 sm:$0xff]   ;;  %v7424_v5 = vld [vmem:[%s11180_s1 + $0x1c8] ss:$16 sps:$4 sm:$0xff]   ;;  %v7425_v6 = vld [vmem:[%s11180_s1 + $0x1e4] ss:$16 sps:$4 sm:$0xff]  }
  0x16   :  { %v874_v60 = vrot.slane %v852_v58, %v8715_v49  ;;  %v7427_v7 = vld [vmem:[%s11180_s1 + $0x1ec] ss:$16 sps:$4 sm:$0xff]   ;;  %v7429_v8 = vld [vmem:[%s11180_s1 + $0x1e0] ss:$16 sps:$4 sm:$0xff]   ;;  %v7430_v9 = vld [vmem:[%s11180_s1 + $0x1e8] ss:$16 sps:$4 sm:$0xff]  }
  0x17   :  { %4957 = vmatpush1.bf16.msra.mxu0 %v7369_v22  ;;  %5490 = vmatpush1.bf16.msra.mxu1 %v7370_v23  ;;  %v7433_v10 = vld [vmem:[%s11180_s1 + $0x204] ss:$16 sps:$4 sm:$0xff]   ;;  %v7436_v11 = vld [vmem:[%s11180_s1 + $0x20c] ss:$16 sps:$4 sm:$0xff]   ;;  %v7431_v12 = vld [vmem:[%s11180_s1 + $0x200] ss:$16 sps:$4 sm:$0xff]  }
  0x18   :  { %4958 = vmatprep.subr.bf16.mxu0 %v7371_v24  ;;  %5491 = vmatprep.subr.bf16.mxu1 %v7373_v25  ;;  %v7434_v14 = vld [vmem:[%s11180_s1 + $0x208] ss:$16 sps:$4 sm:$0xff]   ;;  %v7439_v15 = vld [vmem:[%s11180_s1 + $0x224] ss:$16 sps:$4 sm:$0xff]   ;;  %v7442_v16 = vld [vmem:[%s11180_s1 + $0x22c] ss:$16 sps:$4 sm:$0xff]   ;;  %v884_v17 = vcombine.high %v874_v60, %v874_v60 }
  0x19   :  { %4978 = vmatprep.mubr.bf16.mxu0 %v874_v60  ;;  %5511 = vmatprep.mubr.bf16.mxu1 %v874_v60  ;;  %v7437_v18 = vld [vmem:[%s11180_s1 + $0x220] ss:$16 sps:$4 sm:$0xff]   ;;  %v7440_v19 = vld [vmem:[%s11180_s1 + $0x228] ss:$16 sps:$4 sm:$0xff]   ;;  %v7445_v20 = vld [vmem:[%s11180_s1 + $0x244] ss:$16 sps:$4 sm:$0xff]  }
  0x1a   :  { %v7448_v21 = vld [vmem:[%s11180_s1 + $0x24c] ss:$16 sps:$4 sm:$0xff]   ;;  %v7443_v22 = vld [vmem:[%s11180_s1 + $0x240] ss:$16 sps:$4 sm:$0xff]   ;;  %v7446_v23 = vld [vmem:[%s11180_s1 + $0x248] ss:$16 sps:$4 sm:$0xff]  }
  0x1b   :  { %4959 = vmatpush1.bf16.msra.mxu0 %v7375_v26  ;;  %5492 = vmatpush1.bf16.msra.mxu1 %v7376_v27  ;;  %v7451_v24 = vld [vmem:[%s11180_s1 + $0x264] ss:$16 sps:$4 sm:$0xff]   ;;  %v7454_v25 = vld [vmem:[%s11180_s1 + $0x26c] ss:$16 sps:$4 sm:$0xff]   ;;  %v7449_v26 = vld [vmem:[%s11180_s1 + $0x260] ss:$16 sps:$4 sm:$0xff]  }
  0x1c   :  { %4960 = vmatprep.subr.bf16.mxu0 %v7377_v28  ;;  %5493 = vmatprep.subr.bf16.mxu1 %v7379_v29  ;;  %v7452_v27 = vld [vmem:[%s11180_s1 + $0x268] ss:$16 sps:$4 sm:$0xff]   ;;  %v7457_v28 = vld [vmem:[%s11180_s1 + $0x284] ss:$16 sps:$4 sm:$0xff]   ;;  %v7460_v29 = vld [vmem:[%s11180_s1 + $0x28c] ss:$16 sps:$4 sm:$0xff]  }
  0x1d   :  { %v7469_v36 = vld [vmem:[%s11180_s1 + $0x2c4] ss:$16 sps:$4 sm:$0xff]   ;;  %v7472_v37 = vld [vmem:[%s11180_s1 + $0x2cc] ss:$16 sps:$4 sm:$0xff]   ;;  %v7467_v38 = vld [vmem:[%s11180_s1 + $0x2c0] ss:$16 sps:$4 sm:$0xff]  }
  0x1e   :  { %v7473_v43 = vld [vmem:[%s11180_s1 + $0x2e0] ss:$16 sps:$4 sm:$0xff]   ;;  %v7488_v54 = vld [vmem:[%s11180_s1 + $0x328] ss:$16 sps:$4 sm:$0xff]   ;;  %v7502_v60 = vld [vmem:[%s11180_s1 + $0x36c] ss:$16 sps:$4 sm:$0xff]  }
  0x1f   :  { %4961 = vmatpush1.bf16.msra.mxu0 %v7381_v30  ;;  %5494 = vmatpush1.bf16.msra.mxu1 %v7382_v31  ;;  %v7455_v30 = vld [vmem:[%s11180_s1 + $0x280] ss:$16 sps:$4 sm:$0xff]   ;;  %v7458_v31 = vld [vmem:[%s11180_s1 + $0x288] ss:$16 sps:$4 sm:$0xff]  }
  0x20   :  { %4962 = vmatprep.subr.bf16.mxu0 %v7383_v32  ;;  %5495 = vmatprep.subr.bf16.mxu1 %v7385_v33  ;;  %v7463_v32 = vld [vmem:[%s11180_s1 + $0x2a4] ss:$16 sps:$4 sm:$0xff]   ;;  %v7466_v33 = vld [vmem:[%s11180_s1 + $0x2ac] ss:$16 sps:$4 sm:$0xff]   ;;  %v7494_v58 = vld [vmem:[%s11180_s1 + $0x348] ss:$16 sps:$4 sm:$0xff]  }
  0x23   :  { %4963 = vmatpush1.bf16.msra.mxu0 %v7387_v34  ;;  %5496 = vmatpush1.bf16.msra.mxu1 %v7388_v35  ;;  %v7461_v34 = vld [vmem:[%s11180_s1 + $0x2a0] ss:$16 sps:$4 sm:$0xff]   ;;  %v7464_v35 = vld [vmem:[%s11180_s1 + $0x2a8] ss:$16 sps:$4 sm:$0xff]  }
  0x24   :  { %4964 = vmatprep.subr.bf16.mxu0 %v7389_v39  ;;  %5497 = vmatprep.subr.bf16.mxu1 %v7391_v40  ;;  %v7470_v39 = vld [vmem:[%s11180_s1 + $0x2c8] ss:$16 sps:$4 sm:$0xff]   ;;  %v7475_v40 = vld [vmem:[%s11180_s1 + $0x2e4] ss:$16 sps:$4 sm:$0xff]  }
  0x27   :  { %4965 = vmatpush1.bf16.msra.mxu0 %v7393_v41  ;;  %5498 = vmatpush1.bf16.msra.mxu1 %v7394_v44  ;;  %v7478_v41 = vld [vmem:[%s11180_s1 + $0x2ec] ss:$16 sps:$4 sm:$0xff]   ;;  %v7476_v44 = vld [vmem:[%s11180_s1 + $0x2e8] ss:$16 sps:$4 sm:$0xff]  }
  0x28   :  { %4966 = vmatprep.subr.bf16.mxu0 %v7395_v45  ;;  %5499 = vmatprep.subr.bf16.mxu1 %v7397_v46  ;;  %v7481_v45 = vld [vmem:[%s11180_s1 + $0x304] ss:$16 sps:$4 sm:$0xff]   ;;  %v7484_v46 = vld [vmem:[%s11180_s1 + $0x30c] ss:$16 sps:$4 sm:$0xff]  }
  0x2b   :  { %4967 = vmatpush1.bf16.msra.mxu0 %v7399_v47  ;;  %5500 = vmatpush1.bf16.msra.mxu1 %v7400_v48  ;;  %v7479_v47 = vld [vmem:[%s11180_s1 + $0x300] ss:$16 sps:$4 sm:$0xff]   ;;  %v7482_v48 = vld [vmem:[%s11180_s1 + $0x308] ss:$16 sps:$4 sm:$0xff]  }
  0x2c   :  { %4968 = vmatprep.subr.bf16.mxu0 %v7401_v50  ;;  %5501 = vmatprep.subr.bf16.mxu1 %v7403_v51  ;;  %v7487_v50 = vld [vmem:[%s11180_s1 + $0x324] ss:$16 sps:$4 sm:$0xff]   ;;  %v7490_v51 = vld [vmem:[%s11180_s1 + $0x32c] ss:$16 sps:$4 sm:$0xff]  }
  0x2f   :  { %4969 = vmatpush1.bf16.msra.mxu0 %v7405_v53  ;;  %5502 = vmatpush1.bf16.msra.mxu1 %v7406_v55  ;;  %v7485_v53 = vld [vmem:[%s11180_s1 + $0x320] ss:$16 sps:$4 sm:$0xff]   ;;  %v7493_v55 = vld [vmem:[%s11180_s1 + $0x344] ss:$16 sps:$4 sm:$0xff]  }
  0x30   :  { %4970 = vmatprep.subr.bf16.mxu0 %v7407_v56  ;;  %5503 = vmatprep.subr.bf16.mxu1 %v7409_v57  ;;  %v7496_v56 = vld [vmem:[%s11180_s1 + $0x34c] ss:$16 sps:$4 sm:$0xff]   ;;  %v7491_v57 = vld [vmem:[%s11180_s1 + $0x340] ss:$16 sps:$4 sm:$0xff]  }
  0x33   :  { %4971 = vmatpush1.bf16.msra.mxu0 %v7411_v59  ;;  %5504 = vmatpush1.bf16.msra.mxu1 %v7412_v61  ;;  %v7499_v59 = vld [vmem:[%s11180_s1 + $0x364] ss:$16 sps:$4 sm:$0xff]   ;;  %v7497_v61 = vld [vmem:[%s11180_s1 + $0x360] ss:$16 sps:$4 sm:$0xff]  }
  0x34   :  { %4972 = vmatprep.subr.bf16.mxu0 %v7413_v62  ;;  %5505 = vmatprep.subr.bf16.mxu1 %v7415_v63  ;;  %v7500_v62 = vld [vmem:[%s11180_s1 + $0x368] ss:$16 sps:$4 sm:$0xff]   ;;  %v7505_v63 = vld [vmem:[%s11180_s1 + $0x384] ss:$16 sps:$4 sm:$0xff]  }
  0x37   :  { %4973 = vmatpush1.bf16.msra.mxu0 %v7417_v0  ;;  %5506 = vmatpush1.bf16.msra.mxu1 %v7418_v1  ;;  %v7508_v0 = vld [vmem:[%s11180_s1 + $0x38c] ss:$16 sps:$4 sm:$0xff]   ;;  %v7503_v1 = vld [vmem:[%s11180_s1 + $0x380] ss:$16 sps:$4 sm:$0xff]  }
  0x38   :  { %4974 = vmatprep.subr.bf16.mxu0 %v7419_v2  ;;  %5507 = vmatprep.subr.bf16.mxu1 %v7421_v3  ;;  %v7506_v2 = vld [vmem:[%s11180_s1 + $0x388] ss:$16 sps:$4 sm:$0xff]   ;;  %v7511_v3 = vld [vmem:[%s11180_s1 + $0x3a4] ss:$16 sps:$4 sm:$0xff]  }
  0x3b   :  { %4975 = vmatpush1.bf16.msra.mxu0 %v7423_v4  ;;  %5508 = vmatpush1.bf16.msra.mxu1 %v7424_v5  ;;  %v7514_v4 = vld [vmem:[%s11180_s1 + $0x3ac] ss:$16 sps:$4 sm:$0xff]   ;;  %v7509_v5 = vld [vmem:[%s11180_s1 + $0x3a0] ss:$16 sps:$4 sm:$0xff]  }
  0x3c   :  { %4976 = vmatprep.subr.bf16.mxu0 %v7425_v6  ;;  %5509 = vmatprep.subr.bf16.mxu1 %v7427_v7  ;;  %v7512_v6 = vld [vmem:[%s11180_s1 + $0x3a8] ss:$16 sps:$4 sm:$0xff]   ;;  %v7517_v7 = vld [vmem:[%s11180_s1 + $0x3c4] ss:$16 sps:$4 sm:$0xff]  }
  0x3f   :  { %4977 = vmatpush1.bf16.msra.mxu0 %v7429_v8  ;;  %5510 = vmatpush1.bf16.msra.mxu1 %v7430_v9  ;;  %v7520_v8 = vld [vmem:[%s11180_s1 + $0x3cc] ss:$16 sps:$4 sm:$0xff]   ;;  %v837_v9 = vcombine.high %v8726_v52, %v8726_v52 }
  0x40   :  { %4987 = vmatprep.subr.bf16.mxu0 %v7433_v10  ;;  %5520 = vmatprep.subr.bf16.mxu1 %v7436_v11  ;;  %v7515_v10 = vld [vmem:[%s11180_s1 + $0x3c0] ss:$16 sps:$4 sm:$0xff]   ;;  %v7518_v11 = vld [vmem:[%s11180_s1 + $0x3c8] ss:$16 sps:$4 sm:$0xff]   ;;  %v7526_v52 = vld [vmem:[%s11180_s1 + $0x3ec] ss:$16 sps:$4 sm:$0xff]  }
  0x42   :  { %4979 = vmatmul.mubr.bf16.vlgmr.msra.gmra.mrb[0].mxu0 %v8795_v13  ;;  %5512 = vmatmul.mubr.bf16.vlgmr.msra.gmra.mrb[0].mxu1 %v8795_v13 }
  0x43   :  { %4988 = vmatpush1.bf16.msra.mxu0 %v7431_v12  ;;  %5521 = vmatpush1.bf16.msra.mxu1 %v7434_v14  ;;  %v7523_v12 = vld [vmem:[%s11180_s1 + $0x3e4] ss:$16 sps:$4 sm:$0xff]   ;;  %v8979_v14 = vrot.slane %v837_v9, %v8715_v49  ;;  %v7602_v9 = vld [vmem:[%s11180_s1 + $0x588] ss:$16 sps:$4 sm:$0xff]  }
  0x44   :  { %4989 = vmatprep.subr.bf16.mxu0 %v7439_v15  ;;  %5522 = vmatprep.subr.bf16.mxu1 %v7442_v16  ;;  %v7521_v15 = vld [vmem:[%s11180_s1 + $0x3e0] ss:$16 sps:$4 sm:$0xff]   ;;  %v7524_v16 = vld [vmem:[%s11180_s1 + $0x3e8] ss:$16 sps:$4 sm:$0xff]  }
  0x45   :  { %5019 = vmatprep.mubr.bf16.mxu0 %v884_v17  ;;  %5552 = vmatprep.mubr.bf16.mxu1 %v884_v17  ;;  %v7529_v17 = vld [vmem:[%s11180_s1 + $0x404] ss:$16 sps:$4 sm:$0xff]  }
  0x47   :  { %4990 = vmatpush1.bf16.msra.mxu0 %v7437_v18  ;;  %5523 = vmatpush1.bf16.msra.mxu1 %v7440_v19  ;;  %v7532_v18 = vld [vmem:[%s11180_s1 + $0x40c] ss:$16 sps:$4 sm:$0xff]   ;;  %v853_v19 = vcombine.high %v8979_v14, %v8979_v14 }
  0x48   :  { %4991 = vmatprep.subr.bf16.mxu0 %v7445_v20  ;;  %5524 = vmatprep.subr.bf16.mxu1 %v7448_v21  ;;  %v7527_v20 = vld [vmem:[%s11180_s1 + $0x400] ss:$16 sps:$4 sm:$0xff]   ;;  %v882_v21 = vcombine.high %v8795_v13, %v8795_v13 }
  0x49   :  { %v7533_v13 = vld [vmem:[%s11180_s1 + $0x420] ss:$16 sps:$4 sm:$0xff]  }
  0x4b   :  { %4992 = vmatpush1.bf16.msra.mxu0 %v7443_v22  ;;  %5525 = vmatpush1.bf16.msra.mxu1 %v7446_v23  ;;  %v7530_v22 = vld [vmem:[%s11180_s1 + $0x408] ss:$16 sps:$4 sm:$0xff]   ;;  %v7535_v23 = vld [vmem:[%s11180_s1 + $0x424] ss:$16 sps:$4 sm:$0xff]  }
  0x4c   :  { %4993 = vmatprep.subr.bf16.mxu0 %v7451_v24  ;;  %5526 = vmatprep.subr.bf16.mxu1 %v7454_v25  ;;  %v7538_v24 = vld [vmem:[%s11180_s1 + $0x42c] ss:$16 sps:$4 sm:$0xff]   ;;  %v9010_v25 = vrot.slane %v853_v19, %v8715_v49  ;;  %v7619_v19 = vld [vmem:[%s11180_s1 + $0x5e4] ss:$16 sps:$4 sm:$0xff]  }
  0x4f   :  { %4994 = vmatpush1.bf16.msra.mxu0 %v7449_v26  ;;  %5527 = vmatpush1.bf16.msra.mxu1 %v7452_v27  ;;  %v7536_v26 = vld [vmem:[%s11180_s1 + $0x428] ss:$16 sps:$4 sm:$0xff]   ;;  %v7541_v27 = vld [vmem:[%s11180_s1 + $0x444] ss:$16 sps:$4 sm:$0xff]  }
  0x50   :  { %4995 = vmatprep.subr.bf16.mxu0 %v7457_v28  ;;  %5528 = vmatprep.subr.bf16.mxu1 %v7460_v29  ;;  %v7544_v28 = vld [vmem:[%s11180_s1 + $0x44c] ss:$16 sps:$4 sm:$0xff]   ;;  %v7539_v29 = vld [vmem:[%s11180_s1 + $0x440] ss:$16 sps:$4 sm:$0xff]  }
  0x53   :  { %4996 = vmatpush1.bf16.msra.mxu0 %v7455_v30  ;;  %5529 = vmatpush1.bf16.msra.mxu1 %v7458_v31  ;;  %v7542_v30 = vld [vmem:[%s11180_s1 + $0x448] ss:$16 sps:$4 sm:$0xff]   ;;  %v7547_v31 = vld [vmem:[%s11180_s1 + $0x464] ss:$16 sps:$4 sm:$0xff]  }
  0x54   :  { %4997 = vmatprep.subr.bf16.mxu0 %v7463_v32  ;;  %5530 = vmatprep.subr.bf16.mxu1 %v7466_v33  ;;  %v7550_v32 = vld [vmem:[%s11180_s1 + $0x46c] ss:$16 sps:$4 sm:$0xff]   ;;  %v7545_v33 = vld [vmem:[%s11180_s1 + $0x460] ss:$16 sps:$4 sm:$0xff]  }
  0x57   :  { %4998 = vmatpush1.bf16.msra.mxu0 %v7461_v34  ;;  %5531 = vmatpush1.bf16.msra.mxu1 %v7464_v35  ;;  %v7548_v34 = vld [vmem:[%s11180_s1 + $0x468] ss:$16 sps:$4 sm:$0xff]   ;;  %v7553_v35 = vld [vmem:[%s11180_s1 + $0x484] ss:$16 sps:$4 sm:$0xff]  }
  0x58   :  { %4999 = vmatprep.subr.bf16.mxu0 %v7469_v36  ;;  %5532 = vmatprep.subr.bf16.mxu1 %v7472_v37  ;;  %v7556_v36 = vld [vmem:[%s11180_s1 + $0x48c] ss:$16 sps:$4 sm:$0xff]   ;;  %v7551_v37 = vld [vmem:[%s11180_s1 + $0x480] ss:$16 sps:$4 sm:$0xff]  }
  0x5b   :  { %5000 = vmatpush1.bf16.msra.mxu0 %v7467_v38  ;;  %5533 = vmatpush1.bf16.msra.mxu1 %v7470_v39  ;;  %v7554_v38 = vld [vmem:[%s11180_s1 + $0x488] ss:$16 sps:$4 sm:$0xff]   ;;  %v7559_v39 = vld [vmem:[%s11180_s1 + $0x4a4] ss:$16 sps:$4 sm:$0xff]  }
  0x5c   :  { %5001 = vmatprep.subr.bf16.mxu0 %v7475_v40  ;;  %5534 = vmatprep.subr.bf16.mxu1 %v7478_v41  ;;  %v7562_v40 = vld [vmem:[%s11180_s1 + $0x4ac] ss:$16 sps:$4 sm:$0xff]   ;;  %v7557_v41 = vld [vmem:[%s11180_s1 + $0x4a0] ss:$16 sps:$4 sm:$0xff]  }
  0x5f   :  { %5002 = vmatpush1.bf16.msra.mxu0 %v7473_v43  ;;  %5535 = vmatpush1.bf16.msra.mxu1 %v7476_v44  ;;  %v7560_v43 = vld [vmem:[%s11180_s1 + $0x4a8] ss:$16 sps:$4 sm:$0xff]   ;;  %v7565_v44 = vld [vmem:[%s11180_s1 + $0x4c4] ss:$16 sps:$4 sm:$0xff]  }
  0x60   :  { %5003 = vmatprep.subr.bf16.mxu0 %v7481_v45  ;;  %5536 = vmatprep.subr.bf16.mxu1 %v7484_v46  ;;  %v7568_v45 = vld [vmem:[%s11180_s1 + $0x4cc] ss:$16 sps:$4 sm:$0xff]   ;;  %v7563_v46 = vld [vmem:[%s11180_s1 + $0x4c0] ss:$16 sps:$4 sm:$0xff]  }
  0x63   :  { %5004 = vmatpush1.bf16.msra.mxu0 %v7479_v47  ;;  %5537 = vmatpush1.bf16.msra.mxu1 %v7482_v48  ;;  %v7566_v47 = vld [vmem:[%s11180_s1 + $0x4c8] ss:$16 sps:$4 sm:$0xff]   ;;  %v7571_v48 = vld [vmem:[%s11180_s1 + $0x4e4] ss:$16 sps:$4 sm:$0xff]  }
  0x64   :  { %5005 = vmatprep.subr.bf16.mxu0 %v7487_v50  ;;  %5538 = vmatprep.subr.bf16.mxu1 %v7490_v51  ;;  %v7574_v50 = vld [vmem:[%s11180_s1 + $0x4ec] ss:$16 sps:$4 sm:$0xff]   ;;  %v7569_v51 = vld [vmem:[%s11180_s1 + $0x4e0] ss:$16 sps:$4 sm:$0xff]  }
  0x67   :  { %5006 = vmatpush1.bf16.msra.mxu0 %v7485_v53  ;;  %5539 = vmatpush1.bf16.msra.mxu1 %v7488_v54  ;;  %v7572_v53 = vld [vmem:[%s11180_s1 + $0x4e8] ss:$16 sps:$4 sm:$0xff]   ;;  %v7577_v54 = vld [vmem:[%s11180_s1 + $0x504] ss:$16 sps:$4 sm:$0xff]  }
  0x68   :  { %5007 = vmatprep.subr.bf16.mxu0 %v7493_v55  ;;  %5540 = vmatprep.subr.bf16.mxu1 %v7496_v56  ;;  %v7580_v55 = vld [vmem:[%s11180_s1 + $0x50c] ss:$16 sps:$4 sm:$0xff]   ;;  %v7575_v56 = vld [vmem:[%s11180_s1 + $0x500] ss:$16 sps:$4 sm:$0xff]  }
  0x6b   :  { %5008 = vmatpush1.bf16.msra.mxu0 %v7491_v57  ;;  %5541 = vmatpush1.bf16.msra.mxu1 %v7494_v58  ;;  %v7578_v57 = vld [vmem:[%s11180_s1 + $0x508] ss:$16 sps:$4 sm:$0xff]   ;;  %v7583_v58 = vld [vmem:[%s11180_s1 + $0x524] ss:$16 sps:$4 sm:$0xff]  }
  0x6c   :  { %5009 = vmatprep.subr.bf16.mxu0 %v7499_v59  ;;  %5542 = vmatprep.subr.bf16.mxu1 %v7502_v60  ;;  %v7586_v59 = vld [vmem:[%s11180_s1 + $0x52c] ss:$16 sps:$4 sm:$0xff]   ;;  %v7581_v60 = vld [vmem:[%s11180_s1 + $0x520] ss:$16 sps:$4 sm:$0xff]  }
  0x6f   :  { %5010 = vmatpush1.bf16.msra.mxu0 %v7497_v61  ;;  %5543 = vmatpush1.bf16.msra.mxu1 %v7500_v62  ;;  %v7584_v61 = vld [vmem:[%s11180_s1 + $0x528] ss:$16 sps:$4 sm:$0xff]   ;;  %v7589_v62 = vld [vmem:[%s11180_s1 + $0x544] ss:$16 sps:$4 sm:$0xff]  }
  0x70   :  { %5011 = vmatprep.subr.bf16.mxu0 %v7505_v63  ;;  %5544 = vmatprep.subr.bf16.mxu1 %v7508_v0  ;;  %v7592_v63 = vld [vmem:[%s11180_s1 + $0x54c] ss:$16 sps:$4 sm:$0xff]   ;;  %v7587_v0 = vld [vmem:[%s11180_s1 + $0x540] ss:$16 sps:$4 sm:$0xff]  }
  0x73   :  { %5012 = vmatpush1.bf16.msra.mxu0 %v7503_v1  ;;  %5545 = vmatpush1.bf16.msra.mxu1 %v7506_v2  ;;  %v7590_v1 = vld [vmem:[%s11180_s1 + $0x548] ss:$16 sps:$4 sm:$0xff]   ;;  %v7595_v2 = vld [vmem:[%s11180_s1 + $0x564] ss:$16 sps:$4 sm:$0xff]  }
  0x74   :  { %5013 = vmatprep.subr.bf16.mxu0 %v7511_v3  ;;  %5546 = vmatprep.subr.bf16.mxu1 %v7514_v4  ;;  %v7598_v3 = vld [vmem:[%s11180_s1 + $0x56c] ss:$16 sps:$4 sm:$0xff]   ;;  %v7593_v4 = vld [vmem:[%s11180_s1 + $0x560] ss:$16 sps:$4 sm:$0xff]  }
  0x77   :  { %5014 = vmatpush1.bf16.msra.mxu0 %v7509_v5  ;;  %5547 = vmatpush1.bf16.msra.mxu1 %v7512_v6  ;;  %v7596_v5 = vld [vmem:[%s11180_s1 + $0x568] ss:$16 sps:$4 sm:$0xff]   ;;  %v7601_v6 = vld [vmem:[%s11180_s1 + $0x584] ss:$16 sps:$4 sm:$0xff]  }
  0x78   :  { %5015 = vmatprep.subr.bf16.mxu0 %v7517_v7  ;;  %5548 = vmatprep.subr.bf16.mxu1 %v7520_v8  ;;  %v7604_v7 = vld [vmem:[%s11180_s1 + $0x58c] ss:$16 sps:$4 sm:$0xff]   ;;  %v7599_v8 = vld [vmem:[%s11180_s1 + $0x580] ss:$16 sps:$4 sm:$0xff]  }
  0x7b   :  { %5016 = vmatpush1.bf16.msra.mxu0 %v7515_v10  ;;  %5549 = vmatpush1.bf16.msra.mxu1 %v7518_v11  ;;  %v7607_v10 = vld [vmem:[%s11180_s1 + $0x5a4] ss:$16 sps:$4 sm:$0xff]   ;;  %v7610_v11 = vld [vmem:[%s11180_s1 + $0x5ac] ss:$16 sps:$4 sm:$0xff]  }
  0x7c   :  { %5017 = vmatprep.subr.bf16.mxu0 %v7523_v12  ;;  %5550 = vmatprep.subr.bf16.mxu1 %v7526_v52  ;;  %v7605_v12 = vld [vmem:[%s11180_s1 + $0x5a0] ss:$16 sps:$4 sm:$0xff]   ;;  %v7608_v52 = vld [vmem:[%s11180_s1 + $0x5a8] ss:$16 sps:$4 sm:$0xff]  }
  0x7f   :  { %5018 = vmatpush1.bf16.msra.mxu0 %v7521_v15  ;;  %5551 = vmatpush1.bf16.msra.mxu1 %v7524_v16  ;;  %v7613_v15 = vld [vmem:[%s11180_s1 + $0x5c4] ss:$16 sps:$4 sm:$0xff]   ;;  %v7616_v16 = vld [vmem:[%s11180_s1 + $0x5cc] ss:$16 sps:$4 sm:$0xff]  }
  0x80   :  { %5028 = vmatprep.subr.bf16.mxu0 %v7529_v17  ;;  %5561 = vmatprep.subr.bf16.mxu1 %v7532_v18  ;;  %v7611_v17 = vld [vmem:[%s11180_s1 + $0x5c0] ss:$16 sps:$4 sm:$0xff]   ;;  %v7614_v18 = vld [vmem:[%s11180_s1 + $0x5c8] ss:$16 sps:$4 sm:$0xff]  }
  0x82   :  { %5020 = vmatmul.mubr.bf16.vlgmr.msra.gmra.mrb[0].mxu0 %v882_v21  ;;  %5553 = vmatmul.mubr.bf16.vlgmr.msra.gmra.mrb[0].mxu1 %v882_v21  ;;  %v7617_v21 = vld [vmem:[%s11180_s1 + $0x5e0] ss:$16 sps:$4 sm:$0xff]  }
  0x83   :  { %5029 = vmatpush1.bf16.msra.mxu0 %v7527_v20  ;;  %5562 = vmatpush1.bf16.msra.mxu1 %v7530_v22  ;;  %v7622_v20 = vld [vmem:[%s11180_s1 + $0x5ec] ss:$16 sps:$4 sm:$0xff]   ;;  %v7620_v22 = vld [vmem:[%s11180_s1 + $0x5e8] ss:$16 sps:$4 sm:$0xff]  }
  0x84   :  { %5030 = vmatprep.subr.bf16.mxu0 %v7535_v23  ;;  %5563 = vmatprep.subr.bf16.mxu1 %v7538_v24  ;;  %v7626_v23 = vld [vmem:[%s11180_s1 + $0x604] ss:$16 sps:$4 sm:$0xff]   ;;  %v7629_v24 = vld [vmem:[%s11180_s1 + $0x60c] ss:$16 sps:$4 sm:$0xff]  }
  0x85   :  { %5060 = vmatprep.mubr.bf16.mxu0 %v9010_v25  ;;  %5593 = vmatprep.mubr.bf16.mxu1 %v9010_v25 }
  0x87   :  { %5031 = vmatpush1.bf16.msra.mxu0 %v7533_v13  ;;  %5564 = vmatpush1.bf16.msra.mxu1 %v7536_v26  ;;  %v7624_v13 = vld [vmem:[%s11180_s1 + $0x600] ss:$16 sps:$4 sm:$0xff]   ;;  %v9199_v26 = vrot.slane %v8979_v14, %v8715_v49  ;;  %v885_v14 = vcombine.high %v9010_v25, %v9010_v25  ;;  %v7638_v25 = vld [vmem:[%s11180_s1 + $0x644] ss:$16 sps:$4 sm:$0xff]  }
  0x88   :  { %5032 = vmatprep.subr.bf16.mxu0 %v7541_v27  ;;  %5565 = vmatprep.subr.bf16.mxu1 %v7544_v28  ;;  %v7627_v27 = vld [vmem:[%s11180_s1 + $0x608] ss:$16 sps:$4 sm:$0xff]   ;;  %v7632_v28 = vld [vmem:[%s11180_s1 + $0x624] ss:$16 sps:$4 sm:$0xff]  }
  0x8b   :  { %5033 = vmatpush1.bf16.msra.mxu0 %v7539_v29  ;;  %5566 = vmatpush1.bf16.msra.mxu1 %v7542_v30  ;;  %v7635_v29 = vld [vmem:[%s11180_s1 + $0x62c] ss:$16 sps:$4 sm:$0xff]   ;;  %v7630_v30 = vld [vmem:[%s11180_s1 + $0x620] ss:$16 sps:$4 sm:$0xff]  }
  0x8c   :  { %5034 = vmatprep.subr.bf16.mxu0 %v7547_v31  ;;  %5567 = vmatprep.subr.bf16.mxu1 %v7550_v32  ;;  %v7633_v31 = vld [vmem:[%s11180_s1 + $0x628] ss:$16 sps:$4 sm:$0xff]   ;;  %v7641_v32 = vld [vmem:[%s11180_s1 + $0x64c] ss:$16 sps:$4 sm:$0xff]  }
  0x8f   :  { %5035 = vmatpush1.bf16.msra.mxu0 %v7545_v33  ;;  %5568 = vmatpush1.bf16.msra.mxu1 %v7548_v34  ;;  %v7636_v33 = vld [vmem:[%s11180_s1 + $0x640] ss:$16 sps:$4 sm:$0xff]   ;;  %v7639_v34 = vld [vmem:[%s11180_s1 + $0x648] ss:$16 sps:$4 sm:$0xff]  }
  0x90   :  { %5036 = vmatprep.subr.bf16.mxu0 %v7553_v35  ;;  %5569 = vmatprep.subr.bf16.mxu1 %v7556_v36  ;;  %v7644_v35 = vld [vmem:[%s11180_s1 + $0x664] ss:$16 sps:$4 sm:$0xff]   ;;  %v7647_v36 = vld [vmem:[%s11180_s1 + $0x66c] ss:$16 sps:$4 sm:$0xff]  }
  0x93   :  { %5037 = vmatpush1.bf16.msra.mxu0 %v7551_v37  ;;  %5570 = vmatpush1.bf16.msra.mxu1 %v7554_v38  ;;  %v7642_v37 = vld [vmem:[%s11180_s1 + $0x660] ss:$16 sps:$4 sm:$0xff]   ;;  %v7645_v38 = vld [vmem:[%s11180_s1 + $0x668] ss:$16 sps:$4 sm:$0xff]  }
  0x94   :  { %5038 = vmatprep.subr.bf16.mxu0 %v7559_v39  ;;  %5571 = vmatprep.subr.bf16.mxu1 %v7562_v40  ;;  %v7650_v39 = vld [vmem:[%s11180_s1 + $0x684] ss:$16 sps:$4 sm:$0xff]   ;;  %v7653_v40 = vld [vmem:[%s11180_s1 + $0x68c] ss:$16 sps:$4 sm:$0xff]  }
  0x97   :  { %5039 = vmatpush1.bf16.msra.mxu0 %v7557_v41  ;;  %5572 = vmatpush1.bf16.msra.mxu1 %v7560_v43  ;;  %v7648_v41 = vld [vmem:[%s11180_s1 + $0x680] ss:$16 sps:$4 sm:$0xff]   ;;  %v7651_v43 = vld [vmem:[%s11180_s1 + $0x688] ss:$16 sps:$4 sm:$0xff]  }
  0x98   :  { %5040 = vmatprep.subr.bf16.mxu0 %v7565_v44  ;;  %5573 = vmatprep.subr.bf16.mxu1 %v7568_v45  ;;  %v7656_v44 = vld [vmem:[%s11180_s1 + $0x6a4] ss:$16 sps:$4 sm:$0xff]   ;;  %v7659_v45 = vld [vmem:[%s11180_s1 + $0x6ac] ss:$16 sps:$4 sm:$0xff]  }
  0x9b   :  { %5041 = vmatpush1.bf16.msra.mxu0 %v7563_v46  ;;  %5574 = vmatpush1.bf16.msra.mxu1 %v7566_v47  ;;  %v7654_v46 = vld [vmem:[%s11180_s1 + $0x6a0] ss:$16 sps:$4 sm:$0xff]   ;;  %v7657_v47 = vld [vmem:[%s11180_s1 + $0x6a8] ss:$16 sps:$4 sm:$0xff]  }
  0x9c   :  { %5042 = vmatprep.subr.bf16.mxu0 %v7571_v48  ;;  %5575 = vmatprep.subr.bf16.mxu1 %v7574_v50  ;;  %v7662_v48 = vld [vmem:[%s11180_s1 + $0x6c4] ss:$16 sps:$4 sm:$0xff]   ;;  %v7665_v50 = vld [vmem:[%s11180_s1 + $0x6cc] ss:$16 sps:$4 sm:$0xff]  }
  0x9f   :  { %5043 = vmatpush1.bf16.msra.mxu0 %v7569_v51  ;;  %5576 = vmatpush1.bf16.msra.mxu1 %v7572_v53  ;;  %v7660_v51 = vld [vmem:[%s11180_s1 + $0x6c0] ss:$16 sps:$4 sm:$0xff]   ;;  %v7663_v53 = vld [vmem:[%s11180_s1 + $0x6c8] ss:$16 sps:$4 sm:$0xff]  }
  0xa0   :  { %5044 = vmatprep.subr.bf16.mxu0 %v7577_v54  ;;  %5577 = vmatprep.subr.bf16.mxu1 %v7580_v55  ;;  %v7668_v54 = vld [vmem:[%s11180_s1 + $0x6e4] ss:$16 sps:$4 sm:$0xff]   ;;  %v7671_v55 = vld [vmem:[%s11180_s1 + $0x6ec] ss:$16 sps:$4 sm:$0xff]  }
  0xa3   :  { %5045 = vmatpush1.bf16.msra.mxu0 %v7575_v56  ;;  %5578 = vmatpush1.bf16.msra.mxu1 %v7578_v57  ;;  %v7666_v56 = vld [vmem:[%s11180_s1 + $0x6e0] ss:$16 sps:$4 sm:$0xff]   ;;  %v7669_v57 = vld [vmem:[%s11180_s1 + $0x6e8] ss:$16 sps:$4 sm:$0xff]  }
  0xa4   :  { %5046 = vmatprep.subr.bf16.mxu0 %v7583_v58  ;;  %5579 = vmatprep.subr.bf16.mxu1 %v7586_v59  ;;  %v7674_v58 = vld [vmem:[%s11180_s1 + $0x704] ss:$16 sps:$4 sm:$0xff]   ;;  %v7677_v59 = vld [vmem:[%s11180_s1 + $0x70c] ss:$16 sps:$4 sm:$0xff]  }
  0xa7   :  { %5047 = vmatpush1.bf16.msra.mxu0 %v7581_v60  ;;  %5580 = vmatpush1.bf16.msra.mxu1 %v7584_v61  ;;  %v7672_v60 = vld [vmem:[%s11180_s1 + $0x700] ss:$16 sps:$4 sm:$0xff]   ;;  %v7675_v61 = vld [vmem:[%s11180_s1 + $0x708] ss:$16 sps:$4 sm:$0xff]  }
  0xa8   :  { %5048 = vmatprep.subr.bf16.mxu0 %v7589_v62  ;;  %5581 = vmatprep.subr.bf16.mxu1 %v7592_v63  ;;  %v7680_v62 = vld [vmem:[%s11180_s1 + $0x724] ss:$16 sps:$4 sm:$0xff]   ;;  %v7683_v63 = vld [vmem:[%s11180_s1 + $0x72c] ss:$16 sps:$4 sm:$0xff]  }
  0xab   :  { %5049 = vmatpush1.bf16.msra.mxu0 %v7587_v0  ;;  %5582 = vmatpush1.bf16.msra.mxu1 %v7590_v1  ;;  %v7678_v0 = vld [vmem:[%s11180_s1 + $0x720] ss:$16 sps:$4 sm:$0xff]   ;;  %v7681_v1 = vld [vmem:[%s11180_s1 + $0x728] ss:$16 sps:$4 sm:$0xff]  }
  0xac   :  { %5050 = vmatprep.subr.bf16.mxu0 %v7595_v2  ;;  %5583 = vmatprep.subr.bf16.mxu1 %v7598_v3  ;;  %v7686_v2 = vld [vmem:[%s11180_s1 + $0x744] ss:$16 sps:$4 sm:$0xff]   ;;  %v7689_v3 = vld [vmem:[%s11180_s1 + $0x74c] ss:$16 sps:$4 sm:$0xff]  }
  0xaf   :  { %5051 = vmatpush1.bf16.msra.mxu0 %v7593_v4  ;;  %5584 = vmatpush1.bf16.msra.mxu1 %v7596_v5  ;;  %v7684_v4 = vld [vmem:[%s11180_s1 + $0x740] ss:$16 sps:$4 sm:$0xff]   ;;  %v7687_v5 = vld [vmem:[%s11180_s1 + $0x748] ss:$16 sps:$4 sm:$0xff]  }
  0xb0   :  { %5052 = vmatprep.subr.bf16.mxu0 %v7601_v6  ;;  %5585 = vmatprep.subr.bf16.mxu1 %v7604_v7  ;;  %v7692_v6 = vld [vmem:[%s11180_s1 + $0x764] ss:$16 sps:$4 sm:$0xff]   ;;  %v7695_v7 = vld [vmem:[%s11180_s1 + $0x76c] ss:$16 sps:$4 sm:$0xff]  }
  0xb3   :  { %5053 = vmatpush1.bf16.msra.mxu0 %v7599_v8  ;;  %5586 = vmatpush1.bf16.msra.mxu1 %v7602_v9  ;;  %v7690_v8 = vld [vmem:[%s11180_s1 + $0x760] ss:$16 sps:$4 sm:$0xff]   ;;  %v7693_v9 = vld [vmem:[%s11180_s1 + $0x768] ss:$16 sps:$4 sm:$0xff]  }
  0xb4   :  { %5054 = vmatprep.subr.bf16.mxu0 %v7607_v10  ;;  %5587 = vmatprep.subr.bf16.mxu1 %v7610_v11  ;;  %v7698_v10 = vld [vmem:[%s11180_s1 + $0x784] ss:$16 sps:$4 sm:$0xff]   ;;  %v7701_v11 = vld [vmem:[%s11180_s1 + $0x78c] ss:$16 sps:$4 sm:$0xff]  }
  0xb7   :  { %5055 = vmatpush1.bf16.msra.mxu0 %v7605_v12  ;;  %5588 = vmatpush1.bf16.msra.mxu1 %v7608_v52  ;;  %v7696_v12 = vld [vmem:[%s11180_s1 + $0x780] ss:$16 sps:$4 sm:$0xff]   ;;  %v7699_v52 = vld [vmem:[%s11180_s1 + $0x788] ss:$16 sps:$4 sm:$0xff]  }
  0xb8   :  { %5056 = vmatprep.subr.bf16.mxu0 %v7613_v15  ;;  %5589 = vmatprep.subr.bf16.mxu1 %v7616_v16  ;;  %v7704_v15 = vld [vmem:[%s11180_s1 + $0x7a4] ss:$16 sps:$4 sm:$0xff]   ;;  %v7707_v16 = vld [vmem:[%s11180_s1 + $0x7ac] ss:$16 sps:$4 sm:$0xff]  }
  0xbb   :  { %5057 = vmatpush1.bf16.msra.mxu0 %v7611_v17  ;;  %5590 = vmatpush1.bf16.msra.mxu1 %v7614_v18  ;;  %v7702_v17 = vld [vmem:[%s11180_s1 + $0x7a0] ss:$16 sps:$4 sm:$0xff]   ;;  %v7705_v18 = vld [vmem:[%s11180_s1 + $0x7a8] ss:$16 sps:$4 sm:$0xff]  }
  0xbc   :  { %5058 = vmatprep.subr.bf16.mxu0 %v7619_v19  ;;  %5591 = vmatprep.subr.bf16.mxu1 %v7622_v20  ;;  %v7710_v19 = vld [vmem:[%s11180_s1 + $0x7c4] ss:$16 sps:$4 sm:$0xff]   ;;  %v7713_v20 = vld [vmem:[%s11180_s1 + $0x7cc] ss:$16 sps:$4 sm:$0xff]  }
  0xbf   :  { %5059 = vmatpush1.bf16.msra.mxu0 %v7617_v21  ;;  %5592 = vmatpush1.bf16.msra.mxu1 %v7620_v22  ;;  %v9373_v21 = vld.sshfl [vmem:[%s11181_s0 + $0x8] sm:$0xff pattern:$0x75316420]  ;;  %v7708_v22 = vld [vmem:[%s11180_s1 + $0x7c0] ss:$16 sps:$4 sm:$0xff]  }
  0xc0   :  { %5069 = vmatprep.subr.bf16.mxu0 %v7626_v23  ;;  %5602 = vmatprep.subr.bf16.mxu1 %v7629_v24  ;;  %v7711_v23 = vld [vmem:[%s11180_s1 + $0x7c8] ss:$16 sps:$4 sm:$0xff]   ;;  %v7716_v24 = vld [vmem:[%s11180_s1 + $0x7e4] ss:$16 sps:$4 sm:$0xff]  }
  0xc2   :  { %5061 = vmatmul.mubr.bf16.vlgmr.msra.gmra.mrb[0].mxu0 %v9199_v26  ;;  %5594 = vmatmul.mubr.bf16.vlgmr.msra.gmra.mrb[0].mxu1 %v9199_v26 }
  0xc3   :  { %5070 = vmatpush1.bf16.msra.mxu0 %v7624_v13  ;;  %5603 = vmatpush1.bf16.msra.mxu1 %v7627_v27  ;;  %v7719_v13 = vld [vmem:[%s11180_s1 + $0x7ec] ss:$16 sps:$4 sm:$0xff]   ;;  %v7714_v27 = vld [vmem:[%s11180_s1 + $0x7e0] ss:$16 sps:$4 sm:$0xff]  }
  0xc4   :  { %5071 = vmatprep.subr.bf16.mxu0 %v7632_v28  ;;  %5604 = vmatprep.subr.bf16.mxu1 %v7635_v29  ;;  %v7717_v28 = vld [vmem:[%s11180_s1 + $0x7e8] ss:$16 sps:$4 sm:$0xff]   ;;  %v7722_v29 = vld [vmem:[%s11180_s1 + $0x804] ss:$16 sps:$4 sm:$0xff]  }
  0xc5   :  { %5101 = vmatprep.mubr.bf16.mxu0 %v885_v14  ;;  %5634 = vmatprep.mubr.bf16.mxu1 %v885_v14  ;;  %v7725_v14 = vld [vmem:[%s11180_s1 + $0x80c] ss:$16 sps:$4 sm:$0xff]  }
  0xc7   :  { %5072 = vmatpush1.bf16.msra.mxu0 %v7630_v30  ;;  %5605 = vmatpush1.bf16.msra.mxu1 %v7633_v31  ;;  %v901_v30 = vcombine.high %v9373_v21, %v9373_v21  ;;  %v883_v31 = vcombine.high %v9199_v26, %v9199_v26  ;;  %v7731_v26 = vld [vmem:[%s11180_s1 + $0x82c] ss:$16 sps:$4 sm:$0xff]  }
  0xc8   :  { %5073 = vmatprep.subr.bf16.mxu0 %v7638_v25  ;;  %5606 = vmatprep.subr.bf16.mxu1 %v7641_v32  ;;  %v7720_v25 = vld [vmem:[%s11180_s1 + $0x800] ss:$16 sps:$4 sm:$0xff]   ;;  %v7723_v32 = vld [vmem:[%s11180_s1 + $0x808] ss:$16 sps:$4 sm:$0xff]  }
  0xcb   :  { %5074 = vmatpush1.bf16.msra.mxu0 %v7636_v33  ;;  %5607 = vmatpush1.bf16.msra.mxu1 %v7639_v34  ;;  %v7728_v33 = vld [vmem:[%s11180_s1 + $0x824] ss:$16 sps:$4 sm:$0xff]   ;;  %v9416_v34 = vrot.slane %v901_v30, %v8715_v49 }
  0xcc   :  { %5075 = vmatprep.subr.bf16.mxu0 %v7644_v35  ;;  %5608 = vmatprep.subr.bf16.mxu1 %v7647_v36  ;;  %v7726_v35 = vld [vmem:[%s11180_s1 + $0x820] ss:$16 sps:$4 sm:$0xff]   ;;  %v7729_v36 = vld [vmem:[%s11180_s1 + $0x828] ss:$16 sps:$4 sm:$0xff]   ;;  %v7812_v30 = vld [vmem:[%s11180_s1 + $0x9e4] ss:$16 sps:$4 sm:$0xff]  }
  0xcf   :  { %5076 = vmatpush1.bf16.msra.mxu0 %v7642_v37  ;;  %5609 = vmatpush1.bf16.msra.mxu1 %v7645_v38  ;;  %v7734_v37 = vld [vmem:[%s11180_s1 + $0x844] ss:$16 sps:$4 sm:$0xff]   ;;  %v7737_v38 = vld [vmem:[%s11180_s1 + $0x84c] ss:$16 sps:$4 sm:$0xff]  }
  0xd0   :  { %5077 = vmatprep.subr.bf16.mxu0 %v7650_v39  ;;  %5610 = vmatprep.subr.bf16.mxu1 %v7653_v40  ;;  %v7732_v39 = vld [vmem:[%s11180_s1 + $0x840] ss:$16 sps:$4 sm:$0xff]   ;;  %v7735_v40 = vld [vmem:[%s11180_s1 + $0x848] ss:$16 sps:$4 sm:$0xff]  }
  0xd3   :  { %5078 = vmatpush1.bf16.msra.mxu0 %v7648_v41  ;;  %5611 = vmatpush1.bf16.msra.mxu1 %v7651_v43  ;;  %v7740_v41 = vld [vmem:[%s11180_s1 + $0x864] ss:$16 sps:$4 sm:$0xff]   ;;  %v7743_v43 = vld [vmem:[%s11180_s1 + $0x86c] ss:$16 sps:$4 sm:$0xff]  }
  0xd4   :  { %5079 = vmatprep.subr.bf16.mxu0 %v7656_v44  ;;  %5612 = vmatprep.subr.bf16.mxu1 %v7659_v45  ;;  %v7738_v44 = vld [vmem:[%s11180_s1 + $0x860] ss:$16 sps:$4 sm:$0xff]   ;;  %v7741_v45 = vld [vmem:[%s11180_s1 + $0x868] ss:$16 sps:$4 sm:$0xff]  }
  0xd7   :  { %5080 = vmatpush1.bf16.msra.mxu0 %v7654_v46  ;;  %5613 = vmatpush1.bf16.msra.mxu1 %v7657_v47  ;;  %v7746_v46 = vld [vmem:[%s11180_s1 + $0x884] ss:$16 sps:$4 sm:$0xff]   ;;  %v7749_v47 = vld [vmem:[%s11180_s1 + $0x88c] ss:$16 sps:$4 sm:$0xff]  }
  0xd8   :  { %5081 = vmatprep.subr.bf16.mxu0 %v7662_v48  ;;  %5614 = vmatprep.subr.bf16.mxu1 %v7665_v50  ;;  %v7744_v48 = vld [vmem:[%s11180_s1 + $0x880] ss:$16 sps:$4 sm:$0xff]   ;;  %v7747_v50 = vld [vmem:[%s11180_s1 + $0x888] ss:$16 sps:$4 sm:$0xff]  }
  0xdb   :  { %5082 = vmatpush1.bf16.msra.mxu0 %v7660_v51  ;;  %5615 = vmatpush1.bf16.msra.mxu1 %v7663_v53  ;;  %v7752_v51 = vld [vmem:[%s11180_s1 + $0x8a4] ss:$16 sps:$4 sm:$0xff]   ;;  %v7755_v53 = vld [vmem:[%s11180_s1 + $0x8ac] ss:$16 sps:$4 sm:$0xff]  }
  0xdc   :  { %5083 = vmatprep.subr.bf16.mxu0 %v7668_v54  ;;  %5616 = vmatprep.subr.bf16.mxu1 %v7671_v55  ;;  %v7750_v54 = vld [vmem:[%s11180_s1 + $0x8a0] ss:$16 sps:$4 sm:$0xff]   ;;  %v7753_v55 = vld [vmem:[%s11180_s1 + $0x8a8] ss:$16 sps:$4 sm:$0xff]  }
  0xdf   :  { %5084 = vmatpush1.bf16.msra.mxu0 %v7666_v56  ;;  %5617 = vmatpush1.bf16.msra.mxu1 %v7669_v57  ;;  %v7758_v56 = vld [vmem:[%s11180_s1 + $0x8c4] ss:$16 sps:$4 sm:$0xff]   ;;  %v7761_v57 = vld [vmem:[%s11180_s1 + $0x8cc] ss:$16 sps:$4 sm:$0xff]  }
  0xe0   :  { %5085 = vmatprep.subr.bf16.mxu0 %v7674_v58  ;;  %5618 = vmatprep.subr.bf16.mxu1 %v7677_v59  ;;  %v7756_v58 = vld [vmem:[%s11180_s1 + $0x8c0] ss:$16 sps:$4 sm:$0xff]   ;;  %v7759_v59 = vld [vmem:[%s11180_s1 + $0x8c8] ss:$16 sps:$4 sm:$0xff]  }
  0xe3   :  { %5086 = vmatpush1.bf16.msra.mxu0 %v7672_v60  ;;  %5619 = vmatpush1.bf16.msra.mxu1 %v7675_v61  ;;  %v7764_v60 = vld [vmem:[%s11180_s1 + $0x8e4] ss:$16 sps:$4 sm:$0xff]   ;;  %v7767_v61 = vld [vmem:[%s11180_s1 + $0x8ec] ss:$16 sps:$4 sm:$0xff]  }
  0xe4   :  { %5087 = vmatprep.subr.bf16.mxu0 %v7680_v62  ;;  %5620 = vmatprep.subr.bf16.mxu1 %v7683_v63  ;;  %v7762_v62 = vld [vmem:[%s11180_s1 + $0x8e0] ss:$16 sps:$4 sm:$0xff]   ;;  %v7765_v63 = vld [vmem:[%s11180_s1 + $0x8e8] ss:$16 sps:$4 sm:$0xff]  }
  0xe7   :  { %5088 = vmatpush1.bf16.msra.mxu0 %v7678_v0  ;;  %5621 = vmatpush1.bf16.msra.mxu1 %v7681_v1  ;;  %v7770_v0 = vld [vmem:[%s11180_s1 + $0x904] ss:$16 sps:$4 sm:$0xff]   ;;  %v7773_v1 = vld [vmem:[%s11180_s1 + $0x90c] ss:$16 sps:$4 sm:$0xff]  }
  0xe8   :  { %5089 = vmatprep.subr.bf16.mxu0 %v7686_v2  ;;  %5622 = vmatprep.subr.bf16.mxu1 %v7689_v3  ;;  %v7768_v2 = vld [vmem:[%s11180_s1 + $0x900] ss:$16 sps:$4 sm:$0xff]   ;;  %v7771_v3 = vld [vmem:[%s11180_s1 + $0x908] ss:$16 sps:$4 sm:$0xff]  }
  0xeb   :  { %5090 = vmatpush1.bf16.msra.mxu0 %v7684_v4  ;;  %5623 = vmatpush1.bf16.msra.mxu1 %v7687_v5  ;;  %v7776_v4 = vld [vmem:[%s11180_s1 + $0x924] ss:$16 sps:$4 sm:$0xff]   ;;  %v7779_v5 = vld [vmem:[%s11180_s1 + $0x92c] ss:$16 sps:$4 sm:$0xff]  }
  0xec   :  { %5091 = vmatprep.subr.bf16.mxu0 %v7692_v6  ;;  %5624 = vmatprep.subr.bf16.mxu1 %v7695_v7  ;;  %v7774_v6 = vld [vmem:[%s11180_s1 + $0x920] ss:$16 sps:$4 sm:$0xff]   ;;  %v7777_v7 = vld [vmem:[%s11180_s1 + $0x928] ss:$16 sps:$4 sm:$0xff]  }
  0xef   :  { %5092 = vmatpush1.bf16.msra.mxu0 %v7690_v8  ;;  %5625 = vmatpush1.bf16.msra.mxu1 %v7693_v9  ;;  %v7782_v8 = vld [vmem:[%s11180_s1 + $0x944] ss:$16 sps:$4 sm:$0xff]   ;;  %v7785_v9 = vld [vmem:[%s11180_s1 + $0x94c] ss:$16 sps:$4 sm:$0xff]  }
  0xf0   :  { %5093 = vmatprep.subr.bf16.mxu0 %v7698_v10  ;;  %5626 = vmatprep.subr.bf16.mxu1 %v7701_v11  ;;  %v7780_v10 = vld [vmem:[%s11180_s1 + $0x940] ss:$16 sps:$4 sm:$0xff]   ;;  %v7783_v11 = vld [vmem:[%s11180_s1 + $0x948] ss:$16 sps:$4 sm:$0xff]  }
  0xf3   :  { %5094 = vmatpush1.bf16.msra.mxu0 %v7696_v12  ;;  %5627 = vmatpush1.bf16.msra.mxu1 %v7699_v52  ;;  %v7788_v12 = vld [vmem:[%s11180_s1 + $0x964] ss:$16 sps:$4 sm:$0xff]   ;;  %v7791_v52 = vld [vmem:[%s11180_s1 + $0x96c] ss:$16 sps:$4 sm:$0xff]  }
  0xf4   :  { %5095 = vmatprep.subr.bf16.mxu0 %v7704_v15  ;;  %5628 = vmatprep.subr.bf16.mxu1 %v7707_v16  ;;  %v7786_v15 = vld [vmem:[%s11180_s1 + $0x960] ss:$16 sps:$4 sm:$0xff]   ;;  %v7789_v16 = vld [vmem:[%s11180_s1 + $0x968] ss:$16 sps:$4 sm:$0xff]  }
  0xf7   :  { %5096 = vmatpush1.bf16.msra.mxu0 %v7702_v17  ;;  %5629 = vmatpush1.bf16.msra.mxu1 %v7705_v18  ;;  %v7794_v17 = vld [vmem:[%s11180_s1 + $0x984] ss:$16 sps:$4 sm:$0xff]   ;;  %v7797_v18 = vld [vmem:[%s11180_s1 + $0x98c] ss:$16 sps:$4 sm:$0xff]  }
  0xf8   :  { %5097 = vmatprep.subr.bf16.mxu0 %v7710_v19  ;;  %5630 = vmatprep.subr.bf16.mxu1 %v7713_v20  ;;  %v7792_v19 = vld [vmem:[%s11180_s1 + $0x980] ss:$16 sps:$4 sm:$0xff]   ;;  %v7795_v20 = vld [vmem:[%s11180_s1 + $0x988] ss:$16 sps:$4 sm:$0xff]  }
  0xfb   :  { %5098 = vmatpush1.bf16.msra.mxu0 %v7708_v22  ;;  %5631 = vmatpush1.bf16.msra.mxu1 %v7711_v23  ;;  %v7800_v22 = vld [vmem:[%s11180_s1 + $0x9a4] ss:$16 sps:$4 sm:$0xff]   ;;  %v7803_v23 = vld [vmem:[%s11180_s1 + $0x9ac] ss:$16 sps:$4 sm:$0xff]  }
  0xfc   :  { %5099 = vmatprep.subr.bf16.mxu0 %v7716_v24  ;;  %5632 = vmatprep.subr.bf16.mxu1 %v7719_v13  ;;  %v7798_v24 = vld [vmem:[%s11180_s1 + $0x9a0] ss:$16 sps:$4 sm:$0xff]   ;;  %v7801_v13 = vld [vmem:[%s11180_s1 + $0x9a8] ss:$16 sps:$4 sm:$0xff]  }
  0xff   :  { %5100 = vmatpush1.bf16.msra.mxu0 %v7714_v27  ;;  %5633 = vmatpush1.bf16.msra.mxu1 %v7717_v28  ;;  %v7806_v27 = vld [vmem:[%s11180_s1 + $0x9c4] ss:$16 sps:$4 sm:$0xff]   ;;  %v7809_v28 = vld [vmem:[%s11180_s1 + $0x9cc] ss:$16 sps:$4 sm:$0xff]  }
 0x100   :  { %5110 = vmatprep.subr.bf16.mxu0 %v7722_v29  ;;  %5643 = vmatprep.subr.bf16.mxu1 %v7725_v14  ;;  %v7804_v29 = vld [vmem:[%s11180_s1 + $0x9c0] ss:$16 sps:$4 sm:$0xff]   ;;  %v7807_v14 = vld [vmem:[%s11180_s1 + $0x9c8] ss:$16 sps:$4 sm:$0xff]  }
 0x102   :  { %5102 = vmatmul.mubr.bf16.vlgmr.msra.gmra.mrb[0].mxu0 %v883_v31  ;;  %5635 = vmatmul.mubr.bf16.vlgmr.msra.gmra.mrb[0].mxu1 %v883_v31  ;;  %v7815_v31 = vld [vmem:[%s11180_s1 + $0x9ec] ss:$16 sps:$4 sm:$0xff]  }
 0x103   :  { %5111 = vmatpush1.bf16.msra.mxu0 %v7720_v25  ;;  %5644 = vmatpush1.bf16.msra.mxu1 %v7723_v32  ;;  %v7810_v25 = vld [vmem:[%s11180_s1 + $0x9e0] ss:$16 sps:$4 sm:$0xff]   ;;  %v7813_v32 = vld [vmem:[%s11180_s1 + $0x9e8] ss:$16 sps:$4 sm:$0xff]  }
 0x104   :  { %5112 = vmatprep.subr.bf16.mxu0 %v7728_v33  ;;  %5645 = vmatprep.subr.bf16.mxu1 %v7731_v26  ;;  %v7818_v33 = vld [vmem:[%s11180_s1 + $0xa04] ss:$16 sps:$4 sm:$0xff]   ;;  %v7821_v26 = vld [vmem:[%s11180_s1 + $0xa0c] ss:$16 sps:$4 sm:$0xff]  }
 0x105   :  { %5142 = vmatprep.mubr.bf16.mxu0 %v9416_v34  ;;  %5675 = vmatprep.mubr.bf16.mxu1 %v9416_v34 }
 0x107   :  { %5113 = vmatpush1.bf16.msra.mxu0 %v7726_v35  ;;  %5646 = vmatpush1.bf16.msra.mxu1 %v7729_v36  ;;  %v9602_v35 = vrot.slane %v9373_v21, %v8715_v49  ;;  %v7816_v36 = vld [vmem:[%s11180_s1 + $0xa00] ss:$16 sps:$4 sm:$0xff]   ;;  %v7827_v21 = vld [vmem:[%s11180_s1 + $0xa2c] ss:$16 sps:$4 sm:$0xff]  }
 0x108   :  { %5114 = vmatprep.subr.bf16.mxu0 %v7734_v37  ;;  %5647 = vmatprep.subr.bf16.mxu1 %v7737_v38  ;;  %v7819_v37 = vld [vmem:[%s11180_s1 + $0xa08] ss:$16 sps:$4 sm:$0xff]   ;;  %v7824_v38 = vld [vmem:[%s11180_s1 + $0xa24] ss:$16 sps:$4 sm:$0xff]  }
 0x10b   :  { %5115 = vmatpush1.bf16.msra.mxu0 %v7732_v39  ;;  %5648 = vmatpush1.bf16.msra.mxu1 %v7735_v40  ;;  %v933_v39 = vcombine.high %v9416_v34, %v9416_v34  ;;  %v7822_v40 = vld [vmem:[%s11180_s1 + $0xa20] ss:$16 sps:$4 sm:$0xff]   ;;  %v7830_v34 = vld [vmem:[%s11180_s1 + $0xa44] ss:$16 sps:$4 sm:$0xff]  }
 0x10c   :  { %5116 = vmatprep.subr.bf16.mxu0 %v7740_v41  ;;  %5649 = vmatprep.subr.bf16.mxu1 %v7743_v43  ;;  %v7825_v41 = vld [vmem:[%s11180_s1 + $0xa28] ss:$16 sps:$4 sm:$0xff]   ;;  %v7833_v43 = vld [vmem:[%s11180_s1 + $0xa4c] ss:$16 sps:$4 sm:$0xff]  }
 0x10f   :  { %5117 = vmatpush1.bf16.msra.mxu0 %v7738_v44  ;;  %5650 = vmatpush1.bf16.msra.mxu1 %v7741_v45  ;;  %v7828_v44 = vld [vmem:[%s11180_s1 + $0xa40] ss:$16 sps:$4 sm:$0xff]   ;;  %v7831_v45 = vld [vmem:[%s11180_s1 + $0xa48] ss:$16 sps:$4 sm:$0xff]  }
 0x110   :  { %5118 = vmatprep.subr.bf16.mxu0 %v7746_v46  ;;  %5651 = vmatprep.subr.bf16.mxu1 %v7749_v47  ;;  %v7836_v46 = vld [vmem:[%s11180_s1 + $0xa64] ss:$16 sps:$4 sm:$0xff]   ;;  %v7839_v47 = vld [vmem:[%s11180_s1 + $0xa6c] ss:$16 sps:$4 sm:$0xff]  }
 0x113   :  { %5119 = vmatpush1.bf16.msra.mxu0 %v7744_v48  ;;  %5652 = vmatpush1.bf16.msra.mxu1 %v7747_v50  ;;  %v7834_v48 = vld [vmem:[%s11180_s1 + $0xa60] ss:$16 sps:$4 sm:$0xff]   ;;  %v7837_v50 = vld [vmem:[%s11180_s1 + $0xa68] ss:$16 sps:$4 sm:$0xff]  }
 0x114   :  { %5120 = vmatprep.subr.bf16.mxu0 %v7752_v51  ;;  %5653 = vmatprep.subr.bf16.mxu1 %v7755_v53  ;;  %v7842_v51 = vld [vmem:[%s11180_s1 + $0xa84] ss:$16 sps:$4 sm:$0xff]   ;;  %v7845_v53 = vld [vmem:[%s11180_s1 + $0xa8c] ss:$16 sps:$4 sm:$0xff]  }
 0x117   :  { %5121 = vmatpush1.bf16.msra.mxu0 %v7750_v54  ;;  %5654 = vmatpush1.bf16.msra.mxu1 %v7753_v55  ;;  %v7840_v54 = vld [vmem:[%s11180_s1 + $0xa80] ss:$16 sps:$4 sm:$0xff]   ;;  %v7843_v55 = vld [vmem:[%s11180_s1 + $0xa88] ss:$16 sps:$4 sm:$0xff]  }
 0x118   :  { %5122 = vmatprep.subr.bf16.mxu0 %v7758_v56  ;;  %5655 = vmatprep.subr.bf16.mxu1 %v7761_v57  ;;  %v7848_v56 = vld [vmem:[%s11180_s1 + $0xaa4] ss:$16 sps:$4 sm:$0xff]   ;;  %v7851_v57 = vld [vmem:[%s11180_s1 + $0xaac] ss:$16 sps:$4 sm:$0xff]  }
 0x11b   :  { %5123 = vmatpush1.bf16.msra.mxu0 %v7756_v58  ;;  %5656 = vmatpush1.bf16.msra.mxu1 %v7759_v59  ;;  %v7846_v58 = vld [vmem:[%s11180_s1 + $0xaa0] ss:$16 sps:$4 sm:$0xff]   ;;  %v7849_v59 = vld [vmem:[%s11180_s1 + $0xaa8] ss:$16 sps:$4 sm:$0xff]  }
 0x11c   :  { %5124 = vmatprep.subr.bf16.mxu0 %v7764_v60  ;;  %5657 = vmatprep.subr.bf16.mxu1 %v7767_v61  ;;  %v7854_v60 = vld [vmem:[%s11180_s1 + $0xac4] ss:$16 sps:$4 sm:$0xff]   ;;  %v7857_v61 = vld [vmem:[%s11180_s1 + $0xacc] ss:$16 sps:$4 sm:$0xff]  }
 0x11f   :  { %5125 = vmatpush1.bf16.msra.mxu0 %v7762_v62  ;;  %5658 = vmatpush1.bf16.msra.mxu1 %v7765_v63  ;;  %v7852_v62 = vld [vmem:[%s11180_s1 + $0xac0] ss:$16 sps:$4 sm:$0xff]   ;;  %v7855_v63 = vld [vmem:[%s11180_s1 + $0xac8] ss:$16 sps:$4 sm:$0xff]  }
 0x120   :  { %5126 = vmatprep.subr.bf16.mxu0 %v7770_v0  ;;  %5659 = vmatprep.subr.bf16.mxu1 %v7773_v1  ;;  %v7860_v0 = vld [vmem:[%s11180_s1 + $0xae4] ss:$16 sps:$4 sm:$0xff]   ;;  %v7863_v1 = vld [vmem:[%s11180_s1 + $0xaec] ss:$16 sps:$4 sm:$0xff]  }
 0x123   :  { %5127 = vmatpush1.bf16.msra.mxu0 %v7768_v2  ;;  %5660 = vmatpush1.bf16.msra.mxu1 %v7771_v3  ;;  %v7858_v2 = vld [vmem:[%s11180_s1 + $0xae0] ss:$16 sps:$4 sm:$0xff]   ;;  %v7861_v3 = vld [vmem:[%s11180_s1 + $0xae8] ss:$16 sps:$4 sm:$0xff]  }
 0x124   :  { %5128 = vmatprep.subr.bf16.mxu0 %v7776_v4  ;;  %5661 = vmatprep.subr.bf16.mxu1 %v7779_v5  ;;  %v7866_v4 = vld [vmem:[%s11180_s1 + $0xb04] ss:$16 sps:$4 sm:$0xff]   ;;  %v7869_v5 = vld [vmem:[%s11180_s1 + $0xb0c] ss:$16 sps:$4 sm:$0xff]  }
 0x127   :  { %5129 = vmatpush1.bf16.msra.mxu0 %v7774_v6  ;;  %5662 = vmatpush1.bf16.msra.mxu1 %v7777_v7  ;;  %v7864_v6 = vld [vmem:[%s11180_s1 + $0xb00] ss:$16 sps:$4 sm:$0xff]   ;;  %v7867_v7 = vld [vmem:[%s11180_s1 + $0xb08] ss:$16 sps:$4 sm:$0xff]  }
 0x128   :  { %5130 = vmatprep.subr.bf16.mxu0 %v7782_v8  ;;  %5663 = vmatprep.subr.bf16.mxu1 %v7785_v9  ;;  %v7872_v8 = vld [vmem:[%s11180_s1 + $0xb24] ss:$16 sps:$4 sm:$0xff]   ;;  %v7875_v9 = vld [vmem:[%s11180_s1 + $0xb2c] ss:$16 sps:$4 sm:$0xff]  }
 0x12b   :  { %5131 = vmatpush1.bf16.msra.mxu0 %v7780_v10  ;;  %5664 = vmatpush1.bf16.msra.mxu1 %v7783_v11  ;;  %v7870_v10 = vld [vmem:[%s11180_s1 + $0xb20] ss:$16 sps:$4 sm:$0xff]   ;;  %v7873_v11 = vld [vmem:[%s11180_s1 + $0xb28] ss:$16 sps:$4 sm:$0xff]  }
 0x12c   :  { %5132 = vmatprep.subr.bf16.mxu0 %v7788_v12  ;;  %5665 = vmatprep.subr.bf16.mxu1 %v7791_v52  ;;  %v7878_v12 = vld [vmem:[%s11180_s1 + $0xb44] ss:$16 sps:$4 sm:$0xff]   ;;  %v7881_v52 = vld [vmem:[%s11180_s1 + $0xb4c] ss:$16 sps:$4 sm:$0xff]  }
 0x12f   :  { %5133 = vmatpush1.bf16.msra.mxu0 %v7786_v15  ;;  %5666 = vmatpush1.bf16.msra.mxu1 %v7789_v16  ;;  %v7876_v15 = vld [vmem:[%s11180_s1 + $0xb40] ss:$16 sps:$4 sm:$0xff]   ;;  %v7879_v16 = vld [vmem:[%s11180_s1 + $0xb48] ss:$16 sps:$4 sm:$0xff]  }
 0x130   :  { %5134 = vmatprep.subr.bf16.mxu0 %v7794_v17  ;;  %5667 = vmatprep.subr.bf16.mxu1 %v7797_v18  ;;  %v7884_v17 = vld [vmem:[%s11180_s1 + $0xb64] ss:$16 sps:$4 sm:$0xff]   ;;  %v7887_v18 = vld [vmem:[%s11180_s1 + $0xb6c] ss:$16 sps:$4 sm:$0xff]  }
 0x133   :  { %5135 = vmatpush1.bf16.msra.mxu0 %v7792_v19  ;;  %5668 = vmatpush1.bf16.msra.mxu1 %v7795_v20  ;;  %v7882_v19 = vld [vmem:[%s11180_s1 + $0xb60] ss:$16 sps:$4 sm:$0xff]   ;;  %v7885_v20 = vld [vmem:[%s11180_s1 + $0xb68] ss:$16 sps:$4 sm:$0xff]  }
 0x134   :  { %5136 = vmatprep.subr.bf16.mxu0 %v7800_v22  ;;  %5669 = vmatprep.subr.bf16.mxu1 %v7803_v23  ;;  %v7890_v22 = vld [vmem:[%s11180_s1 + $0xb84] ss:$16 sps:$4 sm:$0xff]   ;;  %v7893_v23 = vld [vmem:[%s11180_s1 + $0xb8c] ss:$16 sps:$4 sm:$0xff]  }
 0x137   :  { %5137 = vmatpush1.bf16.msra.mxu0 %v7798_v24  ;;  %5670 = vmatpush1.bf16.msra.mxu1 %v7801_v13  ;;  %v7888_v24 = vld [vmem:[%s11180_s1 + $0xb80] ss:$16 sps:$4 sm:$0xff]   ;;  %v7891_v13 = vld [vmem:[%s11180_s1 + $0xb88] ss:$16 sps:$4 sm:$0xff]  }
 0x138   :  { %5138 = vmatprep.subr.bf16.mxu0 %v7806_v27  ;;  %5671 = vmatprep.subr.bf16.mxu1 %v7809_v28  ;;  %v7896_v27 = vld [vmem:[%s11180_s1 + $0xba4] ss:$16 sps:$4 sm:$0xff]   ;;  %v7899_v28 = vld [vmem:[%s11180_s1 + $0xbac] ss:$16 sps:$4 sm:$0xff]  }
 0x13b   :  { %5139 = vmatpush1.bf16.msra.mxu0 %v7804_v29  ;;  %5672 = vmatpush1.bf16.msra.mxu1 %v7807_v14  ;;  %v7894_v29 = vld [vmem:[%s11180_s1 + $0xba0] ss:$16 sps:$4 sm:$0xff]   ;;  %v7897_v14 = vld [vmem:[%s11180_s1 + $0xba8] ss:$16 sps:$4 sm:$0xff]  }
 0x13c   :  { %5140 = vmatprep.subr.bf16.mxu0 %v7812_v30  ;;  %5673 = vmatprep.subr.bf16.mxu1 %v7815_v31  ;;  %v7902_v30 = vld [vmem:[%s11180_s1 + $0xbc4] ss:$16 sps:$4 sm:$0xff]   ;;  %v7905_v31 = vld [vmem:[%s11180_s1 + $0xbcc] ss:$16 sps:$4 sm:$0xff]  }
 0x13f   :  { %5141 = vmatpush1.bf16.msra.mxu0 %v7810_v25  ;;  %5674 = vmatpush1.bf16.msra.mxu1 %v7813_v32  ;;  %v8546_v25 = vld [vmem:[%s11181_s0 + $0x8] sm:$0xff] }
 0x140   :  { %5151 = vmatprep.subr.bf16.mxu0 %v7818_v33  ;;  %5684 = vmatprep.subr.bf16.mxu1 %v7821_v26  ;;  %v886_v32 = vcombine.high %v8546_v25, %v8546_v25  ;;  %v7900_v33 = vld [vmem:[%s11180_s1 + $0xbc0] ss:$16 sps:$4 sm:$0xff]   ;;  %v7903_v26 = vld [vmem:[%s11180_s1 + $0xbc8] ss:$16 sps:$4 sm:$0xff]  }
 0x141   :  { %v7984_v25 = vld [vmem:[%s11180_s1 + $0xd80] ss:$16 sps:$4 sm:$0xff]  }
 0x142   :  { %5143 = vmatmul.mubr.bf16.vlgmr.msra.gmra.mrb[0].mxu0 %v9602_v35  ;;  %5676 = vmatmul.mubr.bf16.vlgmr.msra.gmra.mrb[0].mxu1 %v9602_v35 }
 0x143   :  { %5152 = vmatpush1.bf16.msra.mxu0 %v7816_v36  ;;  %5685 = vmatpush1.bf16.msra.mxu1 %v7819_v37  ;;  %v7908_v36 = vld [vmem:[%s11180_s1 + $0xbe4] ss:$16 sps:$4 sm:$0xff]   ;;  %v7911_v37 = vld [vmem:[%s11180_s1 + $0xbec] ss:$16 sps:$4 sm:$0xff]  }
 0x144   :  { %5153 = vmatprep.subr.bf16.mxu0 %v7824_v38  ;;  %5686 = vmatprep.subr.bf16.mxu1 %v7827_v21  ;;  %v9792_v38 = vrot.slane %v886_v32, %v8715_v49  ;;  %v7906_v21 = vld [vmem:[%s11180_s1 + $0xbe0] ss:$16 sps:$4 sm:$0xff]   ;;  %v7987_v32 = vld [vmem:[%s11180_s1 + $0xd88] ss:$16 sps:$4 sm:$0xff]  }
 0x145   :  { %5183 = vmatprep.mubr.bf16.mxu0 %v933_v39  ;;  %5716 = vmatprep.mubr.bf16.mxu1 %v933_v39  ;;  %v7909_v39 = vld [vmem:[%s11180_s1 + $0xbe8] ss:$16 sps:$4 sm:$0xff]  }
 0x147   :  { %5154 = vmatpush1.bf16.msra.mxu0 %v7822_v40  ;;  %5687 = vmatpush1.bf16.msra.mxu1 %v7825_v41  ;;  %v7914_v40 = vld [vmem:[%s11180_s1 + $0xc04] ss:$16 sps:$4 sm:$0xff]   ;;  %v7917_v41 = vld [vmem:[%s11180_s1 + $0xc0c] ss:$16 sps:$4 sm:$0xff]  }
 0x148   :  { %5155 = vmatprep.subr.bf16.mxu0 %v7830_v34  ;;  %5688 = vmatprep.subr.bf16.mxu1 %v7833_v43  ;;  %v902_v34 = vcombine.high %v9792_v38, %v9792_v38  ;;  %v931_v43 = vcombine.high %v9602_v35, %v9602_v35  ;;  %v7923_v35 = vld [vmem:[%s11180_s1 + $0xc2c] ss:$16 sps:$4 sm:$0xff]  }
 0x14b   :  { %5156 = vmatpush1.bf16.msra.mxu0 %v7828_v44  ;;  %5689 = vmatpush1.bf16.msra.mxu1 %v7831_v45  ;;  %v7912_v44 = vld [vmem:[%s11180_s1 + $0xc00] ss:$16 sps:$4 sm:$0xff]   ;;  %v7915_v45 = vld [vmem:[%s11180_s1 + $0xc08] ss:$16 sps:$4 sm:$0xff]  }
 0x14c   :  { %5157 = vmatprep.subr.bf16.mxu0 %v7836_v46  ;;  %5690 = vmatprep.subr.bf16.mxu1 %v7839_v47  ;;  %v7920_v46 = vld [vmem:[%s11180_s1 + $0xc24] ss:$16 sps:$4 sm:$0xff]   ;;  %v9823_v47 = vrot.slane %v902_v34, %v8715_v49 }
 0x14d   :  { %v8004_v34 = vld [vmem:[%s11180_s1 + $0xde4] ss:$16 sps:$4 sm:$0xff]  }
 0x14f   :  { %5158 = vmatpush1.bf16.msra.mxu0 %v7834_v48  ;;  %5691 = vmatpush1.bf16.msra.mxu1 %v7837_v50  ;;  %v7918_v48 = vld [vmem:[%s11180_s1 + $0xc20] ss:$16 sps:$4 sm:$0xff]   ;;  %v7921_v50 = vld [vmem:[%s11180_s1 + $0xc28] ss:$16 sps:$4 sm:$0xff]  }
 0x150   :  { %5159 = vmatprep.subr.bf16.mxu0 %v7842_v51  ;;  %5692 = vmatprep.subr.bf16.mxu1 %v7845_v53  ;;  %v7926_v51 = vld [vmem:[%s11180_s1 + $0xc44] ss:$16 sps:$4 sm:$0xff]   ;;  %v7929_v53 = vld [vmem:[%s11180_s1 + $0xc4c] ss:$16 sps:$4 sm:$0xff]  }
 0x153   :  { %5160 = vmatpush1.bf16.msra.mxu0 %v7840_v54  ;;  %5693 = vmatpush1.bf16.msra.mxu1 %v7843_v55  ;;  %v7924_v54 = vld [vmem:[%s11180_s1 + $0xc40] ss:$16 sps:$4 sm:$0xff]   ;;  %v7927_v55 = vld [vmem:[%s11180_s1 + $0xc48] ss:$16 sps:$4 sm:$0xff]  }
 0x154   :  { %5161 = vmatprep.subr.bf16.mxu0 %v7848_v56  ;;  %5694 = vmatprep.subr.bf16.mxu1 %v7851_v57  ;;  %v7932_v56 = vld [vmem:[%s11180_s1 + $0xc64] ss:$16 sps:$4 sm:$0xff]   ;;  %v7935_v57 = vld [vmem:[%s11180_s1 + $0xc6c] ss:$16 sps:$4 sm:$0xff]  }
 0x157   :  { %5162 = vmatpush1.bf16.msra.mxu0 %v7846_v58  ;;  %5695 = vmatpush1.bf16.msra.mxu1 %v7849_v59  ;;  %v7930_v58 = vld [vmem:[%s11180_s1 + $0xc60] ss:$16 sps:$4 sm:$0xff]   ;;  %v7933_v59 = vld [vmem:[%s11180_s1 + $0xc68] ss:$16 sps:$4 sm:$0xff]  }
 0x158   :  { %5163 = vmatprep.subr.bf16.mxu0 %v7854_v60  ;;  %5696 = vmatprep.subr.bf16.mxu1 %v7857_v61  ;;  %v7938_v60 = vld [vmem:[%s11180_s1 + $0xc84] ss:$16 sps:$4 sm:$0xff]   ;;  %v7941_v61 = vld [vmem:[%s11180_s1 + $0xc8c] ss:$16 sps:$4 sm:$0xff]  }
 0x15b   :  { %5164 = vmatpush1.bf16.msra.mxu0 %v7852_v62  ;;  %5697 = vmatpush1.bf16.msra.mxu1 %v7855_v63  ;;  %v7936_v62 = vld [vmem:[%s11180_s1 + $0xc80] ss:$16 sps:$4 sm:$0xff]   ;;  %v7939_v63 = vld [vmem:[%s11180_s1 + $0xc88] ss:$16 sps:$4 sm:$0xff]  }
 0x15c   :  { %5165 = vmatprep.subr.bf16.mxu0 %v7860_v0  ;;  %5698 = vmatprep.subr.bf16.mxu1 %v7863_v1  ;;  %v7944_v0 = vld [vmem:[%s11180_s1 + $0xca4] ss:$16 sps:$4 sm:$0xff]   ;;  %v7947_v1 = vld [vmem:[%s11180_s1 + $0xcac] ss:$16 sps:$4 sm:$0xff]  }
 0x15f   :  { %5166 = vmatpush1.bf16.msra.mxu0 %v7858_v2  ;;  %5699 = vmatpush1.bf16.msra.mxu1 %v7861_v3  ;;  %v7942_v2 = vld [vmem:[%s11180_s1 + $0xca0] ss:$16 sps:$4 sm:$0xff]   ;;  %v7945_v3 = vld [vmem:[%s11180_s1 + $0xca8] ss:$16 sps:$4 sm:$0xff]  }
 0x160   :  { %5167 = vmatprep.subr.bf16.mxu0 %v7866_v4  ;;  %5700 = vmatprep.subr.bf16.mxu1 %v7869_v5  ;;  %v7950_v4 = vld [vmem:[%s11180_s1 + $0xcc4] ss:$16 sps:$4 sm:$0xff]   ;;  %v7953_v5 = vld [vmem:[%s11180_s1 + $0xccc] ss:$16 sps:$4 sm:$0xff]  }
 0x163   :  { %5168 = vmatpush1.bf16.msra.mxu0 %v7864_v6  ;;  %5701 = vmatpush1.bf16.msra.mxu1 %v7867_v7  ;;  %v7948_v6 = vld [vmem:[%s11180_s1 + $0xcc0] ss:$16 sps:$4 sm:$0xff]   ;;  %v7951_v7 = vld [vmem:[%s11180_s1 + $0xcc8] ss:$16 sps:$4 sm:$0xff]  }
 0x164   :  { %5169 = vmatprep.subr.bf16.mxu0 %v7872_v8  ;;  %5702 = vmatprep.subr.bf16.mxu1 %v7875_v9  ;;  %v7956_v8 = vld [vmem:[%s11180_s1 + $0xce4] ss:$16 sps:$4 sm:$0xff]   ;;  %v7959_v9 = vld [vmem:[%s11180_s1 + $0xcec] ss:$16 sps:$4 sm:$0xff]  }
 0x167   :  { %5170 = vmatpush1.bf16.msra.mxu0 %v7870_v10  ;;  %5703 = vmatpush1.bf16.msra.mxu1 %v7873_v11  ;;  %v7954_v10 = vld [vmem:[%s11180_s1 + $0xce0] ss:$16 sps:$4 sm:$0xff]   ;;  %v7957_v11 = vld [vmem:[%s11180_s1 + $0xce8] ss:$16 sps:$4 sm:$0xff]  }
 0x168   :  { %5171 = vmatprep.subr.bf16.mxu0 %v7878_v12  ;;  %5704 = vmatprep.subr.bf16.mxu1 %v7881_v52  ;;  %v7962_v12 = vld [vmem:[%s11180_s1 + $0xd04] ss:$16 sps:$4 sm:$0xff]   ;;  %v7965_v52 = vld [vmem:[%s11180_s1 + $0xd0c] ss:$16 sps:$4 sm:$0xff]  }
 0x16b   :  { %5172 = vmatpush1.bf16.msra.mxu0 %v7876_v15  ;;  %5705 = vmatpush1.bf16.msra.mxu1 %v7879_v16  ;;  %v7960_v15 = vld [vmem:[%s11180_s1 + $0xd00] ss:$16 sps:$4 sm:$0xff]   ;;  %v7963_v16 = vld [vmem:[%s11180_s1 + $0xd08] ss:$16 sps:$4 sm:$0xff]  }
 0x16c   :  { %5173 = vmatprep.subr.bf16.mxu0 %v7884_v17  ;;  %5706 = vmatprep.subr.bf16.mxu1 %v7887_v18  ;;  %v7968_v17 = vld [vmem:[%s11180_s1 + $0xd24] ss:$16 sps:$4 sm:$0xff]   ;;  %v7971_v18 = vld [vmem:[%s11180_s1 + $0xd2c] ss:$16 sps:$4 sm:$0xff]  }
 0x16f   :  { %5174 = vmatpush1.bf16.msra.mxu0 %v7882_v19  ;;  %5707 = vmatpush1.bf16.msra.mxu1 %v7885_v20  ;;  %v7966_v19 = vld [vmem:[%s11180_s1 + $0xd20] ss:$16 sps:$4 sm:$0xff]   ;;  %v7969_v20 = vld [vmem:[%s11180_s1 + $0xd28] ss:$16 sps:$4 sm:$0xff]  }
 0x170   :  { %5175 = vmatprep.subr.bf16.mxu0 %v7890_v22  ;;  %5708 = vmatprep.subr.bf16.mxu1 %v7893_v23  ;;  %v7974_v22 = vld [vmem:[%s11180_s1 + $0xd44] ss:$16 sps:$4 sm:$0xff]   ;;  %v7977_v23 = vld [vmem:[%s11180_s1 + $0xd4c] ss:$16 sps:$4 sm:$0xff]  }
 0x173   :  { %5176 = vmatpush1.bf16.msra.mxu0 %v7888_v24  ;;  %5709 = vmatpush1.bf16.msra.mxu1 %v7891_v13  ;;  %v7972_v24 = vld [vmem:[%s11180_s1 + $0xd40] ss:$16 sps:$4 sm:$0xff]   ;;  %v7975_v13 = vld [vmem:[%s11180_s1 + $0xd48] ss:$16 sps:$4 sm:$0xff]  }
 0x174   :  { %5177 = vmatprep.subr.bf16.mxu0 %v7896_v27  ;;  %5710 = vmatprep.subr.bf16.mxu1 %v7899_v28  ;;  %v7980_v27 = vld [vmem:[%s11180_s1 + $0xd64] ss:$16 sps:$4 sm:$0xff]   ;;  %v7983_v28 = vld [vmem:[%s11180_s1 + $0xd6c] ss:$16 sps:$4 sm:$0xff]  }
 0x177   :  { %5178 = vmatpush1.bf16.msra.mxu0 %v7894_v29  ;;  %5711 = vmatpush1.bf16.msra.mxu1 %v7897_v14  ;;  %v7978_v29 = vld [vmem:[%s11180_s1 + $0xd60] ss:$16 sps:$4 sm:$0xff]   ;;  %v7981_v14 = vld [vmem:[%s11180_s1 + $0xd68] ss:$16 sps:$4 sm:$0xff]  }
 0x178   :  { %5179 = vmatprep.subr.bf16.mxu0 %v7902_v30  ;;  %5712 = vmatprep.subr.bf16.mxu1 %v7905_v31  ;;  %v7986_v30 = vld [vmem:[%s11180_s1 + $0xd84] ss:$16 sps:$4 sm:$0xff]   ;;  %v7989_v31 = vld [vmem:[%s11180_s1 + $0xd8c] ss:$16 sps:$4 sm:$0xff]  }
 0x17b   :  { %5180 = vmatpush1.bf16.msra.mxu0 %v7900_v33  ;;  %5713 = vmatpush1.bf16.msra.mxu1 %v7903_v26  ;;  %v7992_v33 = vld [vmem:[%s11180_s1 + $0xda4] ss:$16 sps:$4 sm:$0xff]   ;;  %v7995_v26 = vld [vmem:[%s11180_s1 + $0xdac] ss:$16 sps:$4 sm:$0xff]  }
 0x17c   :  { %5181 = vmatprep.subr.bf16.mxu0 %v7908_v36  ;;  %5714 = vmatprep.subr.bf16.mxu1 %v7911_v37  ;;  %v7990_v36 = vld [vmem:[%s11180_s1 + $0xda0] ss:$16 sps:$4 sm:$0xff]   ;;  %v7993_v37 = vld [vmem:[%s11180_s1 + $0xda8] ss:$16 sps:$4 sm:$0xff]  }
 0x17f   :  { %5182 = vmatpush1.bf16.msra.mxu0 %v7906_v21  ;;  %5715 = vmatpush1.bf16.msra.mxu1 %v7909_v39  ;;  %v7998_v21 = vld [vmem:[%s11180_s1 + $0xdc4] ss:$16 sps:$4 sm:$0xff]   ;;  %v8001_v39 = vld [vmem:[%s11180_s1 + $0xdcc] ss:$16 sps:$4 sm:$0xff]  }
 0x180   :  { %5192 = vmatprep.subr.bf16.mxu0 %v7914_v40  ;;  %5725 = vmatprep.subr.bf16.mxu1 %v7917_v41  ;;  %v7996_v40 = vld [vmem:[%s11180_s1 + $0xdc0] ss:$16 sps:$4 sm:$0xff]   ;;  %v7999_v41 = vld [vmem:[%s11180_s1 + $0xdc8] ss:$16 sps:$4 sm:$0xff]  }
 0x182   :  { %5184 = vmatmul.mubr.bf16.vlgmr.msra.gmra.mrb[0].mxu0 %v931_v43  ;;  %5717 = vmatmul.mubr.bf16.vlgmr.msra.gmra.mrb[0].mxu1 %v931_v43  ;;  %v8007_v43 = vld [vmem:[%s11180_s1 + $0xdec] ss:$16 sps:$4 sm:$0xff]  }
 0x183   :  { %5193 = vmatpush1.bf16.msra.mxu0 %v7912_v44  ;;  %5726 = vmatpush1.bf16.msra.mxu1 %v7915_v45  ;;  %v8002_v44 = vld [vmem:[%s11180_s1 + $0xde0] ss:$16 sps:$4 sm:$0xff]   ;;  %v8005_v45 = vld [vmem:[%s11180_s1 + $0xde8] ss:$16 sps:$4 sm:$0xff]  }
 0x184   :  { %5194 = vmatprep.subr.bf16.mxu0 %v7920_v46  ;;  %5727 = vmatprep.subr.bf16.mxu1 %v7923_v35  ;;  %v8011_v46 = vld [vmem:[%s11180_s1 + $0xe04] ss:$16 sps:$4 sm:$0xff]   ;;  %v8014_v35 = vld [vmem:[%s11180_s1 + $0xe0c] ss:$16 sps:$4 sm:$0xff]  }
 0x185   :  { %5224 = vmatprep.mubr.bf16.mxu0 %v9823_v47  ;;  %5757 = vmatprep.mubr.bf16.mxu1 %v9823_v47 }
 0x187   :  { %5195 = vmatpush1.bf16.msra.mxu0 %v7918_v48  ;;  %5728 = vmatpush1.bf16.msra.mxu1 %v7921_v50  ;;  %v10009_v48 = vrot.slane %v9792_v38, %v8715_v49  ;;  %v8009_v50 = vld [vmem:[%s11180_s1 + $0xe00] ss:$16 sps:$4 sm:$0xff]   ;;  %v8020_v38 = vld [vmem:[%s11180_s1 + $0xe2c] ss:$16 sps:$4 sm:$0xff]  }
 0x188   :  { %5196 = vmatprep.subr.bf16.mxu0 %v7926_v51  ;;  %5729 = vmatprep.subr.bf16.mxu1 %v7929_v53  ;;  %v8012_v51 = vld [vmem:[%s11180_s1 + $0xe08] ss:$16 sps:$4 sm:$0xff]   ;;  %v8017_v53 = vld [vmem:[%s11180_s1 + $0xe24] ss:$16 sps:$4 sm:$0xff]  }
 0x18b   :  { %5197 = vmatpush1.bf16.msra.mxu0 %v7924_v54  ;;  %5730 = vmatpush1.bf16.msra.mxu1 %v7927_v55  ;;  %v934_v54 = vcombine.high %v9823_v47, %v9823_v47  ;;  %v8015_v55 = vld [vmem:[%s11180_s1 + $0xe20] ss:$16 sps:$4 sm:$0xff]   ;;  %v8023_v47 = vld [vmem:[%s11180_s1 + $0xe44] ss:$16 sps:$4 sm:$0xff]  }
 0x18c   :  { %5198 = vmatprep.subr.bf16.mxu0 %v7932_v56  ;;  %5731 = vmatprep.subr.bf16.mxu1 %v7935_v57  ;;  %v8018_v56 = vld [vmem:[%s11180_s1 + $0xe28] ss:$16 sps:$4 sm:$0xff]   ;;  %v8026_v57 = vld [vmem:[%s11180_s1 + $0xe4c] ss:$16 sps:$4 sm:$0xff]  }
 0x18f   :  { %5199 = vmatpush1.bf16.msra.mxu0 %v7930_v58  ;;  %5732 = vmatpush1.bf16.msra.mxu1 %v7933_v59  ;;  %v8021_v58 = vld [vmem:[%s11180_s1 + $0xe40] ss:$16 sps:$4 sm:$0xff]   ;;  %v8024_v59 = vld [vmem:[%s11180_s1 + $0xe48] ss:$16 sps:$4 sm:$0xff]  }
 0x190   :  { %5200 = vmatprep.subr.bf16.mxu0 %v7938_v60  ;;  %5733 = vmatprep.subr.bf16.mxu1 %v7941_v61  ;;  %v8029_v60 = vld [vmem:[%s11180_s1 + $0xe64] ss:$16 sps:$4 sm:$0xff]   ;;  %v8032_v61 = vld [vmem:[%s11180_s1 + $0xe6c] ss:$16 sps:$4 sm:$0xff]  }
 0x193   :  { %5201 = vmatpush1.bf16.msra.mxu0 %v7936_v62  ;;  %5734 = vmatpush1.bf16.msra.mxu1 %v7939_v63  ;;  %v8027_v62 = vld [vmem:[%s11180_s1 + $0xe60] ss:$16 sps:$4 sm:$0xff]   ;;  %v8030_v63 = vld [vmem:[%s11180_s1 + $0xe68] ss:$16 sps:$4 sm:$0xff]  }
 0x194   :  { %5202 = vmatprep.subr.bf16.mxu0 %v7944_v0  ;;  %5735 = vmatprep.subr.bf16.mxu1 %v7947_v1  ;;  %v8035_v0 = vld [vmem:[%s11180_s1 + $0xe84] ss:$16 sps:$4 sm:$0xff]   ;;  %v8038_v1 = vld [vmem:[%s11180_s1 + $0xe8c] ss:$16 sps:$4 sm:$0xff]  }
 0x197   :  { %5203 = vmatpush1.bf16.msra.mxu0 %v7942_v2  ;;  %5736 = vmatpush1.bf16.msra.mxu1 %v7945_v3  ;;  %v8033_v2 = vld [vmem:[%s11180_s1 + $0xe80] ss:$16 sps:$4 sm:$0xff]   ;;  %v8036_v3 = vld [vmem:[%s11180_s1 + $0xe88] ss:$16 sps:$4 sm:$0xff]  }
 0x198   :  { %5204 = vmatprep.subr.bf16.mxu0 %v7950_v4  ;;  %5737 = vmatprep.subr.bf16.mxu1 %v7953_v5  ;;  %v8041_v4 = vld [vmem:[%s11180_s1 + $0xea4] ss:$16 sps:$4 sm:$0xff]   ;;  %v8044_v5 = vld [vmem:[%s11180_s1 + $0xeac] ss:$16 sps:$4 sm:$0xff]  }
 0x19b   :  { %5205 = vmatpush1.bf16.msra.mxu0 %v7948_v6  ;;  %5738 = vmatpush1.bf16.msra.mxu1 %v7951_v7  ;;  %v8039_v6 = vld [vmem:[%s11180_s1 + $0xea0] ss:$16 sps:$4 sm:$0xff]   ;;  %v8042_v7 = vld [vmem:[%s11180_s1 + $0xea8] ss:$16 sps:$4 sm:$0xff]  }
 0x19c   :  { %5206 = vmatprep.subr.bf16.mxu0 %v7956_v8  ;;  %5739 = vmatprep.subr.bf16.mxu1 %v7959_v9  ;;  %v8047_v8 = vld [vmem:[%s11180_s1 + $0xec4] ss:$16 sps:$4 sm:$0xff]   ;;  %v8050_v9 = vld [vmem:[%s11180_s1 + $0xecc] ss:$16 sps:$4 sm:$0xff]  }
 0x19f   :  { %5207 = vmatpush1.bf16.msra.mxu0 %v7954_v10  ;;  %5740 = vmatpush1.bf16.msra.mxu1 %v7957_v11  ;;  %v8045_v10 = vld [vmem:[%s11180_s1 + $0xec0] ss:$16 sps:$4 sm:$0xff]   ;;  %v8048_v11 = vld [vmem:[%s11180_s1 + $0xec8] ss:$16 sps:$4 sm:$0xff]  }
 0x1a0   :  { %5208 = vmatprep.subr.bf16.mxu0 %v7962_v12  ;;  %5741 = vmatprep.subr.bf16.mxu1 %v7965_v52  ;;  %v8053_v12 = vld [vmem:[%s11180_s1 + $0xee4] ss:$16 sps:$4 sm:$0xff]   ;;  %v8056_v52 = vld [vmem:[%s11180_s1 + $0xeec] ss:$16 sps:$4 sm:$0xff]  }
 0x1a3   :  { %5209 = vmatpush1.bf16.msra.mxu0 %v7960_v15  ;;  %5742 = vmatpush1.bf16.msra.mxu1 %v7963_v16  ;;  %v8051_v15 = vld [vmem:[%s11180_s1 + $0xee0] ss:$16 sps:$4 sm:$0xff]   ;;  %v8054_v16 = vld [vmem:[%s11180_s1 + $0xee8] ss:$16 sps:$4 sm:$0xff]  }
 0x1a4   :  { %5210 = vmatprep.subr.bf16.mxu0 %v7968_v17  ;;  %5743 = vmatprep.subr.bf16.mxu1 %v7971_v18  ;;  %v8059_v17 = vld [vmem:[%s11180_s1 + $0xf04] ss:$16 sps:$4 sm:$0xff]   ;;  %v8062_v18 = vld [vmem:[%s11180_s1 + $0xf0c] ss:$16 sps:$4 sm:$0xff]  }
 0x1a7   :  { %5211 = vmatpush1.bf16.msra.mxu0 %v7966_v19  ;;  %5744 = vmatpush1.bf16.msra.mxu1 %v7969_v20  ;;  %v8057_v19 = vld [vmem:[%s11180_s1 + $0xf00] ss:$16 sps:$4 sm:$0xff]   ;;  %v8060_v20 = vld [vmem:[%s11180_s1 + $0xf08] ss:$16 sps:$4 sm:$0xff]  }
 0x1a8   :  { %5212 = vmatprep.subr.bf16.mxu0 %v7974_v22  ;;  %5745 = vmatprep.subr.bf16.mxu1 %v7977_v23  ;;  %v8065_v22 = vld [vmem:[%s11180_s1 + $0xf24] ss:$16 sps:$4 sm:$0xff]   ;;  %v8068_v23 = vld [vmem:[%s11180_s1 + $0xf2c] ss:$16 sps:$4 sm:$0xff]  }
 0x1ab   :  { %5213 = vmatpush1.bf16.msra.mxu0 %v7972_v24  ;;  %5746 = vmatpush1.bf16.msra.mxu1 %v7975_v13  ;;  %v8063_v24 = vld [vmem:[%s11180_s1 + $0xf20] ss:$16 sps:$4 sm:$0xff]   ;;  %v8066_v13 = vld [vmem:[%s11180_s1 + $0xf28] ss:$16 sps:$4 sm:$0xff]  }
 0x1ac   :  { %5214 = vmatprep.subr.bf16.mxu0 %v7980_v27  ;;  %5747 = vmatprep.subr.bf16.mxu1 %v7983_v28  ;;  %v8071_v27 = vld [vmem:[%s11180_s1 + $0xf44] ss:$16 sps:$4 sm:$0xff]   ;;  %v8074_v28 = vld [vmem:[%s11180_s1 + $0xf4c] ss:$16 sps:$4 sm:$0xff]  }
 0x1af   :  { %5215 = vmatpush1.bf16.msra.mxu0 %v7978_v29  ;;  %5748 = vmatpush1.bf16.msra.mxu1 %v7981_v14  ;;  %v8069_v29 = vld [vmem:[%s11180_s1 + $0xf40] ss:$16 sps:$4 sm:$0xff]   ;;  %v8072_v14 = vld [vmem:[%s11180_s1 + $0xf48] ss:$16 sps:$4 sm:$0xff]  }
 0x1b0   :  { %5216 = vmatprep.subr.bf16.mxu0 %v7986_v30  ;;  %5749 = vmatprep.subr.bf16.mxu1 %v7989_v31  ;;  %v8077_v30 = vld [vmem:[%s11180_s1 + $0xf64] ss:$16 sps:$4 sm:$0xff]   ;;  %v8080_v31 = vld [vmem:[%s11180_s1 + $0xf6c] ss:$16 sps:$4 sm:$0xff]  }
 0x1b3   :  { %5217 = vmatpush1.bf16.msra.mxu0 %v7984_v25  ;;  %5750 = vmatpush1.bf16.msra.mxu1 %v7987_v32  ;;  %v8075_v25 = vld [vmem:[%s11180_s1 + $0xf60] ss:$16 sps:$4 sm:$0xff]   ;;  %v8078_v32 = vld [vmem:[%s11180_s1 + $0xf68] ss:$16 sps:$4 sm:$0xff]  }
 0x1b4   :  { %5218 = vmatprep.subr.bf16.mxu0 %v7992_v33  ;;  %5751 = vmatprep.subr.bf16.mxu1 %v7995_v26  ;;  %v8083_v33 = vld [vmem:[%s11180_s1 + $0xf84] ss:$16 sps:$4 sm:$0xff]   ;;  %v8086_v26 = vld [vmem:[%s11180_s1 + $0xf8c] ss:$16 sps:$4 sm:$0xff]  }
 0x1b7   :  { %5219 = vmatpush1.bf16.msra.mxu0 %v7990_v36  ;;  %5752 = vmatpush1.bf16.msra.mxu1 %v7993_v37  ;;  %v8081_v36 = vld [vmem:[%s11180_s1 + $0xf80] ss:$16 sps:$4 sm:$0xff]   ;;  %v8084_v37 = vld [vmem:[%s11180_s1 + $0xf88] ss:$16 sps:$4 sm:$0xff]  }
 0x1b8   :  { %5220 = vmatprep.subr.bf16.mxu0 %v7998_v21  ;;  %5753 = vmatprep.subr.bf16.mxu1 %v8001_v39  ;;  %v8089_v21 = vld [vmem:[%s11180_s1 + $0xfa4] ss:$16 sps:$4 sm:$0xff]   ;;  %v8092_v39 = vld [vmem:[%s11180_s1 + $0xfac] ss:$16 sps:$4 sm:$0xff]  }
 0x1bb   :  { %5221 = vmatpush1.bf16.msra.mxu0 %v7996_v40  ;;  %5754 = vmatpush1.bf16.msra.mxu1 %v7999_v41  ;;  %v8087_v40 = vld [vmem:[%s11180_s1 + $0xfa0] ss:$16 sps:$4 sm:$0xff]   ;;  %v8090_v41 = vld [vmem:[%s11180_s1 + $0xfa8] ss:$16 sps:$4 sm:$0xff]  }
 0x1bc   :  { %5222 = vmatprep.subr.bf16.mxu0 %v8004_v34  ;;  %5755 = vmatprep.subr.bf16.mxu1 %v8007_v43  ;;  %v8095_v34 = vld [vmem:[%s11180_s1 + $0xfc4] ss:$16 sps:$4 sm:$0xff]   ;;  %v8098_v43 = vld [vmem:[%s11180_s1 + $0xfcc] ss:$16 sps:$4 sm:$0xff]  }
 0x1bf   :  { %5223 = vmatpush1.bf16.msra.mxu0 %v8002_v44  ;;  %5756 = vmatpush1.bf16.msra.mxu1 %v8005_v45  ;;  %v10186_v44 = vld [vmem:[%s11181_s0 + $0x10] sm:$0xff] }
 0x1c0   :  { %5233 = vmatprep.subr.bf16.mxu0 %v8011_v46  ;;  %5766 = vmatprep.subr.bf16.mxu1 %v8014_v35  ;;  %v8093_v45 = vld [vmem:[%s11180_s1 + $0xfc0] ss:$16 sps:$4 sm:$0xff]   ;;  %v8096_v46 = vld [vmem:[%s11180_s1 + $0xfc8] ss:$16 sps:$4 sm:$0xff]   ;;  %v8101_v35 = vld [vmem:[%s11180_s1 + $0xfe4] ss:$16 sps:$4 sm:$0xff]  }
 0x1c2   :  { %5225 = vmatmul.mubr.bf16.vlgmr.msra.gmra.mrb[0].mxu0 %v10009_v48  ;;  %5758 = vmatmul.mubr.bf16.vlgmr.msra.gmra.mrb[0].mxu1 %v10009_v48 }
 0x1c3   :  { %5234 = vmatpush1.bf16.msra.mxu0 %v8009_v50  ;;  %5767 = vmatpush1.bf16.msra.mxu1 %v8012_v51  ;;  %v8104_v50 = vld [vmem:[%s11180_s1 + $0xfec] ss:$16 sps:$4 sm:$0xff]   ;;  %v10202_v51 = vrot.slane %v10186_v44, %v8715_v49 }
 0x1c4   :  { %5235 = vmatprep.subr.bf16.mxu0 %v8017_v53  ;;  %5768 = vmatprep.subr.bf16.mxu1 %v8020_v38  ;;  %v8099_v53 = vld [vmem:[%s11180_s1 + $0xfe0] ss:$16 sps:$4 sm:$0xff]   ;;  %v8102_v38 = vld [vmem:[%s11180_s1 + $0xfe8] ss:$16 sps:$4 sm:$0xff]  }
 0x1c5   :  { %5265 = vmatprep.mubr.bf16.mxu0 %v934_v54  ;;  %5798 = vmatprep.mubr.bf16.mxu1 %v934_v54  ;;  %v8107_v54 = vld [vmem:[%s11180_s1 + $0x1004] ss:$16 sps:$4 sm:$0xff]  }
 0x1c7   :  { %5236 = vmatpush1.bf16.msra.mxu0 %v8015_v55  ;;  %5769 = vmatpush1.bf16.msra.mxu1 %v8018_v56  ;;  %v8110_v55 = vld [vmem:[%s11180_s1 + $0x100c] ss:$16 sps:$4 sm:$0xff]   ;;  %v950_v56 = vcombine.high %v10202_v51, %v10202_v51 }
 0x1c8   :  { %5237 = vmatprep.subr.bf16.mxu0 %v8023_v47  ;;  %5770 = vmatprep.subr.bf16.mxu1 %v8026_v57  ;;  %v932_v47 = vcombine.high %v10009_v48, %v10009_v48  ;;  %v8105_v57 = vld [vmem:[%s11180_s1 + $0x1000] ss:$16 sps:$4 sm:$0xff]   ;;  %v8116_v48 = vld [vmem:[%s11180_s1 + $0x102c] ss:$16 sps:$4 sm:$0xff]  }
 0x1cb   :  { %5238 = vmatpush1.bf16.msra.mxu0 %v8021_v58  ;;  %5771 = vmatpush1.bf16.msra.mxu1 %v8024_v59  ;;  %v8108_v58 = vld [vmem:[%s11180_s1 + $0x1008] ss:$16 sps:$4 sm:$0xff]   ;;  %v8113_v59 = vld [vmem:[%s11180_s1 + $0x1024] ss:$16 sps:$4 sm:$0xff]  }
 0x1cc   :  { %5239 = vmatprep.subr.bf16.mxu0 %v8029_v60  ;;  %5772 = vmatprep.subr.bf16.mxu1 %v8032_v61  ;;  %v10233_v60 = vrot.slane %v950_v56, %v8715_v49  ;;  %v8111_v61 = vld [vmem:[%s11180_s1 + $0x1020] ss:$16 sps:$4 sm:$0xff]   ;;  %v8192_v56 = vld [vmem:[%s11180_s1 + $0x11c8] ss:$16 sps:$4 sm:$0xff]  }
 0x1cf   :  { %5240 = vmatpush1.bf16.msra.mxu0 %v8027_v62  ;;  %5773 = vmatpush1.bf16.msra.mxu1 %v8030_v63  ;;  %v8114_v62 = vld [vmem:[%s11180_s1 + $0x1028] ss:$16 sps:$4 sm:$0xff]   ;;  %v8119_v63 = vld [vmem:[%s11180_s1 + $0x1044] ss:$16 sps:$4 sm:$0xff]  }
 0x1d0   :  { %5241 = vmatprep.subr.bf16.mxu0 %v8035_v0  ;;  %5774 = vmatprep.subr.bf16.mxu1 %v8038_v1  ;;  %v8122_v0 = vld [vmem:[%s11180_s1 + $0x104c] ss:$16 sps:$4 sm:$0xff]   ;;  %v8117_v1 = vld [vmem:[%s11180_s1 + $0x1040] ss:$16 sps:$4 sm:$0xff]  }
 0x1d3   :  { %5242 = vmatpush1.bf16.msra.mxu0 %v8033_v2  ;;  %5775 = vmatpush1.bf16.msra.mxu1 %v8036_v3  ;;  %v8120_v2 = vld [vmem:[%s11180_s1 + $0x1048] ss:$16 sps:$4 sm:$0xff]   ;;  %v8125_v3 = vld [vmem:[%s11180_s1 + $0x1064] ss:$16 sps:$4 sm:$0xff]  }
 0x1d4   :  { %5243 = vmatprep.subr.bf16.mxu0 %v8041_v4  ;;  %5776 = vmatprep.subr.bf16.mxu1 %v8044_v5  ;;  %v8128_v4 = vld [vmem:[%s11180_s1 + $0x106c] ss:$16 sps:$4 sm:$0xff]   ;;  %v8123_v5 = vld [vmem:[%s11180_s1 + $0x1060] ss:$16 sps:$4 sm:$0xff]  }
 0x1d7   :  { %5244 = vmatpush1.bf16.msra.mxu0 %v8039_v6  ;;  %5777 = vmatpush1.bf16.msra.mxu1 %v8042_v7  ;;  %v8126_v6 = vld [vmem:[%s11180_s1 + $0x1068] ss:$16 sps:$4 sm:$0xff]   ;;  %v8131_v7 = vld [vmem:[%s11180_s1 + $0x1084] ss:$16 sps:$4 sm:$0xff]  }
 0x1d8   :  { %5245 = vmatprep.subr.bf16.mxu0 %v8047_v8  ;;  %5778 = vmatprep.subr.bf16.mxu1 %v8050_v9  ;;  %v8134_v8 = vld [vmem:[%s11180_s1 + $0x108c] ss:$16 sps:$4 sm:$0xff]   ;;  %v8129_v9 = vld [vmem:[%s11180_s1 + $0x1080] ss:$16 sps:$4 sm:$0xff]  }
 0x1db   :  { %5246 = vmatpush1.bf16.msra.mxu0 %v8045_v10  ;;  %5779 = vmatpush1.bf16.msra.mxu1 %v8048_v11  ;;  %v8132_v10 = vld [vmem:[%s11180_s1 + $0x1088] ss:$16 sps:$4 sm:$0xff]   ;;  %v8137_v11 = vld [vmem:[%s11180_s1 + $0x10a4] ss:$16 sps:$4 sm:$0xff]  }
 0x1dc   :  { %5247 = vmatprep.subr.bf16.mxu0 %v8053_v12  ;;  %5780 = vmatprep.subr.bf16.mxu1 %v8056_v52  ;;  %v8140_v12 = vld [vmem:[%s11180_s1 + $0x10ac] ss:$16 sps:$4 sm:$0xff]   ;;  %v8135_v52 = vld [vmem:[%s11180_s1 + $0x10a0] ss:$16 sps:$4 sm:$0xff]  }
 0x1df   :  { %5248 = vmatpush1.bf16.msra.mxu0 %v8051_v15  ;;  %5781 = vmatpush1.bf16.msra.mxu1 %v8054_v16  ;;  %v8138_v15 = vld [vmem:[%s11180_s1 + $0x10a8] ss:$16 sps:$4 sm:$0xff]   ;;  %v8143_v16 = vld [vmem:[%s11180_s1 + $0x10c4] ss:$16 sps:$4 sm:$0xff]  }
 0x1e0   :  { %5249 = vmatprep.subr.bf16.mxu0 %v8059_v17  ;;  %5782 = vmatprep.subr.bf16.mxu1 %v8062_v18  ;;  %v8146_v17 = vld [vmem:[%s11180_s1 + $0x10cc] ss:$16 sps:$4 sm:$0xff]   ;;  %v8141_v18 = vld [vmem:[%s11180_s1 + $0x10c0] ss:$16 sps:$4 sm:$0xff]  }
 0x1e3   :  { %5250 = vmatpush1.bf16.msra.mxu0 %v8057_v19  ;;  %5783 = vmatpush1.bf16.msra.mxu1 %v8060_v20  ;;  %v8144_v19 = vld [vmem:[%s11180_s1 + $0x10c8] ss:$16 sps:$4 sm:$0xff]   ;;  %v8149_v20 = vld [vmem:[%s11180_s1 + $0x10e4] ss:$16 sps:$4 sm:$0xff]  }
 0x1e4   :  { %5251 = vmatprep.subr.bf16.mxu0 %v8065_v22  ;;  %5784 = vmatprep.subr.bf16.mxu1 %v8068_v23  ;;  %v8152_v22 = vld [vmem:[%s11180_s1 + $0x10ec] ss:$16 sps:$4 sm:$0xff]   ;;  %v8147_v23 = vld [vmem:[%s11180_s1 + $0x10e0] ss:$16 sps:$4 sm:$0xff]  }
 0x1e7   :  { %5252 = vmatpush1.bf16.msra.mxu0 %v8063_v24  ;;  %5785 = vmatpush1.bf16.msra.mxu1 %v8066_v13  ;;  %v8150_v24 = vld [vmem:[%s11180_s1 + $0x10e8] ss:$16 sps:$4 sm:$0xff]   ;;  %v8155_v13 = vld [vmem:[%s11180_s1 + $0x1104] ss:$16 sps:$4 sm:$0xff]  }
 0x1e8   :  { %5253 = vmatprep.subr.bf16.mxu0 %v8071_v27  ;;  %5786 = vmatprep.subr.bf16.mxu1 %v8074_v28  ;;  %v8158_v27 = vld [vmem:[%s11180_s1 + $0x110c] ss:$16 sps:$4 sm:$0xff]   ;;  %v8153_v28 = vld [vmem:[%s11180_s1 + $0x1100] ss:$16 sps:$4 sm:$0xff]  }
 0x1eb   :  { %5254 = vmatpush1.bf16.msra.mxu0 %v8069_v29  ;;  %5787 = vmatpush1.bf16.msra.mxu1 %v8072_v14  ;;  %v8156_v29 = vld [vmem:[%s11180_s1 + $0x1108] ss:$16 sps:$4 sm:$0xff]   ;;  %v8161_v14 = vld [vmem:[%s11180_s1 + $0x1124] ss:$16 sps:$4 sm:$0xff]  }
 0x1ec   :  { %5255 = vmatprep.subr.bf16.mxu0 %v8077_v30  ;;  %5788 = vmatprep.subr.bf16.mxu1 %v8080_v31  ;;  %v8164_v30 = vld [vmem:[%s11180_s1 + $0x112c] ss:$16 sps:$4 sm:$0xff]   ;;  %v8159_v31 = vld [vmem:[%s11180_s1 + $0x1120] ss:$16 sps:$4 sm:$0xff]  }
 0x1ef   :  { %5256 = vmatpush1.bf16.msra.mxu0 %v8075_v25  ;;  %5789 = vmatpush1.bf16.msra.mxu1 %v8078_v32  ;;  %v8162_v25 = vld [vmem:[%s11180_s1 + $0x1128] ss:$16 sps:$4 sm:$0xff]   ;;  %v8167_v32 = vld [vmem:[%s11180_s1 + $0x1144] ss:$16 sps:$4 sm:$0xff]  }
 0x1f0   :  { %5257 = vmatprep.subr.bf16.mxu0 %v8083_v33  ;;  %5790 = vmatprep.subr.bf16.mxu1 %v8086_v26  ;;  %v8170_v33 = vld [vmem:[%s11180_s1 + $0x114c] ss:$16 sps:$4 sm:$0xff]   ;;  %v8165_v26 = vld [vmem:[%s11180_s1 + $0x1140] ss:$16 sps:$4 sm:$0xff]  }
 0x1f3   :  { %5258 = vmatpush1.bf16.msra.mxu0 %v8081_v36  ;;  %5791 = vmatpush1.bf16.msra.mxu1 %v8084_v37  ;;  %v8168_v36 = vld [vmem:[%s11180_s1 + $0x1148] ss:$16 sps:$4 sm:$0xff]   ;;  %v8173_v37 = vld [vmem:[%s11180_s1 + $0x1164] ss:$16 sps:$4 sm:$0xff]  }
 0x1f4   :  { %5259 = vmatprep.subr.bf16.mxu0 %v8089_v21  ;;  %5792 = vmatprep.subr.bf16.mxu1 %v8092_v39  ;;  %v8176_v21 = vld [vmem:[%s11180_s1 + $0x116c] ss:$16 sps:$4 sm:$0xff]   ;;  %v8171_v39 = vld [vmem:[%s11180_s1 + $0x1160] ss:$16 sps:$4 sm:$0xff]  }
 0x1f7   :  { %5260 = vmatpush1.bf16.msra.mxu0 %v8087_v40  ;;  %5793 = vmatpush1.bf16.msra.mxu1 %v8090_v41  ;;  %v8174_v40 = vld [vmem:[%s11180_s1 + $0x1168] ss:$16 sps:$4 sm:$0xff]   ;;  %v8179_v41 = vld [vmem:[%s11180_s1 + $0x1184] ss:$16 sps:$4 sm:$0xff]  }
 0x1f8   :  { %5261 = vmatprep.subr.bf16.mxu0 %v8095_v34  ;;  %5794 = vmatprep.subr.bf16.mxu1 %v8098_v43  ;;  %v8182_v34 = vld [vmem:[%s11180_s1 + $0x118c] ss:$16 sps:$4 sm:$0xff]   ;;  %v8177_v43 = vld [vmem:[%s11180_s1 + $0x1180] ss:$16 sps:$4 sm:$0xff]  }
 0x1fb   :  { %5262 = vmatpush1.bf16.msra.mxu0 %v8093_v45  ;;  %5795 = vmatpush1.bf16.msra.mxu1 %v8096_v46  ;;  %v8180_v45 = vld [vmem:[%s11180_s1 + $0x1188] ss:$16 sps:$4 sm:$0xff]   ;;  %v8185_v46 = vld [vmem:[%s11180_s1 + $0x11a4] ss:$16 sps:$4 sm:$0xff]  }
 0x1fc   :  { %5263 = vmatprep.subr.bf16.mxu0 %v8101_v35  ;;  %5796 = vmatprep.subr.bf16.mxu1 %v8104_v50  ;;  %v8188_v35 = vld [vmem:[%s11180_s1 + $0x11ac] ss:$16 sps:$4 sm:$0xff]   ;;  %v8183_v50 = vld [vmem:[%s11180_s1 + $0x11a0] ss:$16 sps:$4 sm:$0xff]  }
 0x1ff   :  { %5264 = vmatpush1.bf16.msra.mxu0 %v8099_v53  ;;  %5797 = vmatpush1.bf16.msra.mxu1 %v8102_v38  ;;  %v8186_v53 = vld [vmem:[%s11180_s1 + $0x11a8] ss:$16 sps:$4 sm:$0xff]   ;;  %v8191_v38 = vld [vmem:[%s11180_s1 + $0x11c4] ss:$16 sps:$4 sm:$0xff]  }
 0x200   :  { %5274 = vmatprep.subr.bf16.mxu0 %v8107_v54  ;;  %5807 = vmatprep.subr.bf16.mxu1 %v8110_v55  ;;  %v8194_v54 = vld [vmem:[%s11180_s1 + $0x11cc] ss:$16 sps:$4 sm:$0xff]   ;;  %v8189_v55 = vld [vmem:[%s11180_s1 + $0x11c0] ss:$16 sps:$4 sm:$0xff]  }
 0x202   :  { %5266 = vmatmul.mubr.bf16.vlgmr.msra.gmra.mrb[0].mxu0 %v932_v47  ;;  %5799 = vmatmul.mubr.bf16.vlgmr.msra.gmra.mrb[0].mxu1 %v932_v47  ;;  %v8197_v47 = vld [vmem:[%s11180_s1 + $0x11e4] ss:$16 sps:$4 sm:$0xff]  }
 0x203   :  { %5275 = vmatpush1.bf16.msra.mxu0 %v8105_v57  ;;  %5808 = vmatpush1.bf16.msra.mxu1 %v8108_v58  ;;  %v8200_v57 = vld [vmem:[%s11180_s1 + $0x11ec] ss:$16 sps:$4 sm:$0xff]   ;;  %v8195_v58 = vld [vmem:[%s11180_s1 + $0x11e0] ss:$16 sps:$4 sm:$0xff]  }
 0x204   :  { %5276 = vmatprep.subr.bf16.mxu0 %v8113_v59  ;;  %5809 = vmatprep.subr.bf16.mxu1 %v8116_v48  ;;  %v8198_v59 = vld [vmem:[%s11180_s1 + $0x11e8] ss:$16 sps:$4 sm:$0xff]   ;;  %v8203_v48 = vld [vmem:[%s11180_s1 + $0x1204] ss:$16 sps:$4 sm:$0xff]  }
 0x205   :  { %5306 = vmatprep.mubr.bf16.mxu0 %v10233_v60  ;;  %5839 = vmatprep.mubr.bf16.mxu1 %v10233_v60 }
 0x207   :  { %5277 = vmatpush1.bf16.msra.mxu0 %v8111_v61  ;;  %5810 = vmatpush1.bf16.msra.mxu1 %v8114_v62  ;;  %v8206_v61 = vld [vmem:[%s11180_s1 + $0x120c] ss:$16 sps:$4 sm:$0xff]   ;;  %v10419_v62 = vrot.slane %v10202_v51, %v8715_v49 }
 0x208   :  { %5278 = vmatprep.subr.bf16.mxu0 %v8119_v63  ;;  %5811 = vmatprep.subr.bf16.mxu1 %v8122_v0  ;;  %v8201_v63 = vld [vmem:[%s11180_s1 + $0x1200] ss:$16 sps:$4 sm:$0xff]   ;;  %v8204_v0 = vld [vmem:[%s11180_s1 + $0x1208] ss:$16 sps:$4 sm:$0xff]   ;;  %v8212_v51 = vld [vmem:[%s11180_s1 + $0x122c] ss:$16 sps:$4 sm:$0xff]  }
 0x20b   :  { %5279 = vmatpush1.bf16.msra.mxu0 %v8117_v1  ;;  %5812 = vmatpush1.bf16.msra.mxu1 %v8120_v2  ;;  %v8209_v1 = vld [vmem:[%s11180_s1 + $0x1224] ss:$16 sps:$4 sm:$0xff]   ;;  %v982_v2 = vcombine.high %v10233_v60, %v10233_v60 }
 0x20c   :  { %5280 = vmatprep.subr.bf16.mxu0 %v8125_v3  ;;  %5813 = vmatprep.subr.bf16.mxu1 %v8128_v4  ;;  %v8207_v3 = vld [vmem:[%s11180_s1 + $0x1220] ss:$16 sps:$4 sm:$0xff]   ;;  %v8210_v4 = vld [vmem:[%s11180_s1 + $0x1228] ss:$16 sps:$4 sm:$0xff]   ;;  %v8215_v60 = vld [vmem:[%s11180_s1 + $0x1244] ss:$16 sps:$4 sm:$0xff]  }
 0x20f   :  { %5281 = vmatpush1.bf16.msra.mxu0 %v8123_v5  ;;  %5814 = vmatpush1.bf16.msra.mxu1 %v8126_v6  ;;  %v8218_v5 = vld [vmem:[%s11180_s1 + $0x124c] ss:$16 sps:$4 sm:$0xff]   ;;  %v8213_v6 = vld [vmem:[%s11180_s1 + $0x1240] ss:$16 sps:$4 sm:$0xff]  }
 0x210   :  { %5282 = vmatprep.subr.bf16.mxu0 %v8131_v7  ;;  %5815 = vmatprep.subr.bf16.mxu1 %v8134_v8  ;;  %v8216_v7 = vld [vmem:[%s11180_s1 + $0x1248] ss:$16 sps:$4 sm:$0xff]   ;;  %v8221_v8 = vld [vmem:[%s11180_s1 + $0x1264] ss:$16 sps:$4 sm:$0xff]  }
 0x213   :  { %5283 = vmatpush1.bf16.msra.mxu0 %v8129_v9  ;;  %5816 = vmatpush1.bf16.msra.mxu1 %v8132_v10  ;;  %v8224_v9 = vld [vmem:[%s11180_s1 + $0x126c] ss:$16 sps:$4 sm:$0xff]   ;;  %v8219_v10 = vld [vmem:[%s11180_s1 + $0x1260] ss:$16 sps:$4 sm:$0xff]  }
 0x214   :  { %5284 = vmatprep.subr.bf16.mxu0 %v8137_v11  ;;  %5817 = vmatprep.subr.bf16.mxu1 %v8140_v12  ;;  %v8222_v11 = vld [vmem:[%s11180_s1 + $0x1268] ss:$16 sps:$4 sm:$0xff]   ;;  %v8227_v12 = vld [vmem:[%s11180_s1 + $0x1284] ss:$16 sps:$4 sm:$0xff]  }
 0x217   :  { %5285 = vmatpush1.bf16.msra.mxu0 %v8135_v52  ;;  %5818 = vmatpush1.bf16.msra.mxu1 %v8138_v15  ;;  %v8230_v52 = vld [vmem:[%s11180_s1 + $0x128c] ss:$16 sps:$4 sm:$0xff]   ;;  %v8225_v15 = vld [vmem:[%s11180_s1 + $0x1280] ss:$16 sps:$4 sm:$0xff]  }
 0x218   :  { %5286 = vmatprep.subr.bf16.mxu0 %v8143_v16  ;;  %5819 = vmatprep.subr.bf16.mxu1 %v8146_v17  ;;  %v8228_v16 = vld [vmem:[%s11180_s1 + $0x1288] ss:$16 sps:$4 sm:$0xff]   ;;  %v8233_v17 = vld [vmem:[%s11180_s1 + $0x12a4] ss:$16 sps:$4 sm:$0xff]  }
 0x21b   :  { %5287 = vmatpush1.bf16.msra.mxu0 %v8141_v18  ;;  %5820 = vmatpush1.bf16.msra.mxu1 %v8144_v19  ;;  %v8236_v18 = vld [vmem:[%s11180_s1 + $0x12ac] ss:$16 sps:$4 sm:$0xff]   ;;  %v8231_v19 = vld [vmem:[%s11180_s1 + $0x12a0] ss:$16 sps:$4 sm:$0xff]  }
 0x21c   :  { %5288 = vmatprep.subr.bf16.mxu0 %v8149_v20  ;;  %5821 = vmatprep.subr.bf16.mxu1 %v8152_v22  ;;  %v8234_v20 = vld [vmem:[%s11180_s1 + $0x12a8] ss:$16 sps:$4 sm:$0xff]   ;;  %v8239_v22 = vld [vmem:[%s11180_s1 + $0x12c4] ss:$16 sps:$4 sm:$0xff]  }
 0x21f   :  { %5289 = vmatpush1.bf16.msra.mxu0 %v8147_v23  ;;  %5822 = vmatpush1.bf16.msra.mxu1 %v8150_v24  ;;  %v8242_v23 = vld [vmem:[%s11180_s1 + $0x12cc] ss:$16 sps:$4 sm:$0xff]   ;;  %v8237_v24 = vld [vmem:[%s11180_s1 + $0x12c0] ss:$16 sps:$4 sm:$0xff]  }
 0x220   :  { %5290 = vmatprep.subr.bf16.mxu0 %v8155_v13  ;;  %5823 = vmatprep.subr.bf16.mxu1 %v8158_v27  ;;  %v8240_v13 = vld [vmem:[%s11180_s1 + $0x12c8] ss:$16 sps:$4 sm:$0xff]   ;;  %v8245_v27 = vld [vmem:[%s11180_s1 + $0x12e4] ss:$16 sps:$4 sm:$0xff]  }
 0x223   :  { %5291 = vmatpush1.bf16.msra.mxu0 %v8153_v28  ;;  %5824 = vmatpush1.bf16.msra.mxu1 %v8156_v29  ;;  %v8248_v28 = vld [vmem:[%s11180_s1 + $0x12ec] ss:$16 sps:$4 sm:$0xff]   ;;  %v8243_v29 = vld [vmem:[%s11180_s1 + $0x12e0] ss:$16 sps:$4 sm:$0xff]  }
 0x224   :  { %5292 = vmatprep.subr.bf16.mxu0 %v8161_v14  ;;  %5825 = vmatprep.subr.bf16.mxu1 %v8164_v30  ;;  %v8246_v14 = vld [vmem:[%s11180_s1 + $0x12e8] ss:$16 sps:$4 sm:$0xff]   ;;  %v8251_v30 = vld [vmem:[%s11180_s1 + $0x1304] ss:$16 sps:$4 sm:$0xff]  }
 0x227   :  { %5293 = vmatpush1.bf16.msra.mxu0 %v8159_v31  ;;  %5826 = vmatpush1.bf16.msra.mxu1 %v8162_v25  ;;  %v8254_v31 = vld [vmem:[%s11180_s1 + $0x130c] ss:$16 sps:$4 sm:$0xff]   ;;  %v8249_v25 = vld [vmem:[%s11180_s1 + $0x1300] ss:$16 sps:$4 sm:$0xff]  }
 0x228   :  { %5294 = vmatprep.subr.bf16.mxu0 %v8167_v32  ;;  %5827 = vmatprep.subr.bf16.mxu1 %v8170_v33  ;;  %v8252_v32 = vld [vmem:[%s11180_s1 + $0x1308] ss:$16 sps:$4 sm:$0xff]   ;;  %v8257_v33 = vld [vmem:[%s11180_s1 + $0x1324] ss:$16 sps:$4 sm:$0xff]  }
 0x22b   :  { %5295 = vmatpush1.bf16.msra.mxu0 %v8165_v26  ;;  %5828 = vmatpush1.bf16.msra.mxu1 %v8168_v36  ;;  %v8260_v26 = vld [vmem:[%s11180_s1 + $0x132c] ss:$16 sps:$4 sm:$0xff]   ;;  %v8255_v36 = vld [vmem:[%s11180_s1 + $0x1320] ss:$16 sps:$4 sm:$0xff]  }
 0x22c   :  { %5296 = vmatprep.subr.bf16.mxu0 %v8173_v37  ;;  %5829 = vmatprep.subr.bf16.mxu1 %v8176_v21  ;;  %v8258_v37 = vld [vmem:[%s11180_s1 + $0x1328] ss:$16 sps:$4 sm:$0xff]   ;;  %v8263_v21 = vld [vmem:[%s11180_s1 + $0x1344] ss:$16 sps:$4 sm:$0xff]  }
 0x22f   :  { %5297 = vmatpush1.bf16.msra.mxu0 %v8171_v39  ;;  %5830 = vmatpush1.bf16.msra.mxu1 %v8174_v40  ;;  %v8266_v39 = vld [vmem:[%s11180_s1 + $0x134c] ss:$16 sps:$4 sm:$0xff]   ;;  %v8261_v40 = vld [vmem:[%s11180_s1 + $0x1340] ss:$16 sps:$4 sm:$0xff]  }
 0x230   :  { %5298 = vmatprep.subr.bf16.mxu0 %v8179_v41  ;;  %5831 = vmatprep.subr.bf16.mxu1 %v8182_v34  ;;  %v8264_v41 = vld [vmem:[%s11180_s1 + $0x1348] ss:$16 sps:$4 sm:$0xff]   ;;  %v8269_v34 = vld [vmem:[%s11180_s1 + $0x1364] ss:$16 sps:$4 sm:$0xff]  }
 0x233   :  { %5299 = vmatpush1.bf16.msra.mxu0 %v8177_v43  ;;  %5832 = vmatpush1.bf16.msra.mxu1 %v8180_v45  ;;  %v8272_v43 = vld [vmem:[%s11180_s1 + $0x136c] ss:$16 sps:$4 sm:$0xff]   ;;  %v8267_v45 = vld [vmem:[%s11180_s1 + $0x1360] ss:$16 sps:$4 sm:$0xff]  }
 0x234   :  { %5300 = vmatprep.subr.bf16.mxu0 %v8185_v46  ;;  %5833 = vmatprep.subr.bf16.mxu1 %v8188_v35  ;;  %v8270_v46 = vld [vmem:[%s11180_s1 + $0x1368] ss:$16 sps:$4 sm:$0xff]   ;;  %v8275_v35 = vld [vmem:[%s11180_s1 + $0x1384] ss:$16 sps:$4 sm:$0xff]  }
 0x237   :  { %5301 = vmatpush1.bf16.msra.mxu0 %v8183_v50  ;;  %5834 = vmatpush1.bf16.msra.mxu1 %v8186_v53  ;;  %v8278_v50 = vld [vmem:[%s11180_s1 + $0x138c] ss:$16 sps:$4 sm:$0xff]   ;;  %v8273_v53 = vld [vmem:[%s11180_s1 + $0x1380] ss:$16 sps:$4 sm:$0xff]  }
 0x238   :  { %5302 = vmatprep.subr.bf16.mxu0 %v8191_v38  ;;  %5835 = vmatprep.subr.bf16.mxu1 %v8194_v54  ;;  %v8276_v38 = vld [vmem:[%s11180_s1 + $0x1388] ss:$16 sps:$4 sm:$0xff]   ;;  %v8281_v54 = vld [vmem:[%s11180_s1 + $0x13a4] ss:$16 sps:$4 sm:$0xff]  }
 0x23b   :  { %5303 = vmatpush1.bf16.msra.mxu0 %v8189_v55  ;;  %5836 = vmatpush1.bf16.msra.mxu1 %v8192_v56  ;;  %v8284_v55 = vld [vmem:[%s11180_s1 + $0x13ac] ss:$16 sps:$4 sm:$0xff]   ;;  %v8279_v56 = vld [vmem:[%s11180_s1 + $0x13a0] ss:$16 sps:$4 sm:$0xff]  }
 0x23c   :  { %5304 = vmatprep.subr.bf16.mxu0 %v8197_v47  ;;  %5837 = vmatprep.subr.bf16.mxu1 %v8200_v57  ;;  %v8282_v47 = vld [vmem:[%s11180_s1 + $0x13a8] ss:$16 sps:$4 sm:$0xff]   ;;  %v8287_v57 = vld [vmem:[%s11180_s1 + $0x13c4] ss:$16 sps:$4 sm:$0xff]  }
 0x23f   :  { %5305 = vmatpush1.bf16.msra.mxu0 %v8195_v58  ;;  %5838 = vmatpush1.bf16.msra.mxu1 %v8198_v59  ;;  %v8290_v58 = vld [vmem:[%s11180_s1 + $0x13cc] ss:$16 sps:$4 sm:$0xff]   ;;  %v935_v59 = vcombine.high %v10186_v44, %v10186_v44 }
 0x240   :  { %5315 = vmatprep.subr.bf16.mxu0 %v8203_v48  ;;  %5848 = vmatprep.subr.bf16.mxu1 %v8206_v61  ;;  %v8285_v48 = vld [vmem:[%s11180_s1 + $0x13c0] ss:$16 sps:$4 sm:$0xff]   ;;  %v8288_v61 = vld [vmem:[%s11180_s1 + $0x13c8] ss:$16 sps:$4 sm:$0xff]   ;;  %v8296_v44 = vld [vmem:[%s11180_s1 + $0x13ec] ss:$16 sps:$4 sm:$0xff]  }
 0x242   :  { %5307 = vmatmul.mubr.bf16.vlgmr.msra.gmra.mrb[0].mxu0 %v10419_v62  ;;  %5840 = vmatmul.mubr.bf16.vlgmr.msra.gmra.mrb[0].mxu1 %v10419_v62 }
 0x243   :  { %5316 = vmatpush1.bf16.msra.mxu0 %v8201_v63  ;;  %5849 = vmatpush1.bf16.msra.mxu1 %v8204_v0  ;;  %v8293_v63 = vld [vmem:[%s11180_s1 + $0x13e4] ss:$16 sps:$4 sm:$0xff]   ;;  %v10608_v0 = vrot.slane %v935_v59, %v8715_v49  ;;  %v8372_v59 = vld [vmem:[%s11180_s1 + $0x1588] ss:$16 sps:$4 sm:$0xff]  }
 0x244   :  { %5317 = vmatprep.subr.bf16.mxu0 %v8209_v1  ;;  %5850 = vmatprep.subr.bf16.mxu1 %v8212_v51  ;;  %v8291_v1 = vld [vmem:[%s11180_s1 + $0x13e0] ss:$16 sps:$4 sm:$0xff]   ;;  %v8294_v51 = vld [vmem:[%s11180_s1 + $0x13e8] ss:$16 sps:$4 sm:$0xff]  }
 0x245   :  { %5347 = vmatprep.mubr.bf16.mxu0 %v982_v2  ;;  %5880 = vmatprep.mubr.bf16.mxu1 %v982_v2  ;;  %v8299_v2 = vld [vmem:[%s11180_s1 + $0x1404] ss:$16 sps:$4 sm:$0xff]  }
 0x247   :  { %5318 = vmatpush1.bf16.msra.mxu0 %v8207_v3  ;;  %5851 = vmatpush1.bf16.msra.mxu1 %v8210_v4  ;;  %v8302_v3 = vld [vmem:[%s11180_s1 + $0x140c] ss:$16 sps:$4 sm:$0xff]   ;;  %v951_v4 = vcombine.high %v10608_v0, %v10608_v0 }
 0x248   :  { %5319 = vmatprep.subr.bf16.mxu0 %v8215_v60  ;;  %5852 = vmatprep.subr.bf16.mxu1 %v8218_v5  ;;  %v980_v60 = vcombine.high %v10419_v62, %v10419_v62  ;;  %v8297_v5 = vld [vmem:[%s11180_s1 + $0x1400] ss:$16 sps:$4 sm:$0xff]   ;;  %v8308_v62 = vld [vmem:[%s11180_s1 + $0x142c] ss:$16 sps:$4 sm:$0xff]  }
 0x24b   :  { %5320 = vmatpush1.bf16.msra.mxu0 %v8213_v6  ;;  %5853 = vmatpush1.bf16.msra.mxu1 %v8216_v7  ;;  %v8300_v6 = vld [vmem:[%s11180_s1 + $0x1408] ss:$16 sps:$4 sm:$0xff]   ;;  %v8305_v7 = vld [vmem:[%s11180_s1 + $0x1424] ss:$16 sps:$4 sm:$0xff]  }
 0x24c   :  { %5321 = vmatprep.subr.bf16.mxu0 %v8221_v8  ;;  %5854 = vmatprep.subr.bf16.mxu1 %v8224_v9  ;;  %v10639_v8 = vrot.slane %v951_v4, %v8715_v49  ;;  %v8303_v9 = vld [vmem:[%s11180_s1 + $0x1420] ss:$16 sps:$4 sm:$0xff]   ;;  %v8389_v4 = vld [vmem:[%s11180_s1 + $0x15e4] ss:$16 sps:$4 sm:$0xff]  }
 0x24f   :  { %5322 = vmatpush1.bf16.msra.mxu0 %v8219_v10  ;;  %5855 = vmatpush1.bf16.msra.mxu1 %v8222_v11  ;;  %v8306_v10 = vld [vmem:[%s11180_s1 + $0x1428] ss:$16 sps:$4 sm:$0xff]   ;;  %v8311_v11 = vld [vmem:[%s11180_s1 + $0x1444] ss:$16 sps:$4 sm:$0xff]  }
 0x250   :  { %5323 = vmatprep.subr.bf16.mxu0 %v8227_v12  ;;  %5856 = vmatprep.subr.bf16.mxu1 %v8230_v52  ;;  %v8314_v12 = vld [vmem:[%s11180_s1 + $0x144c] ss:$16 sps:$4 sm:$0xff]   ;;  %v8309_v52 = vld [vmem:[%s11180_s1 + $0x1440] ss:$16 sps:$4 sm:$0xff]  }
 0x253   :  { %5324 = vmatpush1.bf16.msra.mxu0 %v8225_v15  ;;  %5857 = vmatpush1.bf16.msra.mxu1 %v8228_v16  ;;  %v8312_v15 = vld [vmem:[%s11180_s1 + $0x1448] ss:$16 sps:$4 sm:$0xff]   ;;  %v8317_v16 = vld [vmem:[%s11180_s1 + $0x1464] ss:$16 sps:$4 sm:$0xff]  }
 0x254   :  { %5325 = vmatprep.subr.bf16.mxu0 %v8233_v17  ;;  %5858 = vmatprep.subr.bf16.mxu1 %v8236_v18  ;;  %v8320_v17 = vld [vmem:[%s11180_s1 + $0x146c] ss:$16 sps:$4 sm:$0xff]   ;;  %v8315_v18 = vld [vmem:[%s11180_s1 + $0x1460] ss:$16 sps:$4 sm:$0xff]  }
 0x257   :  { %5326 = vmatpush1.bf16.msra.mxu0 %v8231_v19  ;;  %5859 = vmatpush1.bf16.msra.mxu1 %v8234_v20  ;;  %v8318_v19 = vld [vmem:[%s11180_s1 + $0x1468] ss:$16 sps:$4 sm:$0xff]   ;;  %v8323_v20 = vld [vmem:[%s11180_s1 + $0x1484] ss:$16 sps:$4 sm:$0xff]  }
 0x258   :  { %5327 = vmatprep.subr.bf16.mxu0 %v8239_v22  ;;  %5860 = vmatprep.subr.bf16.mxu1 %v8242_v23  ;;  %v8326_v22 = vld [vmem:[%s11180_s1 + $0x148c] ss:$16 sps:$4 sm:$0xff]   ;;  %v8321_v23 = vld [vmem:[%s11180_s1 + $0x1480] ss:$16 sps:$4 sm:$0xff]  }
 0x25b   :  { %5328 = vmatpush1.bf16.msra.mxu0 %v8237_v24  ;;  %5861 = vmatpush1.bf16.msra.mxu1 %v8240_v13  ;;  %v8324_v24 = vld [vmem:[%s11180_s1 + $0x1488] ss:$16 sps:$4 sm:$0xff]   ;;  %v8329_v13 = vld [vmem:[%s11180_s1 + $0x14a4] ss:$16 sps:$4 sm:$0xff]  }
 0x25c   :  { %5329 = vmatprep.subr.bf16.mxu0 %v8245_v27  ;;  %5862 = vmatprep.subr.bf16.mxu1 %v8248_v28  ;;  %v8332_v27 = vld [vmem:[%s11180_s1 + $0x14ac] ss:$16 sps:$4 sm:$0xff]   ;;  %v8327_v28 = vld [vmem:[%s11180_s1 + $0x14a0] ss:$16 sps:$4 sm:$0xff]  }
 0x25f   :  { %5330 = vmatpush1.bf16.msra.mxu0 %v8243_v29  ;;  %5863 = vmatpush1.bf16.msra.mxu1 %v8246_v14  ;;  %v8330_v29 = vld [vmem:[%s11180_s1 + $0x14a8] ss:$16 sps:$4 sm:$0xff]   ;;  %v8335_v14 = vld [vmem:[%s11180_s1 + $0x14c4] ss:$16 sps:$4 sm:$0xff]  }
 0x260   :  { %5331 = vmatprep.subr.bf16.mxu0 %v8251_v30  ;;  %5864 = vmatprep.subr.bf16.mxu1 %v8254_v31  ;;  %v8338_v30 = vld [vmem:[%s11180_s1 + $0x14cc] ss:$16 sps:$4 sm:$0xff]   ;;  %v8333_v31 = vld [vmem:[%s11180_s1 + $0x14c0] ss:$16 sps:$4 sm:$0xff]  }
 0x263   :  { %5332 = vmatpush1.bf16.msra.mxu0 %v8249_v25  ;;  %5865 = vmatpush1.bf16.msra.mxu1 %v8252_v32  ;;  %v8336_v25 = vld [vmem:[%s11180_s1 + $0x14c8] ss:$16 sps:$4 sm:$0xff]   ;;  %v8341_v32 = vld [vmem:[%s11180_s1 + $0x14e4] ss:$16 sps:$4 sm:$0xff]  }
 0x264   :  { %5333 = vmatprep.subr.bf16.mxu0 %v8257_v33  ;;  %5866 = vmatprep.subr.bf16.mxu1 %v8260_v26  ;;  %v8344_v33 = vld [vmem:[%s11180_s1 + $0x14ec] ss:$16 sps:$4 sm:$0xff]   ;;  %v8339_v26 = vld [vmem:[%s11180_s1 + $0x14e0] ss:$16 sps:$4 sm:$0xff]  }
 0x267   :  { %5334 = vmatpush1.bf16.msra.mxu0 %v8255_v36  ;;  %5867 = vmatpush1.bf16.msra.mxu1 %v8258_v37  ;;  %v8342_v36 = vld [vmem:[%s11180_s1 + $0x14e8] ss:$16 sps:$4 sm:$0xff]   ;;  %v8347_v37 = vld [vmem:[%s11180_s1 + $0x1504] ss:$16 sps:$4 sm:$0xff]  }
 0x268   :  { %5335 = vmatprep.subr.bf16.mxu0 %v8263_v21  ;;  %5868 = vmatprep.subr.bf16.mxu1 %v8266_v39  ;;  %v8350_v21 = vld [vmem:[%s11180_s1 + $0x150c] ss:$16 sps:$4 sm:$0xff]   ;;  %v8345_v39 = vld [vmem:[%s11180_s1 + $0x1500] ss:$16 sps:$4 sm:$0xff]  }
 0x26b   :  { %5336 = vmatpush1.bf16.msra.mxu0 %v8261_v40  ;;  %5869 = vmatpush1.bf16.msra.mxu1 %v8264_v41  ;;  %v8348_v40 = vld [vmem:[%s11180_s1 + $0x1508] ss:$16 sps:$4 sm:$0xff]   ;;  %v8353_v41 = vld [vmem:[%s11180_s1 + $0x1524] ss:$16 sps:$4 sm:$0xff]  }
 0x26c   :  { %5337 = vmatprep.subr.bf16.mxu0 %v8269_v34  ;;  %5870 = vmatprep.subr.bf16.mxu1 %v8272_v43  ;;  %v8356_v34 = vld [vmem:[%s11180_s1 + $0x152c] ss:$16 sps:$4 sm:$0xff]   ;;  %v8351_v43 = vld [vmem:[%s11180_s1 + $0x1520] ss:$16 sps:$4 sm:$0xff]  }
 0x26f   :  { %5338 = vmatpush1.bf16.msra.mxu0 %v8267_v45  ;;  %5871 = vmatpush1.bf16.msra.mxu1 %v8270_v46  ;;  %v8354_v45 = vld [vmem:[%s11180_s1 + $0x1528] ss:$16 sps:$4 sm:$0xff]   ;;  %v8359_v46 = vld [vmem:[%s11180_s1 + $0x1544] ss:$16 sps:$4 sm:$0xff]  }
 0x270   :  { %5339 = vmatprep.subr.bf16.mxu0 %v8275_v35  ;;  %5872 = vmatprep.subr.bf16.mxu1 %v8278_v50  ;;  %v8362_v35 = vld [vmem:[%s11180_s1 + $0x154c] ss:$16 sps:$4 sm:$0xff]   ;;  %v8357_v50 = vld [vmem:[%s11180_s1 + $0x1540] ss:$16 sps:$4 sm:$0xff]  }
 0x273   :  { %5340 = vmatpush1.bf16.msra.mxu0 %v8273_v53  ;;  %5873 = vmatpush1.bf16.msra.mxu1 %v8276_v38  ;;  %v8360_v53 = vld [vmem:[%s11180_s1 + $0x1548] ss:$16 sps:$4 sm:$0xff]   ;;  %v8365_v38 = vld [vmem:[%s11180_s1 + $0x1564] ss:$16 sps:$4 sm:$0xff]  }
 0x274   :  { %5341 = vmatprep.subr.bf16.mxu0 %v8281_v54  ;;  %5874 = vmatprep.subr.bf16.mxu1 %v8284_v55  ;;  %v8368_v54 = vld [vmem:[%s11180_s1 + $0x156c] ss:$16 sps:$4 sm:$0xff]   ;;  %v8363_v55 = vld [vmem:[%s11180_s1 + $0x1560] ss:$16 sps:$4 sm:$0xff]  }
 0x277   :  { %5342 = vmatpush1.bf16.msra.mxu0 %v8279_v56  ;;  %5875 = vmatpush1.bf16.msra.mxu1 %v8282_v47  ;;  %v8366_v56 = vld [vmem:[%s11180_s1 + $0x1568] ss:$16 sps:$4 sm:$0xff]   ;;  %v8371_v47 = vld [vmem:[%s11180_s1 + $0x1584] ss:$16 sps:$4 sm:$0xff]  }
 0x278   :  { %5343 = vmatprep.subr.bf16.mxu0 %v8287_v57  ;;  %5876 = vmatprep.subr.bf16.mxu1 %v8290_v58  ;;  %v8374_v57 = vld [vmem:[%s11180_s1 + $0x158c] ss:$16 sps:$4 sm:$0xff]   ;;  %v8369_v58 = vld [vmem:[%s11180_s1 + $0x1580] ss:$16 sps:$4 sm:$0xff]  }
 0x27b   :  { %5344 = vmatpush1.bf16.msra.mxu0 %v8285_v48  ;;  %5877 = vmatpush1.bf16.msra.mxu1 %v8288_v61  ;;  %v8377_v48 = vld [vmem:[%s11180_s1 + $0x15a4] ss:$16 sps:$4 sm:$0xff]   ;;  %v8380_v61 = vld [vmem:[%s11180_s1 + $0x15ac] ss:$16 sps:$4 sm:$0xff]  }
 0x27c   :  { %5345 = vmatprep.subr.bf16.mxu0 %v8293_v63  ;;  %5878 = vmatprep.subr.bf16.mxu1 %v8296_v44  ;;  %v8375_v63 = vld [vmem:[%s11180_s1 + $0x15a0] ss:$16 sps:$4 sm:$0xff]   ;;  %v8378_v44 = vld [vmem:[%s11180_s1 + $0x15a8] ss:$16 sps:$4 sm:$0xff]  }
 0x27f   :  { %5346 = vmatpush1.bf16.msra.mxu0 %v8291_v1  ;;  %5879 = vmatpush1.bf16.msra.mxu1 %v8294_v51  ;;  %v8383_v1 = vld [vmem:[%s11180_s1 + $0x15c4] ss:$16 sps:$4 sm:$0xff]   ;;  %v8386_v51 = vld [vmem:[%s11180_s1 + $0x15cc] ss:$16 sps:$4 sm:$0xff]  }
 0x280   :  { %5356 = vmatprep.subr.bf16.mxu0 %v8299_v2  ;;  %5889 = vmatprep.subr.bf16.mxu1 %v8302_v3  ;;  %v8381_v2 = vld [vmem:[%s11180_s1 + $0x15c0] ss:$16 sps:$4 sm:$0xff]   ;;  %v8384_v3 = vld [vmem:[%s11180_s1 + $0x15c8] ss:$16 sps:$4 sm:$0xff]  }
 0x282   :  { %5348 = vmatmul.mubr.bf16.vlgmr.msra.gmra.mrb[0].mxu0 %v980_v60  ;;  %5881 = vmatmul.mubr.bf16.vlgmr.msra.gmra.mrb[0].mxu1 %v980_v60  ;;  %v8392_v60 = vld [vmem:[%s11180_s1 + $0x15ec] ss:$16 sps:$4 sm:$0xff]  }
 0x283   :  { %5357 = vmatpush1.bf16.msra.mxu0 %v8297_v5  ;;  %5890 = vmatpush1.bf16.msra.mxu1 %v8300_v6  ;;  %v8387_v5 = vld [vmem:[%s11180_s1 + $0x15e0] ss:$16 sps:$4 sm:$0xff]   ;;  %v8390_v6 = vld [vmem:[%s11180_s1 + $0x15e8] ss:$16 sps:$4 sm:$0xff]  }
 0x284   :  { %5358 = vmatprep.subr.bf16.mxu0 %v8305_v7  ;;  %5891 = vmatprep.subr.bf16.mxu1 %v8308_v62  ;;  %v8396_v7 = vld [vmem:[%s11180_s1 + $0x1604] ss:$16 sps:$4 sm:$0xff]   ;;  %v8399_v62 = vld [vmem:[%s11180_s1 + $0x160c] ss:$16 sps:$4 sm:$0xff]  }
 0x285   :  { %5388 = vmatprep.mubr.bf16.mxu0 %v10639_v8  ;;  %5921 = vmatprep.mubr.bf16.mxu1 %v10639_v8 }
 0x287   :  { %5359 = vmatpush1.bf16.msra.mxu0 %v8303_v9  ;;  %5892 = vmatpush1.bf16.msra.mxu1 %v8306_v10  ;;  %v10825_v9 = vrot.slane %v10608_v0, %v8715_v49  ;;  %v8394_v10 = vld [vmem:[%s11180_s1 + $0x1600] ss:$16 sps:$4 sm:$0xff]   ;;  %v8405_v0 = vld [vmem:[%s11180_s1 + $0x162c] ss:$16 sps:$4 sm:$0xff]  }
 0x288   :  { %5360 = vmatprep.subr.bf16.mxu0 %v8311_v11  ;;  %5893 = vmatprep.subr.bf16.mxu1 %v8314_v12  ;;  %v8397_v11 = vld [vmem:[%s11180_s1 + $0x1608] ss:$16 sps:$4 sm:$0xff]   ;;  %v8402_v12 = vld [vmem:[%s11180_s1 + $0x1624] ss:$16 sps:$4 sm:$0xff]  }
 0x28b   :  { %5361 = vmatpush1.bf16.msra.mxu0 %v8309_v52  ;;  %5894 = vmatpush1.bf16.msra.mxu1 %v8312_v15  ;;  %v983_v52 = vcombine.high %v10639_v8, %v10639_v8  ;;  %v8400_v15 = vld [vmem:[%s11180_s1 + $0x1620] ss:$16 sps:$4 sm:$0xff]   ;;  %v8408_v8 = vld [vmem:[%s11180_s1 + $0x1644] ss:$16 sps:$4 sm:$0xff]  }
 0x28c   :  { %5362 = vmatprep.subr.bf16.mxu0 %v8317_v16  ;;  %5895 = vmatprep.subr.bf16.mxu1 %v8320_v17  ;;  %v8403_v16 = vld [vmem:[%s11180_s1 + $0x1628] ss:$16 sps:$4 sm:$0xff]   ;;  %v8411_v17 = vld [vmem:[%s11180_s1 + $0x164c] ss:$16 sps:$4 sm:$0xff]  }
 0x28f   :  { %5363 = vmatpush1.bf16.msra.mxu0 %v8315_v18  ;;  %5896 = vmatpush1.bf16.msra.mxu1 %v8318_v19  ;;  %v8406_v18 = vld [vmem:[%s11180_s1 + $0x1640] ss:$16 sps:$4 sm:$0xff]   ;;  %v8409_v19 = vld [vmem:[%s11180_s1 + $0x1648] ss:$16 sps:$4 sm:$0xff]  }
 0x290   :  { %5364 = vmatprep.subr.bf16.mxu0 %v8323_v20  ;;  %5897 = vmatprep.subr.bf16.mxu1 %v8326_v22  ;;  %v8414_v20 = vld [vmem:[%s11180_s1 + $0x1664] ss:$16 sps:$4 sm:$0xff]   ;;  %v8417_v22 = vld [vmem:[%s11180_s1 + $0x166c] ss:$16 sps:$4 sm:$0xff]  }
 0x293   :  { %5365 = vmatpush1.bf16.msra.mxu0 %v8321_v23  ;;  %5898 = vmatpush1.bf16.msra.mxu1 %v8324_v24  ;;  %v8412_v23 = vld [vmem:[%s11180_s1 + $0x1660] ss:$16 sps:$4 sm:$0xff]   ;;  %v8415_v24 = vld [vmem:[%s11180_s1 + $0x1668] ss:$16 sps:$4 sm:$0xff]  }
 0x294   :  { %5366 = vmatprep.subr.bf16.mxu0 %v8329_v13  ;;  %5899 = vmatprep.subr.bf16.mxu1 %v8332_v27  ;;  %v8420_v13 = vld [vmem:[%s11180_s1 + $0x1684] ss:$16 sps:$4 sm:$0xff]   ;;  %v8423_v27 = vld [vmem:[%s11180_s1 + $0x168c] ss:$16 sps:$4 sm:$0xff]  }
 0x297   :  { %5367 = vmatpush1.bf16.msra.mxu0 %v8327_v28  ;;  %5900 = vmatpush1.bf16.msra.mxu1 %v8330_v29  ;;  %v8418_v28 = vld [vmem:[%s11180_s1 + $0x1680] ss:$16 sps:$4 sm:$0xff]   ;;  %v8421_v29 = vld [vmem:[%s11180_s1 + $0x1688] ss:$16 sps:$4 sm:$0xff]  }
 0x298   :  { %5368 = vmatprep.subr.bf16.mxu0 %v8335_v14  ;;  %5901 = vmatprep.subr.bf16.mxu1 %v8338_v30  ;;  %v8426_v14 = vld [vmem:[%s11180_s1 + $0x16a4] ss:$16 sps:$4 sm:$0xff]   ;;  %v8429_v30 = vld [vmem:[%s11180_s1 + $0x16ac] ss:$16 sps:$4 sm:$0xff]  }
 0x29b   :  { %5369 = vmatpush1.bf16.msra.mxu0 %v8333_v31  ;;  %5902 = vmatpush1.bf16.msra.mxu1 %v8336_v25  ;;  %v8424_v31 = vld [vmem:[%s11180_s1 + $0x16a0] ss:$16 sps:$4 sm:$0xff]   ;;  %v8427_v25 = vld [vmem:[%s11180_s1 + $0x16a8] ss:$16 sps:$4 sm:$0xff]  }
 0x29c   :  { %5370 = vmatprep.subr.bf16.mxu0 %v8341_v32  ;;  %5903 = vmatprep.subr.bf16.mxu1 %v8344_v33  ;;  %v8432_v32 = vld [vmem:[%s11180_s1 + $0x16c4] ss:$16 sps:$4 sm:$0xff]   ;;  %v8435_v33 = vld [vmem:[%s11180_s1 + $0x16cc] ss:$16 sps:$4 sm:$0xff]  }
 0x29f   :  { %5371 = vmatpush1.bf16.msra.mxu0 %v8339_v26  ;;  %5904 = vmatpush1.bf16.msra.mxu1 %v8342_v36  ;;  %v8430_v26 = vld [vmem:[%s11180_s1 + $0x16c0] ss:$16 sps:$4 sm:$0xff]   ;;  %v8433_v36 = vld [vmem:[%s11180_s1 + $0x16c8] ss:$16 sps:$4 sm:$0xff]  }
 0x2a0   :  { %5372 = vmatprep.subr.bf16.mxu0 %v8347_v37  ;;  %5905 = vmatprep.subr.bf16.mxu1 %v8350_v21  ;;  %v8438_v37 = vld [vmem:[%s11180_s1 + $0x16e4] ss:$16 sps:$4 sm:$0xff]   ;;  %v8441_v21 = vld [vmem:[%s11180_s1 + $0x16ec] ss:$16 sps:$4 sm:$0xff]  }
 0x2a3   :  { %5373 = vmatpush1.bf16.msra.mxu0 %v8345_v39  ;;  %5906 = vmatpush1.bf16.msra.mxu1 %v8348_v40  ;;  %v8436_v39 = vld [vmem:[%s11180_s1 + $0x16e0] ss:$16 sps:$4 sm:$0xff]   ;;  %v8439_v40 = vld [vmem:[%s11180_s1 + $0x16e8] ss:$16 sps:$4 sm:$0xff]  }
 0x2a4   :  { %5374 = vmatprep.subr.bf16.mxu0 %v8353_v41  ;;  %5907 = vmatprep.subr.bf16.mxu1 %v8356_v34  ;;  %v8444_v41 = vld [vmem:[%s11180_s1 + $0x1704] ss:$16 sps:$4 sm:$0xff]   ;;  %v8447_v34 = vld [vmem:[%s11180_s1 + $0x170c] ss:$16 sps:$4 sm:$0xff]  }
 0x2a7   :  { %5375 = vmatpush1.bf16.msra.mxu0 %v8351_v43  ;;  %5908 = vmatpush1.bf16.msra.mxu1 %v8354_v45  ;;  %v8442_v43 = vld [vmem:[%s11180_s1 + $0x1700] ss:$16 sps:$4 sm:$0xff]   ;;  %v8445_v45 = vld [vmem:[%s11180_s1 + $0x1708] ss:$16 sps:$4 sm:$0xff]  }
 0x2a8   :  { %5376 = vmatprep.subr.bf16.mxu0 %v8359_v46  ;;  %5909 = vmatprep.subr.bf16.mxu1 %v8362_v35  ;;  %v8450_v46 = vld [vmem:[%s11180_s1 + $0x1724] ss:$16 sps:$4 sm:$0xff]   ;;  %v8453_v35 = vld [vmem:[%s11180_s1 + $0x172c] ss:$16 sps:$4 sm:$0xff]  }
 0x2ab   :  { %5377 = vmatpush1.bf16.msra.mxu0 %v8357_v50  ;;  %5910 = vmatpush1.bf16.msra.mxu1 %v8360_v53  ;;  %v8448_v50 = vld [vmem:[%s11180_s1 + $0x1720] ss:$16 sps:$4 sm:$0xff]   ;;  %v8451_v53 = vld [vmem:[%s11180_s1 + $0x1728] ss:$16 sps:$4 sm:$0xff]  }
 0x2ac   :  { %5378 = vmatprep.subr.bf16.mxu0 %v8365_v38  ;;  %5911 = vmatprep.subr.bf16.mxu1 %v8368_v54  ;;  %v8456_v38 = vld [vmem:[%s11180_s1 + $0x1744] ss:$16 sps:$4 sm:$0xff]   ;;  %v8459_v54 = vld [vmem:[%s11180_s1 + $0x174c] ss:$16 sps:$4 sm:$0xff]  }
 0x2af   :  { %5379 = vmatpush1.bf16.msra.mxu0 %v8363_v55  ;;  %5912 = vmatpush1.bf16.msra.mxu1 %v8366_v56  ;;  %v8454_v55 = vld [vmem:[%s11180_s1 + $0x1740] ss:$16 sps:$4 sm:$0xff]   ;;  %v8457_v56 = vld [vmem:[%s11180_s1 + $0x1748] ss:$16 sps:$4 sm:$0xff]  }
 0x2b0   :  { %5380 = vmatprep.subr.bf16.mxu0 %v8371_v47  ;;  %5913 = vmatprep.subr.bf16.mxu1 %v8374_v57  ;;  %v8462_v47 = vld [vmem:[%s11180_s1 + $0x1764] ss:$16 sps:$4 sm:$0xff]   ;;  %v8465_v57 = vld [vmem:[%s11180_s1 + $0x176c] ss:$16 sps:$4 sm:$0xff]  }
 0x2b3   :  { %5381 = vmatpush1.bf16.msra.mxu0 %v8369_v58  ;;  %5914 = vmatpush1.bf16.msra.mxu1 %v8372_v59  ;;  %v8460_v58 = vld [vmem:[%s11180_s1 + $0x1760] ss:$16 sps:$4 sm:$0xff]   ;;  %v8463_v59 = vld [vmem:[%s11180_s1 + $0x1768] ss:$16 sps:$4 sm:$0xff]  }
 0x2b4   :  { %5382 = vmatprep.subr.bf16.mxu0 %v8377_v48  ;;  %5915 = vmatprep.subr.bf16.mxu1 %v8380_v61  ;;  %v8468_v48 = vld [vmem:[%s11180_s1 + $0x1784] ss:$16 sps:$4 sm:$0xff]   ;;  %v8471_v61 = vld [vmem:[%s11180_s1 + $0x178c] ss:$16 sps:$4 sm:$0xff]  }
 0x2b7   :  { %5383 = vmatpush1.bf16.msra.mxu0 %v8375_v63  ;;  %5916 = vmatpush1.bf16.msra.mxu1 %v8378_v44  ;;  %v8466_v63 = vld [vmem:[%s11180_s1 + $0x1780] ss:$16 sps:$4 sm:$0xff]   ;;  %v8469_v44 = vld [vmem:[%s11180_s1 + $0x1788] ss:$16 sps:$4 sm:$0xff]  }
 0x2b8   :  { %5384 = vmatprep.subr.bf16.mxu0 %v8383_v1  ;;  %5917 = vmatprep.subr.bf16.mxu1 %v8386_v51  ;;  %v8474_v1 = vld [vmem:[%s11180_s1 + $0x17a4] ss:$16 sps:$4 sm:$0xff]   ;;  %v8477_v51 = vld [vmem:[%s11180_s1 + $0x17ac] ss:$16 sps:$4 sm:$0xff]  }
 0x2bb   :  { %5385 = vmatpush1.bf16.msra.mxu0 %v8381_v2  ;;  %5918 = vmatpush1.bf16.msra.mxu1 %v8384_v3  ;;  %v8472_v2 = vld [vmem:[%s11180_s1 + $0x17a0] ss:$16 sps:$4 sm:$0xff]   ;;  %v8475_v3 = vld [vmem:[%s11180_s1 + $0x17a8] ss:$16 sps:$4 sm:$0xff]  }
 0x2bc   :  { %5386 = vmatprep.subr.bf16.mxu0 %v8389_v4  ;;  %5919 = vmatprep.subr.bf16.mxu1 %v8392_v60  ;;  %v8480_v4 = vld [vmem:[%s11180_s1 + $0x17c4] ss:$16 sps:$4 sm:$0xff]   ;;  %v8483_v60 = vld [vmem:[%s11180_s1 + $0x17cc] ss:$16 sps:$4 sm:$0xff]  }
 0x2bf   :  { %5387 = vmatpush1.bf16.msra.mxu0 %v8387_v5  ;;  %5920 = vmatpush1.bf16.msra.mxu1 %v8390_v6  ;;  %v8478_v5 = vld [vmem:[%s11180_s1 + $0x17c0] ss:$16 sps:$4 sm:$0xff]   ;;  %v8481_v6 = vld [vmem:[%s11180_s1 + $0x17c8] ss:$16 sps:$4 sm:$0xff]  }
 0x2c0   :  { %5397 = vmatprep.subr.bf16.mxu0 %v8396_v7  ;;  %5930 = vmatprep.subr.bf16.mxu1 %v8399_v62  ;;  %v8486_v7 = vld [vmem:[%s11180_s1 + $0x17e4] ss:$16 sps:$4 sm:$0xff]   ;;  %v8489_v62 = vld [vmem:[%s11180_s1 + $0x17ec] ss:$16 sps:$4 sm:$0xff]  }
 0x2c2   :  { %5389 = vmatmul.mubr.bf16.vlgmr.msra.gmra.mrb[0].mxu0 %v10825_v9  ;;  %5922 = vmatmul.mubr.bf16.vlgmr.msra.gmra.mrb[0].mxu1 %v10825_v9 }
 0x2c3   :  { %5398 = vmatpush1.bf16.msra.mxu0 %v8394_v10  ;;  %5931 = vmatpush1.bf16.msra.mxu1 %v8397_v11  ;;  %v8484_v10 = vld [vmem:[%s11180_s1 + $0x17e0] ss:$16 sps:$4 sm:$0xff]   ;;  %v8487_v11 = vld [vmem:[%s11180_s1 + $0x17e8] ss:$16 sps:$4 sm:$0xff]  }
 0x2c4   :  { %5399 = vmatprep.subr.bf16.mxu0 %v8402_v12  ;;  %5932 = vmatprep.subr.bf16.mxu1 %v8405_v0  ;;  %v8492_v12 = vld [vmem:[%s11180_s1 + $0x1804] ss:$16 sps:$4 sm:$0xff]   ;;  %v8495_v0 = vld [vmem:[%s11180_s1 + $0x180c] ss:$16 sps:$4 sm:$0xff]  }
 0x2c5   :  { %5429 = vmatprep.mubr.bf16.mxu0 %v983_v52  ;;  %5962 = vmatprep.mubr.bf16.mxu1 %v983_v52  ;;  %v981_v52 = vcombine.high %v10825_v9, %v10825_v9  ;;  %v8501_v9 = vld [vmem:[%s11180_s1 + $0x182c] ss:$16 sps:$4 sm:$0xff]  }
 0x2c7   :  { %5400 = vmatpush1.bf16.msra.mxu0 %v8400_v15  ;;  %5933 = vmatpush1.bf16.msra.mxu1 %v8403_v16  ;;  %v8490_v15 = vld [vmem:[%s11180_s1 + $0x1800] ss:$16 sps:$4 sm:$0xff]   ;;  %v8493_v16 = vld [vmem:[%s11180_s1 + $0x1808] ss:$16 sps:$4 sm:$0xff]  }
 0x2c8   :  { %5401 = vmatprep.subr.bf16.mxu0 %v8408_v8  ;;  %5934 = vmatprep.subr.bf16.mxu1 %v8411_v17  ;;  %v8498_v8 = vld [vmem:[%s11180_s1 + $0x1824] ss:$16 sps:$4 sm:$0xff]   ;;  %v8496_v17 = vld [vmem:[%s11180_s1 + $0x1820] ss:$16 sps:$4 sm:$0xff]  }
 0x2cb   :  { %5402 = vmatpush1.bf16.msra.mxu0 %v8406_v18  ;;  %5935 = vmatpush1.bf16.msra.mxu1 %v8409_v19  ;;  %v8499_v18 = vld [vmem:[%s11180_s1 + $0x1828] ss:$16 sps:$4 sm:$0xff]   ;;  %v8504_v19 = vld [vmem:[%s11180_s1 + $0x1844] ss:$16 sps:$4 sm:$0xff]  }
 0x2cc   :  { %5403 = vmatprep.subr.bf16.mxu0 %v8414_v20  ;;  %5936 = vmatprep.subr.bf16.mxu1 %v8417_v22  ;;  %v8507_v20 = vld [vmem:[%s11180_s1 + $0x184c] ss:$16 sps:$4 sm:$0xff]   ;;  %v8549_v22 = vmov 0  }
 0x2cf   :  { %5404 = vmatpush1.bf16.msra.mxu0 %v8412_v23  ;;  %5937 = vmatpush1.bf16.msra.mxu1 %v8415_v24  ;;  %v8502_v23 = vld [vmem:[%s11180_s1 + $0x1840] ss:$16 sps:$4 sm:$0xff]   ;;  %v8505_v24 = vld [vmem:[%s11180_s1 + $0x1848] ss:$16 sps:$4 sm:$0xff]  }
 0x2d0   :  { %5405 = vmatprep.subr.bf16.mxu0 %v8420_v13  ;;  %5938 = vmatprep.subr.bf16.mxu1 %v8423_v27  ;;  %v8510_v13 = vld [vmem:[%s11180_s1 + $0x1864] ss:$16 sps:$4 sm:$0xff]   ;;  %v8513_v27 = vld [vmem:[%s11180_s1 + $0x186c] ss:$16 sps:$4 sm:$0xff]  }
 0x2d3   :  { %5406 = vmatpush1.bf16.msra.mxu0 %v8418_v28  ;;  %5939 = vmatpush1.bf16.msra.mxu1 %v8421_v29  ;;  %v8508_v28 = vld [vmem:[%s11180_s1 + $0x1860] ss:$16 sps:$4 sm:$0xff]   ;;  %v8511_v29 = vld [vmem:[%s11180_s1 + $0x1868] ss:$16 sps:$4 sm:$0xff]  }
 0x2d4   :  { %5407 = vmatprep.subr.bf16.mxu0 %v8426_v14  ;;  %5940 = vmatprep.subr.bf16.mxu1 %v8429_v30  ;;  %v6369_v14 = vld.sshfl [vmem:[%s11181_s0 + $0x18] sm:$0x1 pattern:$0x75316420]  ;;  %v8514_v30 = vld [vmem:[%s11182_s3 + $0x40] sm:$0xff]  }
 0x2d7   :  { %5408 = vmatpush1.bf16.msra.mxu0 %v8424_v31  ;;  %5941 = vmatpush1.bf16.msra.mxu1 %v8427_v25  ;;  %v8515_v31 = vld [vmem:[%s11182_s3 + $0xc0] sm:$0xff]   ;;  %v997_v25 = vrot.slane %v6369_v14, %v8715_v49  ;;  %v8519_v49 = vld [vmem:[%s11182_s3 + $0xc8] sm:$0xff]  }
 0x2d8   :  { %5409 = vmatprep.subr.bf16.mxu0 %v8432_v32  ;;  %5942 = vmatprep.subr.bf16.mxu1 %v8435_v33  ;;  %v8516_v32 = vld [vmem:[%s11182_s3] sm:$0xff]  }
 0x2d9   :  { %v8517_v33 = vld [vmem:[%s11182_s3 + $0x80] sm:$0xff]  }
 0x2db   :  { %5410 = vmatpush1.bf16.msra.mxu0 %v8430_v26  ;;  %5943 = vmatpush1.bf16.msra.mxu1 %v8433_v36  ;;  %v8518_v26 = vld [vmem:[%s11182_s3 + $0x48] sm:$0xff]  }
 0x2dc   :  { %5411 = vmatprep.subr.bf16.mxu0 %v8438_v37  ;;  %5944 = vmatprep.subr.bf16.mxu1 %v8441_v21  ;;  %v8520_v36 = vld [vmem:[%s11182_s3 + $0x8] sm:$0xff]   ;;  %v8522_v21 = vld [vmem:[%s11182_s3 + $0x50] sm:$0xff]  }
 0x2dd   :  { %v8521_v37 = vld [vmem:[%s11182_s3 + $0x88] sm:$0xff]  }
 0x2df   :  { %5412 = vmatpush1.bf16.msra.mxu0 %v8436_v39  ;;  %5945 = vmatpush1.bf16.msra.mxu1 %v8439_v40  ;;  %v8523_v39 = vld [vmem:[%s11182_s3 + $0xd0] sm:$0xff]  }
 0x2e0   :  { %5413 = vmatprep.subr.bf16.mxu0 %v8444_v41  ;;  %5946 = vmatprep.subr.bf16.mxu1 %v8447_v34  ;;  %v8524_v40 = vld [vmem:[%s11182_s3 + $0x10] sm:$0xff]   ;;  %v8526_v34 = vld [vmem:[%s11182_s3 + $0x58] sm:$0xff]  }
 0x2e1   :  { %v8525_v41 = vld [vmem:[%s11182_s3 + $0x90] sm:$0xff]  }
 0x2e3   :  { %5414 = vmatpush1.bf16.msra.mxu0 %v8442_v43  ;;  %5947 = vmatpush1.bf16.msra.mxu1 %v8445_v45  ;;  %v8527_v43 = vld [vmem:[%s11182_s3 + $0xd8] sm:$0xff]  }
 0x2e4   :  { %5415 = vmatprep.subr.bf16.mxu0 %v8450_v46  ;;  %5948 = vmatprep.subr.bf16.mxu1 %v8453_v35  ;;  %v8528_v45 = vld [vmem:[%s11182_s3 + $0x18] sm:$0xff]   ;;  %v8530_v35 = vld [vmem:[%s11182_s3 + $0x60] sm:$0xff]  }
 0x2e5   :  { %v8529_v46 = vld [vmem:[%s11182_s3 + $0x98] sm:$0xff]  }
 0x2e7   :  { %5416 = vmatpush1.bf16.msra.mxu0 %v8448_v50  ;;  %5949 = vmatpush1.bf16.msra.mxu1 %v8451_v53  ;;  %v8531_v50 = vld [vmem:[%s11182_s3 + $0xe0] sm:$0xff]  }
 0x2e8   :  { %5417 = vmatprep.subr.bf16.mxu0 %v8456_v38  ;;  %5950 = vmatprep.subr.bf16.mxu1 %v8459_v54  ;;  %v8532_v53 = vld [vmem:[%s11182_s3 + $0x20] sm:$0xff]   ;;  %v8534_v54 = vld [vmem:[%s11182_s3 + $0x68] sm:$0xff]  }
 0x2e9   :  { %v8533_v38 = vld [vmem:[%s11182_s3 + $0xa0] sm:$0xff]  }
 0x2eb   :  { %5418 = vmatpush1.bf16.msra.mxu0 %v8454_v55  ;;  %5951 = vmatpush1.bf16.msra.mxu1 %v8457_v56  ;;  %v8535_v55 = vld [vmem:[%s11182_s3 + $0xe8] sm:$0xff]  }
 0x2ec   :  { %5419 = vmatprep.subr.bf16.mxu0 %v8462_v47  ;;  %5952 = vmatprep.subr.bf16.mxu1 %v8465_v57  ;;  %v8536_v56 = vld [vmem:[%s11182_s3 + $0x28] sm:$0xff]   ;;  %v8538_v57 = vld [vmem:[%s11182_s3 + $0x70] sm:$0xff]  }
 0x2ed   :  { %v8537_v47 = vld [vmem:[%s11182_s3 + $0xa8] sm:$0xff]  }
 0x2ef   :  { %5420 = vmatpush1.bf16.msra.mxu0 %v8460_v58  ;;  %5953 = vmatpush1.bf16.msra.mxu1 %v8463_v59  ;;  %v8539_v58 = vld [vmem:[%s11182_s3 + $0xf0] sm:$0xff]  }
 0x2f0   :  { %5421 = vmatprep.subr.bf16.mxu0 %v8468_v48  ;;  %5954 = vmatprep.subr.bf16.mxu1 %v8471_v61  ;;  %v8540_v59 = vld [vmem:[%s11182_s3 + $0x30] sm:$0xff]   ;;  %v8542_v61 = vld [vmem:[%s11182_s3 + $0x78] sm:$0xff]  }
 0x2f1   :  { %v8541_v48 = vld [vmem:[%s11182_s3 + $0xb0] sm:$0xff]  }
 0x2f3   :  { %5422 = vmatpush1.bf16.msra.mxu0 %v8466_v63  ;;  %5955 = vmatpush1.bf16.msra.mxu1 %v8469_v44  ;;  %v8543_v63 = vld [vmem:[%s11182_s3 + $0xf8] sm:$0xff]  }
 0x2f4   :  { %5423 = vmatprep.subr.bf16.mxu0 %v8474_v1  ;;  %5956 = vmatprep.subr.bf16.mxu1 %v8477_v51  ;;  %v8544_v44 = vld [vmem:[%s11182_s3 + $0x38] sm:$0xff]   ;;  %v815_v51 = vsub.s32 0, %v8697_v42 }
 0x2f5   :  { %v8545_v1 = vld [vmem:[%s11182_s3 + $0xb8] sm:$0xff]  }
 0x2f7   :  { %5424 = vmatpush1.bf16.msra.mxu0 %v8472_v2  ;;  %5957 = vmatpush1.bf16.msra.mxu1 %v8475_v3  ;;  %v823_v2 = vsub.s32 2, %v8697_v42  ;;  %v811_v3 = vld [vmem:[%s11183_s2] sm:$0xf] }
 0x2f8   :  { %5425 = vmatprep.subr.bf16.mxu0 %v8480_v4  ;;  %5958 = vmatprep.subr.bf16.mxu1 %v8483_v60  ;;  %v819_v4 = vsub.s32 1, %v8697_v42  ;;  %v827_v60 = vsub.s32 3, %v8697_v42 }
 0x2fb   :  { %5426 = vmatpush1.bf16.msra.mxu0 %v8478_v5  ;;  %5959 = vmatpush1.bf16.msra.mxu1 %v8481_v6  ;;  %v816_v5 = vrot.slane %v811_v3, %v815_v51  ;;  %v824_v6 = vrot.slane %v811_v3, %v823_v2 }
 0x2fc   :  { %5427 = vmatprep.subr.bf16.mxu0 %v8486_v7  ;;  %5960 = vmatprep.subr.bf16.mxu1 %v8489_v62  ;;  %v820_v7 = vrot.slane %v811_v3, %v819_v4  ;;  %v828_v62 = vrot.slane %v811_v3, %v827_v60 }
 0x2ff   :  { %5428 = vmatpush1.bf16.msra.mxu0 %v8484_v10  ;;  %5961 = vmatpush1.bf16.msra.mxu1 %v8487_v11 }
 0x300   :  { %5438 = vmatprep.subr.bf16.mxu0 %v8492_v12  ;;  %5971 = vmatprep.subr.bf16.mxu1 %v8495_v0 }
 0x302   :  { %5430 = vmatmul.mubr.bf16.vlgmr.msra.gmra.mrb[0].mxu0 %v981_v52  ;;  %5963 = vmatmul.mubr.bf16.vlgmr.msra.gmra.mrb[0].mxu1 %v981_v52 }
 0x303   :  { %5439 = vmatpush1.bf16.msra.mxu0 %v8490_v15  ;;  %5972 = vmatpush1.bf16.msra.mxu1 %v8493_v16 }
 0x304   :  { %5440 = vmatprep.subr.bf16.mxu0 %v8498_v8  ;;  %5973 = vmatprep.subr.bf16.mxu1 %v8501_v9 }
 0x305   :  { %5470 = vmatprep.mubr.bf16.mxu0 %v8549_v22  ;;  %6003 = vmatprep.mubr.bf16.mxu1 %v8549_v22 }
 0x307   :  { %5441 = vmatpush1.bf16.msra.mxu0 %v8496_v17  ;;  %5974 = vmatpush1.bf16.msra.mxu1 %v8499_v18 }
 0x308   :  { %5442 = vmatprep.subr.bf16.mxu0 %v8504_v19  ;;  %5975 = vmatprep.subr.bf16.mxu1 %v8507_v20 }
 0x30b   :  { %5443 = vmatpush1.bf16.msra.mxu0 %v8502_v23  ;;  %5976 = vmatpush1.bf16.msra.mxu1 %v8505_v24 }
 0x30c   :  { %5444 = vmatprep.subr.bf16.mxu0 %v8510_v13  ;;  %5977 = vmatprep.subr.bf16.mxu1 %v8513_v27 }
 0x30f   :  { %5445 = vmatpush1.bf16.msra.mxu0 %v8508_v28  ;;  %5978 = vmatpush1.bf16.msra.mxu1 %v8511_v29  ;;  %v10_v29 = vstv %s11184_s4 }
 0x310   :  { %7189 = vmatprep.subr.bf16.mxu0 %v8514_v30  ;;  %7211 = vmatprep.subr.bf16.mxu1 %v8515_v31  ;;  %11 = vst [vmem:[#allocation2] sm:$0x1] %v10_v29 }
 0x312   :  { %7154 = vmatmul.mubr.msk.bf16.vlgmr.msra.gmra.mrb[0].mxu0 %vm4942_vm0, %v997_v25  ;;  %7155 = vmatmul.mubr.msk.bf16.vlgmr.msra.gmra.mrb[0].mxu1 %vm4942_vm0, %v997_v25 }
 0x313   :  { %7190 = vmatpush3.bf16.msra.mxu0 %v8516_v32  ;;  %7212 = vmatpush3.bf16.msra.mxu1 %v8517_v33 }
 0x314   :  { %7191 = vmatprep.subr.bf16.mxu0 %v8518_v26  ;;  %7213 = vmatprep.subr.bf16.mxu1 %v8519_v49 }
 0x317   :  { %7192 = vmatpush3.bf16.msra.mxu0 %v8520_v36  ;;  %7214 = vmatpush3.bf16.msra.mxu1 %v8521_v37  ;;  %v7156_v31 = vld [vmem:[#allocation2] ss:$0 sm:$0xff] }
 0x318   :  { %7193 = vmatprep.subr.bf16.mxu0 %v8522_v21  ;;  %7215 = vmatprep.subr.bf16.mxu1 %v8523_v39 }
 0x31b   :  { %7194 = vmatpush3.bf16.msra.mxu0 %v8524_v40  ;;  %7216 = vmatpush3.bf16.msra.mxu1 %v8525_v41 }
 0x31c   :  { %7195 = vmatprep.subr.bf16.mxu0 %v8526_v34  ;;  %7217 = vmatprep.subr.bf16.mxu1 %v8527_v43 }
 0x31f   :  { %7196 = vmatpush3.bf16.msra.mxu0 %v8528_v45  ;;  %7218 = vmatpush3.bf16.msra.mxu1 %v8529_v46 }
 0x320   :  { %7197 = vmatprep.subr.bf16.mxu0 %v8530_v35  ;;  %7219 = vmatprep.subr.bf16.mxu1 %v8531_v50 }
 0x323   :  { %7198 = vmatpush3.bf16.msra.mxu0 %v8532_v53  ;;  %7220 = vmatpush3.bf16.msra.mxu1 %v8533_v38 }
 0x324   :  { %7199 = vmatprep.subr.bf16.mxu0 %v8534_v54  ;;  %7221 = vmatprep.subr.bf16.mxu1 %v8535_v55 }
 0x327   :  { %7200 = vmatpush3.bf16.msra.mxu0 %v8536_v56  ;;  %7222 = vmatpush3.bf16.msra.mxu1 %v8537_v47 }
 0x328   :  { %7201 = vmatprep.subr.bf16.mxu0 %v8538_v57  ;;  %7223 = vmatprep.subr.bf16.mxu1 %v8539_v58 }
 0x32b   :  { %7202 = vmatpush3.bf16.msra.mxu0 %v8540_v59  ;;  %7224 = vmatpush3.bf16.msra.mxu1 %v8541_v48 }
 0x32c   :  { %7203 = vmatprep.subr.bf16.mxu0 %v8542_v61  ;;  %7225 = vmatprep.subr.bf16.mxu1 %v8543_v63 }
 0x32f   :  { %7204 = vmatpush3.bf16.msra.mxu0 %v8544_v44  ;;  %7226 = vmatpush3.bf16.msra.mxu1 %v8545_v1 }
 0x3e5   :  { %v5472_v10 = vpop.f32.mrb[0].mxu0  ;;  %v6005_v11 = vpop.f32.mrb[0].mxu1 }
 0x3e6   :  { %v7233_v12 = vadd.f32 %v5472_v10, %v816_v5  ;;  %v7235_v0 = vadd.f32 %v6005_v11, %v824_v6  ;;  %v5474_v52 = vpop.f32.mrb[1].mxu0  ;;  %v6007_v15 = vpop.f32.mrb[1].mxu1 }
 0x3e7   :  { %v7234_v16 = vadd.f32 %v5474_v52, %v820_v7  ;;  %v7236_v8 = vadd.f32 %v6007_v15, %v828_v62  ;;  %v5476_v9 = vpop.f32.mrb[2].mxu0  ;;  %v6009_v17 = vpop.f32.mrb[2].mxu1 }
 0x3e8   :  { %v6012_v18 = vmax.f32 %v7233_v12, 0.0  ;;  %v6014_v19 = vmax.f32 %v7235_v0, 0.0  ;;  %v5477_v20 = vpop.f32.mrb[3].mxu0  ;;  %v6010_v22 = vpop.f32.mrb[3].mxu1 }
 0x3e9   :  { %v6013_v23 = vmax.f32 %v7234_v16, 0.0  ;;  %v6015_v42 = vmax.f32 %v7236_v8, 0.0 }
 0x3ea   :  { %v6016_v27 = vpack.c.bf16 %v6012_v18, %v6012_v18  ;;  %v6018_v28 = vpack.c.bf16 %v6014_v19, %v6014_v19 }
 0x3eb   :  { %v6017_v24 = vpack.c.bf16 %v6013_v23, %v6013_v23  ;;  %v6019_v13 = vpack.c.bf16 %v6015_v42, %v6015_v42 }
 0x3ed   :  { %6315 = vmatprep.mubr.bf16.mxu0 %v6017_v24  ;;  %6355 = vmatprep.mubr.bf16.mxu1 %v6019_v13 }
 0x3ee   :  { %6316 = vmatmul.mubr.bf16.vlgmr.msra.gmra.mrb[4].mxu0 %v6016_v27  ;;  %6356 = vmatmul.mubr.bf16.vlgmr.msra.gmra.mrb[4].mxu1 %v6018_v28 }
 0x4c1   :  { %v7205_v14 = vpop.f32.mrb[4].mxu0  ;;  %v7227_v30 = vpop.f32.mrb[4].mxu1 }
 0x4c2   :  { %v7206_v25 = vpop.f32.mrb[5].mxu0  ;;  %v7228_v32 = vpop.f32.mrb[5].mxu1 }
 0x4c3   :  { %v7207_v33 = vadd.f32 %v7206_v25, %v7205_v14  ;;  %v7229_v26 = vadd.f32 %v7228_v32, %v7227_v30  ;;  %v7208_v49 = vpop.f32.mrb[6].mxu0  ;;  %v7230_v36 = vpop.f32.mrb[6].mxu1 }
 0x4c4   :  { %v7209_v37 = vpop.f32.mrb[7].mxu0  ;;  %v7231_v21 = vpop.f32.mrb[7].mxu1 }
 0x4c5   :  { %v6318_v39 = vadd.f32 %v7207_v33, %v7156_v31 }
 0x4c7   :  { %v6358_v40 = vadd.f32 %v7229_v26, %v6318_v39 }
 0x4c9   :  { %6364 = vst.msk [vmem:[%s11185_s5] sm:$0x3] %vm6363_vm1, %v6358_v40 }

</bundles_post_ra>
